<compile_context>
chip_gen: v7x
topology: tpu7x:2x2x1
jax: 0.10.0
libtpu: 0.0.40
codegen_flags: <defaults>
</compile_context>

<pallas_src>
import functools

import numpy as np
import jax
import jax.numpy as jnp
from jax import lax
from jax.experimental import pallas as pl
from jax.experimental.pallas import tpu as pltpu

_CHUNK = 64                      # conv position-chunk rows -> 8-vreg accumulator

# cA (width-128 constant slab) row offsets
_ROW_W1, _ROW_B1, _ROW_W2, _ROW_B2 = 0, 9, 10, 19
# cB (width-n2 constant slab) row offsets
_ROW_MASK, _ROW_B3, _ROW_FC1B, _ROW_FC2B = 0, 16, 17, 18
# fc-weight slab row offsets
_ROW_FC1W, _ROW_FC2W = 0, 256


def _round_up(n, m):
    return (n + m - 1) // m * m


def _plan(H, W):
    """Static row-budget plan shared by prepare_params() and forward()."""
    assert H >= 7 and W >= 7, "conv chain needs at least 7x7 input"
    OH3, OW3 = H - 6, W - 6
    # last y2 flat row carrying nonzero pooling weight
    max_mask_row = (OH3 + 1) * W + (OW3 + 1)
    cw = max(256, _round_up(max_mask_row + 1, 8))   # >=256 so b3 fits in the cB slab
    n2 = _round_up(cw, _CHUNK)                      # y2 rows: all must be finite
    cw = n2                                         # stage-1 K == cB width == y2 rows
    span = _CHUNK + 2 * W                           # per-chunk source window
    n1 = _round_up((n2 - _CHUNK) + 2 + span, _CHUNK)  # y1 rows read by last conv2 chunk
    nx = _round_up((n1 - _CHUNK) + 2 + span, 8)       # x rows read by last conv1 chunk
    return dict(OH3=OH3, OW3=OW3, cw=cw, n2=n2, n1=n1, nx=nx)


# ---------------------------------------------------------------------------
# Fused kernel: entire forward pass, single invocation, fully VMEM resident.
# ---------------------------------------------------------------------------
def _fused_forward_kernel(W, n1, n2, inv_count,
                          x_ref, ca_ref, cb_ref, fcw_hbm, w3_hbm,
                          o_ref,
                          xb_ref, y1_ref, y2_ref, w3_vmem, fcw_vmem, sem):
    # Kick off the two big weight DMAs immediately so they overlap conv1/conv2.
    w3_cp = pltpu.make_async_copy(w3_hbm, w3_vmem, sem.at[0])
    fc_cp = pltpu.make_async_copy(fcw_hbm, fcw_vmem, sem.at[1])
    w3_cp.start()
    fc_cp.start()

    nx = xb_ref.shape[0]
    span = _CHUNK + 2 * W

    # Broadcast the single input channel to all 128 lanes ONCE (hoisted out of
    # the 9-tap loop; Mosaic does not CSE broadcasts).
    xb_ref[...] = jnp.broadcast_to(x_ref[...], (nx, 128))

    def conv3x3_relu(src_ref, dst_ref, w_row, b_row, n_out):
        """Lane-parallel 3x3 conv on a flat (position, 128-channel) slab.

        Rows are chunked so the accumulator stays in vregs; per (chunk, j) one
        span-row ref slice is loaded and the three i-offsets are vreg-aligned
        value slices of it.
        """
        w9 = ca_ref[pl.ds(w_row, 9), :]          # (9, 128)
        b = ca_ref[pl.ds(b_row, 1), :]           # (1, 128)
        for c0 in range(0, n_out, _CHUNK):
            acc = jnp.zeros((_CHUNK, 128), jnp.float32)
            for j in range(3):
                big = src_ref[pl.ds(c0 + j, span), :]               # (span, 128)
                for i in range(3):
                    acc = acc + (big[i * W:i * W + _CHUNK, :] *
                                 w9[3 * i + j:3 * i + j + 1, :])
            dst_ref[pl.ds(c0, _CHUNK), :] = jnp.maximum(acc + b, 0.0)

    # Conv2d(1,32,3)+ReLU   (32 output channels pre-replicated x4 across lanes)
    conv3x3_relu(xb_ref, y1_ref, _ROW_W1, _ROW_B1, n1)
    # Conv2d(32,128,3,groups=32)+ReLU  == depthwise thanks to the x4 replication
    conv3x3_relu(y1_ref, y2_ref, _ROW_W2, _ROW_B2, n2)

    # ---- Conv2d(128,250,3) folded with AdaptiveAvgPool2d(1) -----------------
    w3_cp.wait()
    # Stage 1: ONE (16, n2)@(n2, 128) matmul against 9 shifted {0,1} masks
    # (stacked on sublanes, exact in bf16) replaces nine M=1 matvecs.
    mask9 = cb_ref[pl.ds(_ROW_MASK, 16), :].astype(jnp.bfloat16)
    y2b = y2_ref[...].astype(jnp.bfloat16)
    m16 = jnp.dot(mask9, y2b, preferred_element_type=jnp.float32) * inv_count

    # Stage 2: per-tap (1,128)@(128,250) against bf16 w3, f32 accumulation.
    pooled = cb_ref[pl.ds(_ROW_B3, 1), :][:, :250]                  # b3 (1,250)
    for t in range(9):
        pooled = pooled + jnp.dot(m16[t:t + 1, :].astype(jnp.bfloat16),
                                  w3_vmem[pl.ds(t * 128, 128), :],
                                  preferred_element_type=jnp.float32)

    # ---- Linear(250,64) + ReLU + Linear(64,10) -------------------------------
    fc_cp.wait()
    h = jnp.dot(pooled, fcw_vmem[pl.ds(_ROW_FC1W, 250), :],
                preferred_element_type=jnp.float32)
    h = jnp.maximum(h + cb_ref[pl.ds(_ROW_FC1B, 1), :][:, :64], 0.0)
    out = jnp.dot(h, fcw_vmem[pl.ds(_ROW_FC2W, 64), :],
                  preferred_element_type=jnp.float32)
    o_ref[...] = out[:, :10] + cb_ref[pl.ds(_ROW_FC2B, 1), :][:, :10]


# ---------------------------------------------------------------------------
# Wrapper: one-time weight repack + the fused pallas_call.
# ---------------------------------------------------------------------------
def prepare_params(params, H, W, w3_dtype=jnp.bfloat16):
    """One-time repack of PyTorch-layout weights into packed kernel slabs."""
    p = _plan(H, W)
    cw, OH3, OW3 = p["cw"], p["OH3"], p["OW3"]

    # cA (20,128): conv1 weights replicated x4 (grouped conv -> depthwise), conv2.
    w1 = params["w1"].reshape(32, 9)
    w2 = params["w2"].reshape(128, 9)
    cA = jnp.concatenate([
        jnp.repeat(w1, 4, axis=0).T,                  # rows 0..8   (9,128)
        jnp.repeat(params["b1"], 4)[None, :],         # row  9
        w2.T,                                         # rows 10..18
        params["b2"][None, :],                        # row  19
    ], axis=0)

    # cB (19, cw): 9 shifted pooling masks ({0,1}) + b3 + fc biases.
    pos = np.arange(cw)
    ph, pw = pos // W, pos % W
    mask = np.zeros((16, cw), np.float32)
    for t in range(9):
        i, j = t // 3, t % 3
        ok = (ph >= i) & (ph < OH3 + i) & (pw >= j) & (pw < OW3 + j)
        mask[t] = ok.astype(np.float32)

    def row(vec):
        r = jnp.zeros((1, cw), jnp.float32)
        return r.at[0, :vec.shape[0]].set(vec)

    cB = jnp.concatenate([jnp.asarray(mask),
                          row(params["b3"]),
                          row(params["fc1_b"]),
                          row(params["fc2_b"])], axis=0)

    # fc-weight slab (320, 64): rows 0..249 fc1_w^T, rows 256..319 fc2_w^T (padded).
    fcw = jnp.zeros((320, 64), jnp.float32)
    fcw = fcw.at[:250, :].set(params["fc1_w"].T)
    fcw = fcw.at[256:320, :10].set(params["fc2_w"].T)

    # w3 as [(tap, cin), cout] in bf16 (halves the dominant HBM->VMEM DMA).
    w3 = params["w3"].transpose(2, 3, 1, 0).reshape(9 * 128, 250).astype(w3_dtype)

    return {"cA": cA, "cB": cB, "fcw": fcw, "w3": w3}


def forward(prep, x):
    # x: (1, 1, H, W) NCHW; batch must be 1 (implied by the PyTorch .flatten()).
    assert x.shape[0] == 1 and x.shape[1] == 1, "module's flatten implies batch=1, cin=1"
    H, W = x.shape[-2], x.shape[-1]
    p = _plan(H, W)
    nx, n1, n2 = p["nx"], p["n1"], p["n2"]
    inv_count = 1.0 / float(p["OH3"] * p["OW3"])

    x_flat = jnp.pad(x.reshape(H * W, 1), ((0, nx - H * W), (0, 0)))

    kernel = functools.partial(_fused_forward_kernel, W, n1, n2, inv_count)
    vmem = pl.BlockSpec(memory_space=pltpu.MemorySpace.VMEM)
    out = pl.pallas_call(
        kernel,
        out_shape=jax.ShapeDtypeStruct((1, 10), jnp.float32),
        in_specs=[vmem,                                   # x_flat
                  vmem,                                   # cA
                  vmem,                                   # cB
                  pl.BlockSpec(memory_space=pl.ANY),      # fc weights (manual DMA)
                  pl.BlockSpec(memory_space=pl.ANY)],     # w3         (manual DMA)
        out_specs=vmem,
        scratch_shapes=[pltpu.VMEM((nx, 128), jnp.float32),   # broadcast input slab
                        pltpu.VMEM((n1, 128), jnp.float32),   # conv1 slab
                        pltpu.VMEM((n2, 128), jnp.float32),   # conv2 slab
                        pltpu.VMEM(prep["w3"].shape, prep["w3"].dtype),
                        pltpu.VMEM(prep["fcw"].shape, jnp.float32),
                        pltpu.SemaphoreType.DMA((2,))],
    )(x_flat, prep["cA"], prep["cB"], prep["fcw"], prep["w3"])
    return out[0]                                          # (10,)


# ---------------------------------------------------------------------------
# Parameter init (PyTorch-like) and a pure-JAX reference for verification.
# ---------------------------------------------------------------------------
def init_params(key):
    ks = jax.random.split(key, 10)

    def u(k, shape, fan_in):
        bound = 1.0 / float(fan_in) ** 0.5
        return jax.random.uniform(k, shape, jnp.float32, -bound, bound)

    return {
        "w1": u(ks[0], (32, 1, 3, 3), 1 * 9),      "b1": u(ks[1], (32,), 1 * 9),
        "w2": u(ks[2], (128, 1, 3, 3), 1 * 9),     "b2": u(ks[3], (128,), 1 * 9),
        "w3": u(ks[4], (250, 128, 3, 3), 128 * 9), "b3": u(ks[5], (250,), 128 * 9),
        "fc1_w": u(ks[6], (64, 250), 250), "fc1_b": u(ks[7], (64,), 250),
        "fc2_w": u(ks[8], (10, 64), 64),   "fc2_b": u(ks[9], (10,), 64),
    }


def reference(params, x):
    dn = ("NCHW", "OIHW", "NCHW")
    y = lax.conv_general_dilated(x, params["w1"], (1, 1), "VALID", dimension_numbers=dn)
    y = jnp.maximum(y + params["b1"][None, :, None, None], 0.0)
    y = lax.conv_general_dilated(y, params["w2"], (1, 1), "VALID",
                                 dimension_numbers=dn, feature_group_count=32)
    y = jnp.maximum(y + params["b2"][None, :, None, None], 0.0)
    y = lax.conv_general_dilated(y, params["w3"], (1, 1), "VALID", dimension_numbers=dn)
    y = y + params["b3"][None, :, None, None]
    pooled = jnp.mean(y, axis=(2, 3)).reshape(-1)          # (250,)
    h = jnp.maximum(pooled @ params["fc1_w"].T + params["fc1_b"], 0.0)
    return h @ params["fc2_w"].T + params["fc2_b"]


if __name__ == "__main__":
    key = jax.random.PRNGKey(0)
    pkey, xkey = jax.random.split(key)
    params = init_params(pkey)
    x = jax.random.normal(xkey, (1, 1, 16, 16), jnp.float32)  # NCHW, batch must be 1

    prep = prepare_params(params, 16, 16)       # one-time weight repack (off the hot path)
    fwd = jax.jit(forward)

    out = jax.block_until_ready(fwd(prep, x))
    assert out.shape == (10,)

    ref = reference(params, x)
    assert jnp.allclose(out, ref, rtol=1e-2, atol=1e-2), (out, ref)
    print("KERNEL_OK")
</pallas_src>

<mosaic_0001>
module attributes {stable_mosaic.version = 11 : i64} {
  func.func @_fused_forward_kernel(%arg0: memref<360x1xf32, #tpu.memory_space<vmem>>, %arg1: memref<20x128xf32, #tpu.memory_space<vmem>>, %arg2: memref<19x256xf32, #tpu.memory_space<vmem>>, %arg3: memref<320x64xf32, #tpu.memory_space<any>>, %arg4: memref<1152x250xbf16, #tpu.memory_space<any>>, %arg5: memref<1x10xf32, #tpu.memory_space<vmem>>, %arg6: memref<360x128xf32, #tpu.memory_space<vmem>>, %arg7: memref<320x128xf32, #tpu.memory_space<vmem>>, %arg8: memref<256x128xf32, #tpu.memory_space<vmem>>, %arg9: memref<1152x250xbf16, #tpu.memory_space<vmem>>, %arg10: memref<320x64xf32, #tpu.memory_space<vmem>>, %arg11: memref<2x!tpu.dma_semaphore, #tpu.memory_space<semaphore_mem>>) attributes {dimension_semantics = [], scalar_prefetch = 0 : i64, scratch_operands = 6 : i64, tpu.core_type = #tpu.core_type<tc>} {
    %c0_i32 = arith.constant 0 : i32
    %0 = tpu.memref_slice %arg11[%c0_i32] : memref<2x!tpu.dma_semaphore, #tpu.memory_space<semaphore_mem>> -> memref<1x!tpu.dma_semaphore, #tpu.memory_space<semaphore_mem>>
    %1 = tpu.memref_squeeze %0 : memref<1x!tpu.dma_semaphore, #tpu.memory_space<semaphore_mem>> -> memref<!tpu.dma_semaphore, #tpu.memory_space<semaphore_mem>>
    tpu.enqueue_dma source(%arg4 : memref<1152x250xbf16, #tpu.memory_space<any>>) target(%arg9 : memref<1152x250xbf16, #tpu.memory_space<vmem>>) target_semaphore(%1 : memref<!tpu.dma_semaphore, #tpu.memory_space<semaphore_mem>>)
    %c1_i32 = arith.constant 1 : i32
    %2 = tpu.memref_slice %arg11[%c1_i32] : memref<2x!tpu.dma_semaphore, #tpu.memory_space<semaphore_mem>> -> memref<1x!tpu.dma_semaphore, #tpu.memory_space<semaphore_mem>>
    %3 = tpu.memref_squeeze %2 : memref<1x!tpu.dma_semaphore, #tpu.memory_space<semaphore_mem>> -> memref<!tpu.dma_semaphore, #tpu.memory_space<semaphore_mem>>
    tpu.enqueue_dma source(%arg3 : memref<320x64xf32, #tpu.memory_space<any>>) target(%arg10 : memref<320x64xf32, #tpu.memory_space<vmem>>) target_semaphore(%3 : memref<!tpu.dma_semaphore, #tpu.memory_space<semaphore_mem>>)
    %c0 = arith.constant 0 : index
    %c0_0 = arith.constant 0 : index
    %4 = vector.load %arg0[%c0, %c0_0] : memref<360x1xf32, #tpu.memory_space<vmem>>, vector<360x1xf32>
    %5 = vector.shape_cast %4 : vector<360x1xf32> to vector<360x1xf32>
    %6 = vector.broadcast %5 : vector<360x1xf32> to vector<360x128xf32>
    %c0_1 = arith.constant 0 : index
    %c0_2 = arith.constant 0 : index
    %7 = vector.load %arg6[%c0_1, %c0_2] : memref<360x128xf32, #tpu.memory_space<vmem>>, vector<360x128xf32>
    tpu.vector_store %arg6[%c0_1, %c0_2], %6 {strides = array<i32>} : memref<360x128xf32, #tpu.memory_space<vmem>>, vector<360x128xf32>,
    %c0_3 = arith.constant 0 : index
    %c0_4 = arith.constant 0 : index
    %8 = vector.load %arg1[%c0_3, %c0_4] : memref<20x128xf32, #tpu.memory_space<vmem>>, vector<9x128xf32>
    %c9 = arith.constant 9 : index
    %c0_5 = arith.constant 0 : index
    %9 = vector.load %arg1[%c9, %c0_5] : memref<20x128xf32, #tpu.memory_space<vmem>>, vector<1x128xf32>
    %cst = arith.constant 0.000000e+00 : f32
    %10 = vector.broadcast %cst : f32 to vector<64x128xf32>
    %c0_6 = arith.constant 0 : index
    %c0_7 = arith.constant 0 : index
    %11 = vector.load %arg6[%c0_6, %c0_7] : memref<360x128xf32, #tpu.memory_space<vmem>>, vector<96x128xf32>
    %12 = vector.extract_strided_slice %11 {offsets = [0, 0], sizes = [64, 128], strides = [1, 1]} : vector<96x128xf32> to vector<64x128xf32>
    %13 = vector.extract_strided_slice %8 {offsets = [0, 0], sizes = [1, 128], strides = [1, 1]} : vector<9x128xf32> to vector<1x128xf32>
    %14 = vector.broadcast %13 : vector<1x128xf32> to vector<64x128xf32>
    %15 = arith.mulf %12, %14 : vector<64x128xf32>
    %16 = arith.addf %10, %15 : vector<64x128xf32>
    %17 = vector.extract_strided_slice %11 {offsets = [16, 0], sizes = [64, 128], strides = [1, 1]} : vector<96x128xf32> to vector<64x128xf32>
    %18 = vector.extract_strided_slice %8 {offsets = [3, 0], sizes = [1, 128], strides = [1, 1]} : vector<9x128xf32> to vector<1x128xf32>
    %19 = vector.broadcast %18 : vector<1x128xf32> to vector<64x128xf32>
    %20 = arith.mulf %17, %19 : vector<64x128xf32>
    %21 = arith.addf %16, %20 : vector<64x128xf32>
    %22 = vector.extract_strided_slice %11 {offsets = [32, 0], sizes = [64, 128], strides = [1, 1]} : vector<96x128xf32> to vector<64x128xf32>
    %23 = vector.extract_strided_slice %8 {offsets = [6, 0], sizes = [1, 128], strides = [1, 1]} : vector<9x128xf32> to vector<1x128xf32>
    %24 = vector.broadcast %23 : vector<1x128xf32> to vector<64x128xf32>
    %25 = arith.mulf %22, %24 : vector<64x128xf32>
    %26 = arith.addf %21, %25 : vector<64x128xf32>
    %c1 = arith.constant 1 : index
    %c0_8 = arith.constant 0 : index
    %27 = vector.load %arg6[%c1, %c0_8] : memref<360x128xf32, #tpu.memory_space<vmem>>, vector<96x128xf32>
    %28 = vector.extract_strided_slice %27 {offsets = [0, 0], sizes = [64, 128], strides = [1, 1]} : vector<96x128xf32> to vector<64x128xf32>
    %29 = vector.extract_strided_slice %8 {offsets = [1, 0], sizes = [1, 128], strides = [1, 1]} : vector<9x128xf32> to vector<1x128xf32>
    %30 = vector.broadcast %29 : vector<1x128xf32> to vector<64x128xf32>
    %31 = arith.mulf %28, %30 : vector<64x128xf32>
    %32 = arith.addf %26, %31 : vector<64x128xf32>
    %33 = vector.extract_strided_slice %27 {offsets = [16, 0], sizes = [64, 128], strides = [1, 1]} : vector<96x128xf32> to vector<64x128xf32>
    %34 = vector.extract_strided_slice %8 {offsets = [4, 0], sizes = [1, 128], strides = [1, 1]} : vector<9x128xf32> to vector<1x128xf32>
    %35 = vector.broadcast %34 : vector<1x128xf32> to vector<64x128xf32>
    %36 = arith.mulf %33, %35 : vector<64x128xf32>
    %37 = arith.addf %32, %36 : vector<64x128xf32>
    %38 = vector.extract_strided_slice %27 {offsets = [32, 0], sizes = [64, 128], strides = [1, 1]} : vector<96x128xf32> to vector<64x128xf32>
    %39 = vector.extract_strided_slice %8 {offsets = [7, 0], sizes = [1, 128], strides = [1, 1]} : vector<9x128xf32> to vector<1x128xf32>
    %40 = vector.broadcast %39 : vector<1x128xf32> to vector<64x128xf32>
    %41 = arith.mulf %38, %40 : vector<64x128xf32>
    %42 = arith.addf %37, %41 : vector<64x128xf32>
    %c2 = arith.constant 2 : index
    %c0_9 = arith.constant 0 : index
    %43 = vector.load %arg6[%c2, %c0_9] : memref<360x128xf32, #tpu.memory_space<vmem>>, vector<96x128xf32>
    %44 = vector.extract_strided_slice %43 {offsets = [0, 0], sizes = [64, 128], strides = [1, 1]} : vector<96x128xf32> to vector<64x128xf32>
    %45 = vector.extract_strided_slice %8 {offsets = [2, 0], sizes = [1, 128], strides = [1, 1]} : vector<9x128xf32> to vector<1x128xf32>
    %46 = vector.broadcast %45 : vector<1x128xf32> to vector<64x128xf32>
    %47 = arith.mulf %44, %46 : vector<64x128xf32>
    %48 = arith.addf %42, %47 : vector<64x128xf32>
    %49 = vector.extract_strided_slice %43 {offsets = [16, 0], sizes = [64, 128], strides = [1, 1]} : vector<96x128xf32> to vector<64x128xf32>
    %50 = vector.extract_strided_slice %8 {offsets = [5, 0], sizes = [1, 128], strides = [1, 1]} : vector<9x128xf32> to vector<1x128xf32>
    %51 = vector.broadcast %50 : vector<1x128xf32> to vector<64x128xf32>
    %52 = arith.mulf %49, %51 : vector<64x128xf32>
    %53 = arith.addf %48, %52 : vector<64x128xf32>
    %54 = vector.extract_strided_slice %43 {offsets = [32, 0], sizes = [64, 128], strides = [1, 1]} : vector<96x128xf32> to vector<64x128xf32>
    %55 = vector.extract_strided_slice %8 {offsets = [8, 0], sizes = [1, 128], strides = [1, 1]} : vector<9x128xf32> to vector<1x128xf32>
    %56 = vector.broadcast %55 : vector<1x128xf32> to vector<64x128xf32>
    %57 = arith.mulf %54, %56 : vector<64x128xf32>
    %58 = arith.addf %53, %57 : vector<64x128xf32>
    %59 = vector.broadcast %9 : vector<1x128xf32> to vector<64x128xf32>
    %60 = arith.addf %58, %59 : vector<64x128xf32>
    %cst_10 = arith.constant 0.000000e+00 : f32
    %61 = vector.broadcast %cst_10 : f32 to vector<64x128xf32>
    %62 = arith.maximumf %60, %61 : vector<64x128xf32>
    %c0_11 = arith.constant 0 : index
    %c0_12 = arith.constant 0 : index
    %63 = vector.load %arg7[%c0_11, %c0_12] : memref<320x128xf32, #tpu.memory_space<vmem>>, vector<64x128xf32>
    tpu.vector_store %arg7[%c0_11, %c0_12], %62 {strides = array<i32>} : memref<320x128xf32, #tpu.memory_space<vmem>>, vector<64x128xf32>,
    %cst_13 = arith.constant 0.000000e+00 : f32
    %64 = vector.broadcast %cst_13 : f32 to vector<64x128xf32>
    %c64 = arith.constant 64 : index
    %c0_14 = arith.constant 0 : index
    %65 = vector.load %arg6[%c64, %c0_14] : memref<360x128xf32, #tpu.memory_space<vmem>>, vector<96x128xf32>
    %66 = vector.extract_strided_slice %65 {offsets = [0, 0], sizes = [64, 128], strides = [1, 1]} : vector<96x128xf32> to vector<64x128xf32>
    %67 = vector.extract_strided_slice %8 {offsets = [0, 0], sizes = [1, 128], strides = [1, 1]} : vector<9x128xf32> to vector<1x128xf32>
    %68 = vector.broadcast %67 : vector<1x128xf32> to vector<64x128xf32>
    %69 = arith.mulf %66, %68 : vector<64x128xf32>
    %70 = arith.addf %64, %69 : vector<64x128xf32>
    %71 = vector.extract_strided_slice %65 {offsets = [16, 0], sizes = [64, 128], strides = [1, 1]} : vector<96x128xf32> to vector<64x128xf32>
    %72 = vector.extract_strided_slice %8 {offsets = [3, 0], sizes = [1, 128], strides = [1, 1]} : vector<9x128xf32> to vector<1x128xf32>
    %73 = vector.broadcast %72 : vector<1x128xf32> to vector<64x128xf32>
    %74 = arith.mulf %71, %73 : vector<64x128xf32>
    %75 = arith.addf %70, %74 : vector<64x128xf32>
    %76 = vector.extract_strided_slice %65 {offsets = [32, 0], sizes = [64, 128], strides = [1, 1]} : vector<96x128xf32> to vector<64x128xf32>
    %77 = vector.extract_strided_slice %8 {offsets = [6, 0], sizes = [1, 128], strides = [1, 1]} : vector<9x128xf32> to vector<1x128xf32>
    %78 = vector.broadcast %77 : vector<1x128xf32> to vector<64x128xf32>
    %79 = arith.mulf %76, %78 : vector<64x128xf32>
    %80 = arith.addf %75, %79 : vector<64x128xf32>
    %c65 = arith.constant 65 : index
    %c0_15 = arith.constant 0 : index
    %81 = vector.load %arg6[%c65, %c0_15] : memref<360x128xf32, #tpu.memory_space<vmem>>, vector<96x128xf32>
    %82 = vector.extract_strided_slice %81 {offsets = [0, 0], sizes = [64, 128], strides = [1, 1]} : vector<96x128xf32> to vector<64x128xf32>
    %83 = vector.extract_strided_slice %8 {offsets = [1, 0], sizes = [1, 128], strides = [1, 1]} : vector<9x128xf32> to vector<1x128xf32>
    %84 = vector.broadcast %83 : vector<1x128xf32> to vector<64x128xf32>
    %85 = arith.mulf %82, %84 : vector<64x128xf32>
    %86 = arith.addf %80, %85 : vector<64x128xf32>
    %87 = vector.extract_strided_slice %81 {offsets = [16, 0], sizes = [64, 128], strides = [1, 1]} : vector<96x128xf32> to vector<64x128xf32>
    %88 = vector.extract_strided_slice %8 {offsets = [4, 0], sizes = [1, 128], strides = [1, 1]} : vector<9x128xf32> to vector<1x128xf32>
    %89 = vector.broadcast %88 : vector<1x128xf32> to vector<64x128xf32>
    %90 = arith.mulf %87, %89 : vector<64x128xf32>
    %91 = arith.addf %86, %90 : vector<64x128xf32>
    %92 = vector.extract_strided_slice %81 {offsets = [32, 0], sizes = [64, 128], strides = [1, 1]} : vector<96x128xf32> to vector<64x128xf32>
    %93 = vector.extract_strided_slice %8 {offsets = [7, 0], sizes = [1, 128], strides = [1, 1]} : vector<9x128xf32> to vector<1x128xf32>
    %94 = vector.broadcast %93 : vector<1x128xf32> to vector<64x128xf32>
    %95 = arith.mulf %92, %94 : vector<64x128xf32>
    %96 = arith.addf %91, %95 : vector<64x128xf32>
    %c66 = arith.constant 66 : index
    %c0_16 = arith.constant 0 : index
    %97 = vector.load %arg6[%c66, %c0_16] : memref<360x128xf32, #tpu.memory_space<vmem>>, vector<96x128xf32>
    %98 = vector.extract_strided_slice %97 {offsets = [0, 0], sizes = [64, 128], strides = [1, 1]} : vector<96x128xf32> to vector<64x128xf32>
    %99 = vector.extract_strided_slice %8 {offsets = [2, 0], sizes = [1, 128], strides = [1, 1]} : vector<9x128xf32> to vector<1x128xf32>
    %100 = vector.broadcast %99 : vector<1x128xf32> to vector<64x128xf32>
    %101 = arith.mulf %98, %100 : vector<64x128xf32>
    %102 = arith.addf %96, %101 : vector<64x128xf32>
    %103 = vector.extract_strided_slice %97 {offsets = [16, 0], sizes = [64, 128], strides = [1, 1]} : vector<96x128xf32> to vector<64x128xf32>
    %104 = vector.extract_strided_slice %8 {offsets = [5, 0], sizes = [1, 128], strides = [1, 1]} : vector<9x128xf32> to vector<1x128xf32>
    %105 = vector.broadcast %104 : vector<1x128xf32> to vector<64x128xf32>
    %106 = arith.mulf %103, %105 : vector<64x128xf32>
    %107 = arith.addf %102, %106 : vector<64x128xf32>
    %108 = vector.extract_strided_slice %97 {offsets = [32, 0], sizes = [64, 128], strides = [1, 1]} : vector<96x128xf32> to vector<64x128xf32>
    %109 = vector.extract_strided_slice %8 {offsets = [8, 0], sizes = [1, 128], strides = [1, 1]} : vector<9x128xf32> to vector<1x128xf32>
    %110 = vector.broadcast %109 : vector<1x128xf32> to vector<64x128xf32>
    %111 = arith.mulf %108, %110 : vector<64x128xf32>
    %112 = arith.addf %107, %111 : vector<64x128xf32>
    %113 = vector.broadcast %9 : vector<1x128xf32> to vector<64x128xf32>
    %114 = arith.addf %112, %113 : vector<64x128xf32>
    %cst_17 = arith.constant 0.000000e+00 : f32
    %115 = vector.broadcast %cst_17 : f32 to vector<64x128xf32>
    %116 = arith.maximumf %114, %115 : vector<64x128xf32>
    %c64_18 = arith.constant 64 : index
    %c0_19 = arith.constant 0 : index
    %117 = vector.load %arg7[%c64_18, %c0_19] : memref<320x128xf32, #tpu.memory_space<vmem>>, vector<64x128xf32>
    tpu.vector_store %arg7[%c64_18, %c0_19], %116 {strides = array<i32>} : memref<320x128xf32, #tpu.memory_space<vmem>>, vector<64x128xf32>,
    %cst_20 = arith.constant 0.000000e+00 : f32
    %118 = vector.broadcast %cst_20 : f32 to vector<64x128xf32>
    %c128 = arith.constant 128 : index
    %c0_21 = arith.constant 0 : index
    %119 = vector.load %arg6[%c128, %c0_21] : memref<360x128xf32, #tpu.memory_space<vmem>>, vector<96x128xf32>
    %120 = vector.extract_strided_slice %119 {offsets = [0, 0], sizes = [64, 128], strides = [1, 1]} : vector<96x128xf32> to vector<64x128xf32>
    %121 = vector.extract_strided_slice %8 {offsets = [0, 0], sizes = [1, 128], strides = [1, 1]} : vector<9x128xf32> to vector<1x128xf32>
    %122 = vector.broadcast %121 : vector<1x128xf32> to vector<64x128xf32>
    %123 = arith.mulf %120, %122 : vector<64x128xf32>
    %124 = arith.addf %118, %123 : vector<64x128xf32>
    %125 = vector.extract_strided_slice %119 {offsets = [16, 0], sizes = [64, 128], strides = [1, 1]} : vector<96x128xf32> to vector<64x128xf32>
    %126 = vector.extract_strided_slice %8 {offsets = [3, 0], sizes = [1, 128], strides = [1, 1]} : vector<9x128xf32> to vector<1x128xf32>
    %127 = vector.broadcast %126 : vector<1x128xf32> to vector<64x128xf32>
    %128 = arith.mulf %125, %127 : vector<64x128xf32>
    %129 = arith.addf %124, %128 : vector<64x128xf32>
    %130 = vector.extract_strided_slice %119 {offsets = [32, 0], sizes = [64, 128], strides = [1, 1]} : vector<96x128xf32> to vector<64x128xf32>
    %131 = vector.extract_strided_slice %8 {offsets = [6, 0], sizes = [1, 128], strides = [1, 1]} : vector<9x128xf32> to vector<1x128xf32>
    %132 = vector.broadcast %131 : vector<1x128xf32> to vector<64x128xf32>
    %133 = arith.mulf %130, %132 : vector<64x128xf32>
    %134 = arith.addf %129, %133 : vector<64x128xf32>
    %c129 = arith.constant 129 : index
    %c0_22 = arith.constant 0 : index
    %135 = vector.load %arg6[%c129, %c0_22] : memref<360x128xf32, #tpu.memory_space<vmem>>, vector<96x128xf32>
    %136 = vector.extract_strided_slice %135 {offsets = [0, 0], sizes = [64, 128], strides = [1, 1]} : vector<96x128xf32> to vector<64x128xf32>
    %137 = vector.extract_strided_slice %8 {offsets = [1, 0], sizes = [1, 128], strides = [1, 1]} : vector<9x128xf32> to vector<1x128xf32>
    %138 = vector.broadcast %137 : vector<1x128xf32> to vector<64x128xf32>
    %139 = arith.mulf %136, %138 : vector<64x128xf32>
    %140 = arith.addf %134, %139 : vector<64x128xf32>
    %141 = vector.extract_strided_slice %135 {offsets = [16, 0], sizes = [64, 128], strides = [1, 1]} : vector<96x128xf32> to vector<64x128xf32>
    %142 = vector.extract_strided_slice %8 {offsets = [4, 0], sizes = [1, 128], strides = [1, 1]} : vector<9x128xf32> to vector<1x128xf32>
    %143 = vector.broadcast %142 : vector<1x128xf32> to vector<64x128xf32>
    %144 = arith.mulf %141, %143 : vector<64x128xf32>
    %145 = arith.addf %140, %144 : vector<64x128xf32>
    %146 = vector.extract_strided_slice %135 {offsets = [32, 0], sizes = [64, 128], strides = [1, 1]} : vector<96x128xf32> to vector<64x128xf32>
    %147 = vector.extract_strided_slice %8 {offsets = [7, 0], sizes = [1, 128], strides = [1, 1]} : vector<9x128xf32> to vector<1x128xf32>
    %148 = vector.broadcast %147 : vector<1x128xf32> to vector<64x128xf32>
    %149 = arith.mulf %146, %148 : vector<64x128xf32>
    %150 = arith.addf %145, %149 : vector<64x128xf32>
    %c130 = arith.constant 130 : index
    %c0_23 = arith.constant 0 : index
    %151 = vector.load %arg6[%c130, %c0_23] : memref<360x128xf32, #tpu.memory_space<vmem>>, vector<96x128xf32>
    %152 = vector.extract_strided_slice %151 {offsets = [0, 0], sizes = [64, 128], strides = [1, 1]} : vector<96x128xf32> to vector<64x128xf32>
    %153 = vector.extract_strided_slice %8 {offsets = [2, 0], sizes = [1, 128], strides = [1, 1]} : vector<9x128xf32> to vector<1x128xf32>
    %154 = vector.broadcast %153 : vector<1x128xf32> to vector<64x128xf32>
    %155 = arith.mulf %152, %154 : vector<64x128xf32>
    %156 = arith.addf %150, %155 : vector<64x128xf32>
    %157 = vector.extract_strided_slice %151 {offsets = [16, 0], sizes = [64, 128], strides = [1, 1]} : vector<96x128xf32> to vector<64x128xf32>
    %158 = vector.extract_strided_slice %8 {offsets = [5, 0], sizes = [1, 128], strides = [1, 1]} : vector<9x128xf32> to vector<1x128xf32>
    %159 = vector.broadcast %158 : vector<1x128xf32> to vector<64x128xf32>
    %160 = arith.mulf %157, %159 : vector<64x128xf32>
    %161 = arith.addf %156, %160 : vector<64x128xf32>
    %162 = vector.extract_strided_slice %151 {offsets = [32, 0], sizes = [64, 128], strides = [1, 1]} : vector<96x128xf32> to vector<64x128xf32>
    %163 = vector.extract_strided_slice %8 {offsets = [8, 0], sizes = [1, 128], strides = [1, 1]} : vector<9x128xf32> to vector<1x128xf32>
    %164 = vector.broadcast %163 : vector<1x128xf32> to vector<64x128xf32>
    %165 = arith.mulf %162, %164 : vector<64x128xf32>
    %166 = arith.addf %161, %165 : vector<64x128xf32>
    %167 = vector.broadcast %9 : vector<1x128xf32> to vector<64x128xf32>
    %168 = arith.addf %166, %167 : vector<64x128xf32>
    %cst_24 = arith.constant 0.000000e+00 : f32
    %169 = vector.broadcast %cst_24 : f32 to vector<64x128xf32>
    %170 = arith.maximumf %168, %169 : vector<64x128xf32>
    %c128_25 = arith.constant 128 : index
    %c0_26 = arith.constant 0 : index
    %171 = vector.load %arg7[%c128_25, %c0_26] : memref<320x128xf32, #tpu.memory_space<vmem>>, vector<64x128xf32>
    tpu.vector_store %arg7[%c128_25, %c0_26], %170 {strides = array<i32>} : memref<320x128xf32, #tpu.memory_space<vmem>>, vector<64x128xf32>,
    %cst_27 = arith.constant 0.000000e+00 : f32
    %172 = vector.broadcast %cst_27 : f32 to vector<64x128xf32>
    %c192 = arith.constant 192 : index
    %c0_28 = arith.constant 0 : index
    %173 = vector.load %arg6[%c192, %c0_28] : memref<360x128xf32, #tpu.memory_space<vmem>>, vector<96x128xf32>
    %174 = vector.extract_strided_slice %173 {offsets = [0, 0], sizes = [64, 128], strides = [1, 1]} : vector<96x128xf32> to vector<64x128xf32>
    %175 = vector.extract_strided_slice %8 {offsets = [0, 0], sizes = [1, 128], strides = [1, 1]} : vector<9x128xf32> to vector<1x128xf32>
    %176 = vector.broadcast %175 : vector<1x128xf32> to vector<64x128xf32>
    %177 = arith.mulf %174, %176 : vector<64x128xf32>
    %178 = arith.addf %172, %177 : vector<64x128xf32>
    %179 = vector.extract_strided_slice %173 {offsets = [16, 0], sizes = [64, 128], strides = [1, 1]} : vector<96x128xf32> to vector<64x128xf32>
    %180 = vector.extract_strided_slice %8 {offsets = [3, 0], sizes = [1, 128], strides = [1, 1]} : vector<9x128xf32> to vector<1x128xf32>
    %181 = vector.broadcast %180 : vector<1x128xf32> to vector<64x128xf32>
    %182 = arith.mulf %179, %181 : vector<64x128xf32>
    %183 = arith.addf %178, %182 : vector<64x128xf32>
    %184 = vector.extract_strided_slice %173 {offsets = [32, 0], sizes = [64, 128], strides = [1, 1]} : vector<96x128xf32> to vector<64x128xf32>
    %185 = vector.extract_strided_slice %8 {offsets = [6, 0], sizes = [1, 128], strides = [1, 1]} : vector<9x128xf32> to vector<1x128xf32>
    %186 = vector.broadcast %185 : vector<1x128xf32> to vector<64x128xf32>
    %187 = arith.mulf %184, %186 : vector<64x128xf32>
    %188 = arith.addf %183, %187 : vector<64x128xf32>
    %c193 = arith.constant 193 : index
    %c0_29 = arith.constant 0 : index
    %189 = vector.load %arg6[%c193, %c0_29] : memref<360x128xf32, #tpu.memory_space<vmem>>, vector<96x128xf32>
    %190 = vector.extract_strided_slice %189 {offsets = [0, 0], sizes = [64, 128], strides = [1, 1]} : vector<96x128xf32> to vector<64x128xf32>
    %191 = vector.extract_strided_slice %8 {offsets = [1, 0], sizes = [1, 128], strides = [1, 1]} : vector<9x128xf32> to vector<1x128xf32>
    %192 = vector.broadcast %191 : vector<1x128xf32> to vector<64x128xf32>
    %193 = arith.mulf %190, %192 : vector<64x128xf32>
    %194 = arith.addf %188, %193 : vector<64x128xf32>
    %195 = vector.extract_strided_slice %189 {offsets = [16, 0], sizes = [64, 128], strides = [1, 1]} : vector<96x128xf32> to vector<64x128xf32>
    %196 = vector.extract_strided_slice %8 {offsets = [4, 0], sizes = [1, 128], strides = [1, 1]} : vector<9x128xf32> to vector<1x128xf32>
    %197 = vector.broadcast %196 : vector<1x128xf32> to vector<64x128xf32>
    %198 = arith.mulf %195, %197 : vector<64x128xf32>
    %199 = arith.addf %194, %198 : vector<64x128xf32>
    %200 = vector.extract_strided_slice %189 {offsets = [32, 0], sizes = [64, 128], strides = [1, 1]} : vector<96x128xf32> to vector<64x128xf32>
    %201 = vector.extract_strided_slice %8 {offsets = [7, 0], sizes = [1, 128], strides = [1, 1]} : vector<9x128xf32> to vector<1x128xf32>
    %202 = vector.broadcast %201 : vector<1x128xf32> to vector<64x128xf32>
    %203 = arith.mulf %200, %202 : vector<64x128xf32>
    %204 = arith.addf %199, %203 : vector<64x128xf32>
    %c194 = arith.constant 194 : index
    %c0_30 = arith.constant 0 : index
    %205 = vector.load %arg6[%c194, %c0_30] : memref<360x128xf32, #tpu.memory_space<vmem>>, vector<96x128xf32>
    %206 = vector.extract_strided_slice %205 {offsets = [0, 0], sizes = [64, 128], strides = [1, 1]} : vector<96x128xf32> to vector<64x128xf32>
    %207 = vector.extract_strided_slice %8 {offsets = [2, 0], sizes = [1, 128], strides = [1, 1]} : vector<9x128xf32> to vector<1x128xf32>
    %208 = vector.broadcast %207 : vector<1x128xf32> to vector<64x128xf32>
    %209 = arith.mulf %206, %208 : vector<64x128xf32>
    %210 = arith.addf %204, %209 : vector<64x128xf32>
    %211 = vector.extract_strided_slice %205 {offsets = [16, 0], sizes = [64, 128], strides = [1, 1]} : vector<96x128xf32> to vector<64x128xf32>
    %212 = vector.extract_strided_slice %8 {offsets = [5, 0], sizes = [1, 128], strides = [1, 1]} : vector<9x128xf32> to vector<1x128xf32>
    %213 = vector.broadcast %212 : vector<1x128xf32> to vector<64x128xf32>
    %214 = arith.mulf %211, %213 : vector<64x128xf32>
    %215 = arith.addf %210, %214 : vector<64x128xf32>
    %216 = vector.extract_strided_slice %205 {offsets = [32, 0], sizes = [64, 128], strides = [1, 1]} : vector<96x128xf32> to vector<64x128xf32>
    %217 = vector.extract_strided_slice %8 {offsets = [8, 0], sizes = [1, 128], strides = [1, 1]} : vector<9x128xf32> to vector<1x128xf32>
    %218 = vector.broadcast %217 : vector<1x128xf32> to vector<64x128xf32>
    %219 = arith.mulf %216, %218 : vector<64x128xf32>
    %220 = arith.addf %215, %219 : vector<64x128xf32>
    %221 = vector.broadcast %9 : vector<1x128xf32> to vector<64x128xf32>
    %222 = arith.addf %220, %221 : vector<64x128xf32>
    %cst_31 = arith.constant 0.000000e+00 : f32
    %223 = vector.broadcast %cst_31 : f32 to vector<64x128xf32>
    %224 = arith.maximumf %222, %223 : vector<64x128xf32>
    %c192_32 = arith.constant 192 : index
    %c0_33 = arith.constant 0 : index
    %225 = vector.load %arg7[%c192_32, %c0_33] : memref<320x128xf32, #tpu.memory_space<vmem>>, vector<64x128xf32>
    tpu.vector_store %arg7[%c192_32, %c0_33], %224 {strides = array<i32>} : memref<320x128xf32, #tpu.memory_space<vmem>>, vector<64x128xf32>,
    %cst_34 = arith.constant 0.000000e+00 : f32
    %226 = vector.broadcast %cst_34 : f32 to vector<64x128xf32>
    %c256 = arith.constant 256 : index
    %c0_35 = arith.constant 0 : index
    %227 = vector.load %arg6[%c256, %c0_35] : memref<360x128xf32, #tpu.memory_space<vmem>>, vector<96x128xf32>
    %228 = vector.extract_strided_slice %227 {offsets = [0, 0], sizes = [64, 128], strides = [1, 1]} : vector<96x128xf32> to vector<64x128xf32>
    %229 = vector.extract_strided_slice %8 {offsets = [0, 0], sizes = [1, 128], strides = [1, 1]} : vector<9x128xf32> to vector<1x128xf32>
    %230 = vector.broadcast %229 : vector<1x128xf32> to vector<64x128xf32>
    %231 = arith.mulf %228, %230 : vector<64x128xf32>
    %232 = arith.addf %226, %231 : vector<64x128xf32>
    %233 = vector.extract_strided_slice %227 {offsets = [16, 0], sizes = [64, 128], strides = [1, 1]} : vector<96x128xf32> to vector<64x128xf32>
    %234 = vector.extract_strided_slice %8 {offsets = [3, 0], sizes = [1, 128], strides = [1, 1]} : vector<9x128xf32> to vector<1x128xf32>
    %235 = vector.broadcast %234 : vector<1x128xf32> to vector<64x128xf32>
    %236 = arith.mulf %233, %235 : vector<64x128xf32>
    %237 = arith.addf %232, %236 : vector<64x128xf32>
    %238 = vector.extract_strided_slice %227 {offsets = [32, 0], sizes = [64, 128], strides = [1, 1]} : vector<96x128xf32> to vector<64x128xf32>
    %239 = vector.extract_strided_slice %8 {offsets = [6, 0], sizes = [1, 128], strides = [1, 1]} : vector<9x128xf32> to vector<1x128xf32>
    %240 = vector.broadcast %239 : vector<1x128xf32> to vector<64x128xf32>
    %241 = arith.mulf %238, %240 : vector<64x128xf32>
    %242 = arith.addf %237, %241 : vector<64x128xf32>
    %c257 = arith.constant 257 : index
    %c0_36 = arith.constant 0 : index
    %243 = vector.load %arg6[%c257, %c0_36] : memref<360x128xf32, #tpu.memory_space<vmem>>, vector<96x128xf32>
    %244 = vector.extract_strided_slice %243 {offsets = [0, 0], sizes = [64, 128], strides = [1, 1]} : vector<96x128xf32> to vector<64x128xf32>
    %245 = vector.extract_strided_slice %8 {offsets = [1, 0], sizes = [1, 128], strides = [1, 1]} : vector<9x128xf32> to vector<1x128xf32>
    %246 = vector.broadcast %245 : vector<1x128xf32> to vector<64x128xf32>
    %247 = arith.mulf %244, %246 : vector<64x128xf32>
    %248 = arith.addf %242, %247 : vector<64x128xf32>
    %249 = vector.extract_strided_slice %243 {offsets = [16, 0], sizes = [64, 128], strides = [1, 1]} : vector<96x128xf32> to vector<64x128xf32>
    %250 = vector.extract_strided_slice %8 {offsets = [4, 0], sizes = [1, 128], strides = [1, 1]} : vector<9x128xf32> to vector<1x128xf32>
    %251 = vector.broadcast %250 : vector<1x128xf32> to vector<64x128xf32>
    %252 = arith.mulf %249, %251 : vector<64x128xf32>
    %253 = arith.addf %248, %252 : vector<64x128xf32>
    %254 = vector.extract_strided_slice %243 {offsets = [32, 0], sizes = [64, 128], strides = [1, 1]} : vector<96x128xf32> to vector<64x128xf32>
    %255 = vector.extract_strided_slice %8 {offsets = [7, 0], sizes = [1, 128], strides = [1, 1]} : vector<9x128xf32> to vector<1x128xf32>
    %256 = vector.broadcast %255 : vector<1x128xf32> to vector<64x128xf32>
    %257 = arith.mulf %254, %256 : vector<64x128xf32>
    %258 = arith.addf %253, %257 : vector<64x128xf32>
    %c258 = arith.constant 258 : index
    %c0_37 = arith.constant 0 : index
    %259 = vector.load %arg6[%c258, %c0_37] : memref<360x128xf32, #tpu.memory_space<vmem>>, vector<96x128xf32>
    %260 = vector.extract_strided_slice %259 {offsets = [0, 0], sizes = [64, 128], strides = [1, 1]} : vector<96x128xf32> to vector<64x128xf32>
    %261 = vector.extract_strided_slice %8 {offsets = [2, 0], sizes = [1, 128], strides = [1, 1]} : vector<9x128xf32> to vector<1x128xf32>
    %262 = vector.broadcast %261 : vector<1x128xf32> to vector<64x128xf32>
    %263 = arith.mulf %260, %262 : vector<64x128xf32>
    %264 = arith.addf %258, %263 : vector<64x128xf32>
    %265 = vector.extract_strided_slice %259 {offsets = [16, 0], sizes = [64, 128], strides = [1, 1]} : vector<96x128xf32> to vector<64x128xf32>
    %266 = vector.extract_strided_slice %8 {offsets = [5, 0], sizes = [1, 128], strides = [1, 1]} : vector<9x128xf32> to vector<1x128xf32>
    %267 = vector.broadcast %266 : vector<1x128xf32> to vector<64x128xf32>
    %268 = arith.mulf %265, %267 : vector<64x128xf32>
    %269 = arith.addf %264, %268 : vector<64x128xf32>
    %270 = vector.extract_strided_slice %259 {offsets = [32, 0], sizes = [64, 128], strides = [1, 1]} : vector<96x128xf32> to vector<64x128xf32>
    %271 = vector.extract_strided_slice %8 {offsets = [8, 0], sizes = [1, 128], strides = [1, 1]} : vector<9x128xf32> to vector<1x128xf32>
    %272 = vector.broadcast %271 : vector<1x128xf32> to vector<64x128xf32>
    %273 = arith.mulf %270, %272 : vector<64x128xf32>
    %274 = arith.addf %269, %273 : vector<64x128xf32>
    %275 = vector.broadcast %9 : vector<1x128xf32> to vector<64x128xf32>
    %276 = arith.addf %274, %275 : vector<64x128xf32>
    %cst_38 = arith.constant 0.000000e+00 : f32
    %277 = vector.broadcast %cst_38 : f32 to vector<64x128xf32>
    %278 = arith.maximumf %276, %277 : vector<64x128xf32>
    %c256_39 = arith.constant 256 : index
    %c0_40 = arith.constant 0 : index
    %279 = vector.load %arg7[%c256_39, %c0_40] : memref<320x128xf32, #tpu.memory_space<vmem>>, vector<64x128xf32>
    tpu.vector_store %arg7[%c256_39, %c0_40], %278 {strides = array<i32>} : memref<320x128xf32, #tpu.memory_space<vmem>>, vector<64x128xf32>,
    %c10 = arith.constant 10 : index
    %c0_41 = arith.constant 0 : index
    %280 = vector.load %arg1[%c10, %c0_41] : memref<20x128xf32, #tpu.memory_space<vmem>>, vector<9x128xf32>
    %c19 = arith.constant 19 : index
    %c0_42 = arith.constant 0 : index
    %281 = vector.load %arg1[%c19, %c0_42] : memref<20x128xf32, #tpu.memory_space<vmem>>, vector<1x128xf32>
    %cst_43 = arith.constant 0.000000e+00 : f32
    %282 = vector.broadcast %cst_43 : f32 to vector<64x128xf32>
    %c0_44 = arith.constant 0 : index
    %c0_45 = arith.constant 0 : index
    %283 = vector.load %arg7[%c0_44, %c0_45] : memref<320x128xf32, #tpu.memory_space<vmem>>, vector<96x128xf32>
    %284 = vector.extract_strided_slice %283 {offsets = [0, 0], sizes = [64, 128], strides = [1, 1]} : vector<96x128xf32> to vector<64x128xf32>
    %285 = vector.extract_strided_slice %280 {offsets = [0, 0], sizes = [1, 128], strides = [1, 1]} : vector<9x128xf32> to vector<1x128xf32>
    %286 = vector.broadcast %285 : vector<1x128xf32> to vector<64x128xf32>
    %287 = arith.mulf %284, %286 : vector<64x128xf32>
    %288 = arith.addf %282, %287 : vector<64x128xf32>
    %289 = vector.extract_strided_slice %283 {offsets = [16, 0], sizes = [64, 128], strides = [1, 1]} : vector<96x128xf32> to vector<64x128xf32>
    %290 = vector.extract_strided_slice %280 {offsets = [3, 0], sizes = [1, 128], strides = [1, 1]} : vector<9x128xf32> to vector<1x128xf32>
    %291 = vector.broadcast %290 : vector<1x128xf32> to vector<64x128xf32>
    %292 = arith.mulf %289, %291 : vector<64x128xf32>
    %293 = arith.addf %288, %292 : vector<64x128xf32>
    %294 = vector.extract_strided_slice %283 {offsets = [32, 0], sizes = [64, 128], strides = [1, 1]} : vector<96x128xf32> to vector<64x128xf32>
    %295 = vector.extract_strided_slice %280 {offsets = [6, 0], sizes = [1, 128], strides = [1, 1]} : vector<9x128xf32> to vector<1x128xf32>
    %296 = vector.broadcast %295 : vector<1x128xf32> to vector<64x128xf32>
    %297 = arith.mulf %294, %296 : vector<64x128xf32>
    %298 = arith.addf %293, %297 : vector<64x128xf32>
    %c1_46 = arith.constant 1 : index
    %c0_47 = arith.constant 0 : index
    %299 = vector.load %arg7[%c1_46, %c0_47] : memref<320x128xf32, #tpu.memory_space<vmem>>, vector<96x128xf32>
    %300 = vector.extract_strided_slice %299 {offsets = [0, 0], sizes = [64, 128], strides = [1, 1]} : vector<96x128xf32> to vector<64x128xf32>
    %301 = vector.extract_strided_slice %280 {offsets = [1, 0], sizes = [1, 128], strides = [1, 1]} : vector<9x128xf32> to vector<1x128xf32>
    %302 = vector.broadcast %301 : vector<1x128xf32> to vector<64x128xf32>
    %303 = arith.mulf %300, %302 : vector<64x128xf32>
    %304 = arith.addf %298, %303 : vector<64x128xf32>
    %305 = vector.extract_strided_slice %299 {offsets = [16, 0], sizes = [64, 128], strides = [1, 1]} : vector<96x128xf32> to vector<64x128xf32>
    %306 = vector.extract_strided_slice %280 {offsets = [4, 0], sizes = [1, 128], strides = [1, 1]} : vector<9x128xf32> to vector<1x128xf32>
    %307 = vector.broadcast %306 : vector<1x128xf32> to vector<64x128xf32>
    %308 = arith.mulf %305, %307 : vector<64x128xf32>
    %309 = arith.addf %304, %308 : vector<64x128xf32>
    %310 = vector.extract_strided_slice %299 {offsets = [32, 0], sizes = [64, 128], strides = [1, 1]} : vector<96x128xf32> to vector<64x128xf32>
    %311 = vector.extract_strided_slice %280 {offsets = [7, 0], sizes = [1, 128], strides = [1, 1]} : vector<9x128xf32> to vector<1x128xf32>
    %312 = vector.broadcast %311 : vector<1x128xf32> to vector<64x128xf32>
    %313 = arith.mulf %310, %312 : vector<64x128xf32>
    %314 = arith.addf %309, %313 : vector<64x128xf32>
    %c2_48 = arith.constant 2 : index
    %c0_49 = arith.constant 0 : index
    %315 = vector.load %arg7[%c2_48, %c0_49] : memref<320x128xf32, #tpu.memory_space<vmem>>, vector<96x128xf32>
    %316 = vector.extract_strided_slice %315 {offsets = [0, 0], sizes = [64, 128], strides = [1, 1]} : vector<96x128xf32> to vector<64x128xf32>
    %317 = vector.extract_strided_slice %280 {offsets = [2, 0], sizes = [1, 128], strides = [1, 1]} : vector<9x128xf32> to vector<1x128xf32>
    %318 = vector.broadcast %317 : vector<1x128xf32> to vector<64x128xf32>
    %319 = arith.mulf %316, %318 : vector<64x128xf32>
    %320 = arith.addf %314, %319 : vector<64x128xf32>
    %321 = vector.extract_strided_slice %315 {offsets = [16, 0], sizes = [64, 128], strides = [1, 1]} : vector<96x128xf32> to vector<64x128xf32>
    %322 = vector.extract_strided_slice %280 {offsets = [5, 0], sizes = [1, 128], strides = [1, 1]} : vector<9x128xf32> to vector<1x128xf32>
    %323 = vector.broadcast %322 : vector<1x128xf32> to vector<64x128xf32>
    %324 = arith.mulf %321, %323 : vector<64x128xf32>
    %325 = arith.addf %320, %324 : vector<64x128xf32>
    %326 = vector.extract_strided_slice %315 {offsets = [32, 0], sizes = [64, 128], strides = [1, 1]} : vector<96x128xf32> to vector<64x128xf32>
    %327 = vector.extract_strided_slice %280 {offsets = [8, 0], sizes = [1, 128], strides = [1, 1]} : vector<9x128xf32> to vector<1x128xf32>
    %328 = vector.broadcast %327 : vector<1x128xf32> to vector<64x128xf32>
    %329 = arith.mulf %326, %328 : vector<64x128xf32>
    %330 = arith.addf %325, %329 : vector<64x128xf32>
    %331 = vector.broadcast %281 : vector<1x128xf32> to vector<64x128xf32>
    %332 = arith.addf %330, %331 : vector<64x128xf32>
    %cst_50 = arith.constant 0.000000e+00 : f32
    %333 = vector.broadcast %cst_50 : f32 to vector<64x128xf32>
    %334 = arith.maximumf %332, %333 : vector<64x128xf32>
    %c0_51 = arith.constant 0 : index
    %c0_52 = arith.constant 0 : index
    %335 = vector.load %arg8[%c0_51, %c0_52] : memref<256x128xf32, #tpu.memory_space<vmem>>, vector<64x128xf32>
    tpu.vector_store %arg8[%c0_51, %c0_52], %334 {strides = array<i32>} : memref<256x128xf32, #tpu.memory_space<vmem>>, vector<64x128xf32>,
    %cst_53 = arith.constant 0.000000e+00 : f32
    %336 = vector.broadcast %cst_53 : f32 to vector<64x128xf32>
    %c64_54 = arith.constant 64 : index
    %c0_55 = arith.constant 0 : index
    %337 = vector.load %arg7[%c64_54, %c0_55] : memref<320x128xf32, #tpu.memory_space<vmem>>, vector<96x128xf32>
    %338 = vector.extract_strided_slice %337 {offsets = [0, 0], sizes = [64, 128], strides = [1, 1]} : vector<96x128xf32> to vector<64x128xf32>
    %339 = vector.extract_strided_slice %280 {offsets = [0, 0], sizes = [1, 128], strides = [1, 1]} : vector<9x128xf32> to vector<1x128xf32>
    %340 = vector.broadcast %339 : vector<1x128xf32> to vector<64x128xf32>
    %341 = arith.mulf %338, %340 : vector<64x128xf32>
    %342 = arith.addf %336, %341 : vector<64x128xf32>
    %343 = vector.extract_strided_slice %337 {offsets = [16, 0], sizes = [64, 128], strides = [1, 1]} : vector<96x128xf32> to vector<64x128xf32>
    %344 = vector.extract_strided_slice %280 {offsets = [3, 0], sizes = [1, 128], strides = [1, 1]} : vector<9x128xf32> to vector<1x128xf32>
    %345 = vector.broadcast %344 : vector<1x128xf32> to vector<64x128xf32>
    %346 = arith.mulf %343, %345 : vector<64x128xf32>
    %347 = arith.addf %342, %346 : vector<64x128xf32>
    %348 = vector.extract_strided_slice %337 {offsets = [32, 0], sizes = [64, 128], strides = [1, 1]} : vector<96x128xf32> to vector<64x128xf32>
    %349 = vector.extract_strided_slice %280 {offsets = [6, 0], sizes = [1, 128], strides = [1, 1]} : vector<9x128xf32> to vector<1x128xf32>
    %350 = vector.broadcast %349 : vector<1x128xf32> to vector<64x128xf32>
    %351 = arith.mulf %348, %350 : vector<64x128xf32>
    %352 = arith.addf %347, %351 : vector<64x128xf32>
    %c65_56 = arith.constant 65 : index
    %c0_57 = arith.constant 0 : index
    %353 = vector.load %arg7[%c65_56, %c0_57] : memref<320x128xf32, #tpu.memory_space<vmem>>, vector<96x128xf32>
    %354 = vector.extract_strided_slice %353 {offsets = [0, 0], sizes = [64, 128], strides = [1, 1]} : vector<96x128xf32> to vector<64x128xf32>
    %355 = vector.extract_strided_slice %280 {offsets = [1, 0], sizes = [1, 128], strides = [1, 1]} : vector<9x128xf32> to vector<1x128xf32>
    %356 = vector.broadcast %355 : vector<1x128xf32> to vector<64x128xf32>
    %357 = arith.mulf %354, %356 : vector<64x128xf32>
    %358 = arith.addf %352, %357 : vector<64x128xf32>
    %359 = vector.extract_strided_slice %353 {offsets = [16, 0], sizes = [64, 128], strides = [1, 1]} : vector<96x128xf32> to vector<64x128xf32>
    %360 = vector.extract_strided_slice %280 {offsets = [4, 0], sizes = [1, 128], strides = [1, 1]} : vector<9x128xf32> to vector<1x128xf32>
    %361 = vector.broadcast %360 : vector<1x128xf32> to vector<64x128xf32>
    %362 = arith.mulf %359, %361 : vector<64x128xf32>
    %363 = arith.addf %358, %362 : vector<64x128xf32>
    %364 = vector.extract_strided_slice %353 {offsets = [32, 0], sizes = [64, 128], strides = [1, 1]} : vector<96x128xf32> to vector<64x128xf32>
    %365 = vector.extract_strided_slice %280 {offsets = [7, 0], sizes = [1, 128], strides = [1, 1]} : vector<9x128xf32> to vector<1x128xf32>
    %366 = vector.broadcast %365 : vector<1x128xf32> to vector<64x128xf32>
    %367 = arith.mulf %364, %366 : vector<64x128xf32>
    %368 = arith.addf %363, %367 : vector<64x128xf32>
    %c66_58 = arith.constant 66 : index
    %c0_59 = arith.constant 0 : index
    %369 = vector.load %arg7[%c66_58, %c0_59] : memref<320x128xf32, #tpu.memory_space<vmem>>, vector<96x128xf32>
    %370 = vector.extract_strided_slice %369 {offsets = [0, 0], sizes = [64, 128], strides = [1, 1]} : vector<96x128xf32> to vector<64x128xf32>
    %371 = vector.extract_strided_slice %280 {offsets = [2, 0], sizes = [1, 128], strides = [1, 1]} : vector<9x128xf32> to vector<1x128xf32>
    %372 = vector.broadcast %371 : vector<1x128xf32> to vector<64x128xf32>
    %373 = arith.mulf %370, %372 : vector<64x128xf32>
    %374 = arith.addf %368, %373 : vector<64x128xf32>
    %375 = vector.extract_strided_slice %369 {offsets = [16, 0], sizes = [64, 128], strides = [1, 1]} : vector<96x128xf32> to vector<64x128xf32>
    %376 = vector.extract_strided_slice %280 {offsets = [5, 0], sizes = [1, 128], strides = [1, 1]} : vector<9x128xf32> to vector<1x128xf32>
    %377 = vector.broadcast %376 : vector<1x128xf32> to vector<64x128xf32>
    %378 = arith.mulf %375, %377 : vector<64x128xf32>
    %379 = arith.addf %374, %378 : vector<64x128xf32>
    %380 = vector.extract_strided_slice %369 {offsets = [32, 0], sizes = [64, 128], strides = [1, 1]} : vector<96x128xf32> to vector<64x128xf32>
    %381 = vector.extract_strided_slice %280 {offsets = [8, 0], sizes = [1, 128], strides = [1, 1]} : vector<9x128xf32> to vector<1x128xf32>
    %382 = vector.broadcast %381 : vector<1x128xf32> to vector<64x128xf32>
    %383 = arith.mulf %380, %382 : vector<64x128xf32>
    %384 = arith.addf %379, %383 : vector<64x128xf32>
    %385 = vector.broadcast %281 : vector<1x128xf32> to vector<64x128xf32>
    %386 = arith.addf %384, %385 : vector<64x128xf32>
    %cst_60 = arith.constant 0.000000e+00 : f32
    %387 = vector.broadcast %cst_60 : f32 to vector<64x128xf32>
    %388 = arith.maximumf %386, %387 : vector<64x128xf32>
    %c64_61 = arith.constant 64 : index
    %c0_62 = arith.constant 0 : index
    %389 = vector.load %arg8[%c64_61, %c0_62] : memref<256x128xf32, #tpu.memory_space<vmem>>, vector<64x128xf32>
    tpu.vector_store %arg8[%c64_61, %c0_62], %388 {strides = array<i32>} : memref<256x128xf32, #tpu.memory_space<vmem>>, vector<64x128xf32>,
    %cst_63 = arith.constant 0.000000e+00 : f32
    %390 = vector.broadcast %cst_63 : f32 to vector<64x128xf32>
    %c128_64 = arith.constant 128 : index
    %c0_65 = arith.constant 0 : index
    %391 = vector.load %arg7[%c128_64, %c0_65] : memref<320x128xf32, #tpu.memory_space<vmem>>, vector<96x128xf32>
    %392 = vector.extract_strided_slice %391 {offsets = [0, 0], sizes = [64, 128], strides = [1, 1]} : vector<96x128xf32> to vector<64x128xf32>
    %393 = vector.extract_strided_slice %280 {offsets = [0, 0], sizes = [1, 128], strides = [1, 1]} : vector<9x128xf32> to vector<1x128xf32>
    %394 = vector.broadcast %393 : vector<1x128xf32> to vector<64x128xf32>
    %395 = arith.mulf %392, %394 : vector<64x128xf32>
    %396 = arith.addf %390, %395 : vector<64x128xf32>
    %397 = vector.extract_strided_slice %391 {offsets = [16, 0], sizes = [64, 128], strides = [1, 1]} : vector<96x128xf32> to vector<64x128xf32>
    %398 = vector.extract_strided_slice %280 {offsets = [3, 0], sizes = [1, 128], strides = [1, 1]} : vector<9x128xf32> to vector<1x128xf32>
    %399 = vector.broadcast %398 : vector<1x128xf32> to vector<64x128xf32>
    %400 = arith.mulf %397, %399 : vector<64x128xf32>
    %401 = arith.addf %396, %400 : vector<64x128xf32>
    %402 = vector.extract_strided_slice %391 {offsets = [32, 0], sizes = [64, 128], strides = [1, 1]} : vector<96x128xf32> to vector<64x128xf32>
    %403 = vector.extract_strided_slice %280 {offsets = [6, 0], sizes = [1, 128], strides = [1, 1]} : vector<9x128xf32> to vector<1x128xf32>
    %404 = vector.broadcast %403 : vector<1x128xf32> to vector<64x128xf32>
    %405 = arith.mulf %402, %404 : vector<64x128xf32>
    %406 = arith.addf %401, %405 : vector<64x128xf32>
    %c129_66 = arith.constant 129 : index
    %c0_67 = arith.constant 0 : index
    %407 = vector.load %arg7[%c129_66, %c0_67] : memref<320x128xf32, #tpu.memory_space<vmem>>, vector<96x128xf32>
    %408 = vector.extract_strided_slice %407 {offsets = [0, 0], sizes = [64, 128], strides = [1, 1]} : vector<96x128xf32> to vector<64x128xf32>
    %409 = vector.extract_strided_slice %280 {offsets = [1, 0], sizes = [1, 128], strides = [1, 1]} : vector<9x128xf32> to vector<1x128xf32>
    %410 = vector.broadcast %409 : vector<1x128xf32> to vector<64x128xf32>
    %411 = arith.mulf %408, %410 : vector<64x128xf32>
    %412 = arith.addf %406, %411 : vector<64x128xf32>
    %413 = vector.extract_strided_slice %407 {offsets = [16, 0], sizes = [64, 128], strides = [1, 1]} : vector<96x128xf32> to vector<64x128xf32>
    %414 = vector.extract_strided_slice %280 {offsets = [4, 0], sizes = [1, 128], strides = [1, 1]} : vector<9x128xf32> to vector<1x128xf32>
    %415 = vector.broadcast %414 : vector<1x128xf32> to vector<64x128xf32>
    %416 = arith.mulf %413, %415 : vector<64x128xf32>
    %417 = arith.addf %412, %416 : vector<64x128xf32>
    %418 = vector.extract_strided_slice %407 {offsets = [32, 0], sizes = [64, 128], strides = [1, 1]} : vector<96x128xf32> to vector<64x128xf32>
    %419 = vector.extract_strided_slice %280 {offsets = [7, 0], sizes = [1, 128], strides = [1, 1]} : vector<9x128xf32> to vector<1x128xf32>
    %420 = vector.broadcast %419 : vector<1x128xf32> to vector<64x128xf32>
    %421 = arith.mulf %418, %420 : vector<64x128xf32>
    %422 = arith.addf %417, %421 : vector<64x128xf32>
    %c130_68 = arith.constant 130 : index
    %c0_69 = arith.constant 0 : index
    %423 = vector.load %arg7[%c130_68, %c0_69] : memref<320x128xf32, #tpu.memory_space<vmem>>, vector<96x128xf32>
    %424 = vector.extract_strided_slice %423 {offsets = [0, 0], sizes = [64, 128], strides = [1, 1]} : vector<96x128xf32> to vector<64x128xf32>
    %425 = vector.extract_strided_slice %280 {offsets = [2, 0], sizes = [1, 128], strides = [1, 1]} : vector<9x128xf32> to vector<1x128xf32>
    %426 = vector.broadcast %425 : vector<1x128xf32> to vector<64x128xf32>
    %427 = arith.mulf %424, %426 : vector<64x128xf32>
    %428 = arith.addf %422, %427 : vector<64x128xf32>
    %429 = vector.extract_strided_slice %423 {offsets = [16, 0], sizes = [64, 128], strides = [1, 1]} : vector<96x128xf32> to vector<64x128xf32>
    %430 = vector.extract_strided_slice %280 {offsets = [5, 0], sizes = [1, 128], strides = [1, 1]} : vector<9x128xf32> to vector<1x128xf32>
    %431 = vector.broadcast %430 : vector<1x128xf32> to vector<64x128xf32>
    %432 = arith.mulf %429, %431 : vector<64x128xf32>
    %433 = arith.addf %428, %432 : vector<64x128xf32>
    %434 = vector.extract_strided_slice %423 {offsets = [32, 0], sizes = [64, 128], strides = [1, 1]} : vector<96x128xf32> to vector<64x128xf32>
    %435 = vector.extract_strided_slice %280 {offsets = [8, 0], sizes = [1, 128], strides = [1, 1]} : vector<9x128xf32> to vector<1x128xf32>
    %436 = vector.broadcast %435 : vector<1x128xf32> to vector<64x128xf32>
    %437 = arith.mulf %434, %436 : vector<64x128xf32>
    %438 = arith.addf %433, %437 : vector<64x128xf32>
    %439 = vector.broadcast %281 : vector<1x128xf32> to vector<64x128xf32>
    %440 = arith.addf %438, %439 : vector<64x128xf32>
    %cst_70 = arith.constant 0.000000e+00 : f32
    %441 = vector.broadcast %cst_70 : f32 to vector<64x128xf32>
    %442 = arith.maximumf %440, %441 : vector<64x128xf32>
    %c128_71 = arith.constant 128 : index
    %c0_72 = arith.constant 0 : index
    %443 = vector.load %arg8[%c128_71, %c0_72] : memref<256x128xf32, #tpu.memory_space<vmem>>, vector<64x128xf32>
    tpu.vector_store %arg8[%c128_71, %c0_72], %442 {strides = array<i32>} : memref<256x128xf32, #tpu.memory_space<vmem>>, vector<64x128xf32>,
    %cst_73 = arith.constant 0.000000e+00 : f32
    %444 = vector.broadcast %cst_73 : f32 to vector<64x128xf32>
    %c192_74 = arith.constant 192 : index
    %c0_75 = arith.constant 0 : index
    %445 = vector.load %arg7[%c192_74, %c0_75] : memref<320x128xf32, #tpu.memory_space<vmem>>, vector<96x128xf32>
    %446 = vector.extract_strided_slice %445 {offsets = [0, 0], sizes = [64, 128], strides = [1, 1]} : vector<96x128xf32> to vector<64x128xf32>
    %447 = vector.extract_strided_slice %280 {offsets = [0, 0], sizes = [1, 128], strides = [1, 1]} : vector<9x128xf32> to vector<1x128xf32>
    %448 = vector.broadcast %447 : vector<1x128xf32> to vector<64x128xf32>
    %449 = arith.mulf %446, %448 : vector<64x128xf32>
    %450 = arith.addf %444, %449 : vector<64x128xf32>
    %451 = vector.extract_strided_slice %445 {offsets = [16, 0], sizes = [64, 128], strides = [1, 1]} : vector<96x128xf32> to vector<64x128xf32>
    %452 = vector.extract_strided_slice %280 {offsets = [3, 0], sizes = [1, 128], strides = [1, 1]} : vector<9x128xf32> to vector<1x128xf32>
    %453 = vector.broadcast %452 : vector<1x128xf32> to vector<64x128xf32>
    %454 = arith.mulf %451, %453 : vector<64x128xf32>
    %455 = arith.addf %450, %454 : vector<64x128xf32>
    %456 = vector.extract_strided_slice %445 {offsets = [32, 0], sizes = [64, 128], strides = [1, 1]} : vector<96x128xf32> to vector<64x128xf32>
    %457 = vector.extract_strided_slice %280 {offsets = [6, 0], sizes = [1, 128], strides = [1, 1]} : vector<9x128xf32> to vector<1x128xf32>
    %458 = vector.broadcast %457 : vector<1x128xf32> to vector<64x128xf32>
    %459 = arith.mulf %456, %458 : vector<64x128xf32>
    %460 = arith.addf %455, %459 : vector<64x128xf32>
    %c193_76 = arith.constant 193 : index
    %c0_77 = arith.constant 0 : index
    %461 = vector.load %arg7[%c193_76, %c0_77] : memref<320x128xf32, #tpu.memory_space<vmem>>, vector<96x128xf32>
    %462 = vector.extract_strided_slice %461 {offsets = [0, 0], sizes = [64, 128], strides = [1, 1]} : vector<96x128xf32> to vector<64x128xf32>
    %463 = vector.extract_strided_slice %280 {offsets = [1, 0], sizes = [1, 128], strides = [1, 1]} : vector<9x128xf32> to vector<1x128xf32>
    %464 = vector.broadcast %463 : vector<1x128xf32> to vector<64x128xf32>
    %465 = arith.mulf %462, %464 : vector<64x128xf32>
    %466 = arith.addf %460, %465 : vector<64x128xf32>
    %467 = vector.extract_strided_slice %461 {offsets = [16, 0], sizes = [64, 128], strides = [1, 1]} : vector<96x128xf32> to vector<64x128xf32>
    %468 = vector.extract_strided_slice %280 {offsets = [4, 0], sizes = [1, 128], strides = [1, 1]} : vector<9x128xf32> to vector<1x128xf32>
    %469 = vector.broadcast %468 : vector<1x128xf32> to vector<64x128xf32>
    %470 = arith.mulf %467, %469 : vector<64x128xf32>
    %471 = arith.addf %466, %470 : vector<64x128xf32>
    %472 = vector.extract_strided_slice %461 {offsets = [32, 0], sizes = [64, 128], strides = [1, 1]} : vector<96x128xf32> to vector<64x128xf32>
    %473 = vector.extract_strided_slice %280 {offsets = [7, 0], sizes = [1, 128], strides = [1, 1]} : vector<9x128xf32> to vector<1x128xf32>
    %474 = vector.broadcast %473 : vector<1x128xf32> to vector<64x128xf32>
    %475 = arith.mulf %472, %474 : vector<64x128xf32>
    %476 = arith.addf %471, %475 : vector<64x128xf32>
    %c194_78 = arith.constant 194 : index
    %c0_79 = arith.constant 0 : index
    %477 = vector.load %arg7[%c194_78, %c0_79] : memref<320x128xf32, #tpu.memory_space<vmem>>, vector<96x128xf32>
    %478 = vector.extract_strided_slice %477 {offsets = [0, 0], sizes = [64, 128], strides = [1, 1]} : vector<96x128xf32> to vector<64x128xf32>
    %479 = vector.extract_strided_slice %280 {offsets = [2, 0], sizes = [1, 128], strides = [1, 1]} : vector<9x128xf32> to vector<1x128xf32>
    %480 = vector.broadcast %479 : vector<1x128xf32> to vector<64x128xf32>
    %481 = arith.mulf %478, %480 : vector<64x128xf32>
    %482 = arith.addf %476, %481 : vector<64x128xf32>
    %483 = vector.extract_strided_slice %477 {offsets = [16, 0], sizes = [64, 128], strides = [1, 1]} : vector<96x128xf32> to vector<64x128xf32>
    %484 = vector.extract_strided_slice %280 {offsets = [5, 0], sizes = [1, 128], strides = [1, 1]} : vector<9x128xf32> to vector<1x128xf32>
    %485 = vector.broadcast %484 : vector<1x128xf32> to vector<64x128xf32>
    %486 = arith.mulf %483, %485 : vector<64x128xf32>
    %487 = arith.addf %482, %486 : vector<64x128xf32>
    %488 = vector.extract_strided_slice %477 {offsets = [32, 0], sizes = [64, 128], strides = [1, 1]} : vector<96x128xf32> to vector<64x128xf32>
    %489 = vector.extract_strided_slice %280 {offsets = [8, 0], sizes = [1, 128], strides = [1, 1]} : vector<9x128xf32> to vector<1x128xf32>
    %490 = vector.broadcast %489 : vector<1x128xf32> to vector<64x128xf32>
    %491 = arith.mulf %488, %490 : vector<64x128xf32>
    %492 = arith.addf %487, %491 : vector<64x128xf32>
    %493 = vector.broadcast %281 : vector<1x128xf32> to vector<64x128xf32>
    %494 = arith.addf %492, %493 : vector<64x128xf32>
    %cst_80 = arith.constant 0.000000e+00 : f32
    %495 = vector.broadcast %cst_80 : f32 to vector<64x128xf32>
    %496 = arith.maximumf %494, %495 : vector<64x128xf32>
    %c192_81 = arith.constant 192 : index
    %c0_82 = arith.constant 0 : index
    %497 = vector.load %arg8[%c192_81, %c0_82] : memref<256x128xf32, #tpu.memory_space<vmem>>, vector<64x128xf32>
    tpu.vector_store %arg8[%c192_81, %c0_82], %496 {strides = array<i32>} : memref<256x128xf32, #tpu.memory_space<vmem>>, vector<64x128xf32>,
    %c0_i32_83 = arith.constant 0 : i32
    %498 = tpu.memref_slice %arg11[%c0_i32_83] : memref<2x!tpu.dma_semaphore, #tpu.memory_space<semaphore_mem>> -> memref<1x!tpu.dma_semaphore, #tpu.memory_space<semaphore_mem>>
    %499 = tpu.memref_squeeze %498 : memref<1x!tpu.dma_semaphore, #tpu.memory_space<semaphore_mem>> -> memref<!tpu.dma_semaphore, #tpu.memory_space<semaphore_mem>>
    tpu.wait_dma2 semaphore(%499 : memref<!tpu.dma_semaphore, #tpu.memory_space<semaphore_mem>>) src(%arg4 : memref<1152x250xbf16, #tpu.memory_space<any>>) dst(%arg9 : memref<1152x250xbf16, #tpu.memory_space<vmem>>)
    %c0_84 = arith.constant 0 : index
    %c0_85 = arith.constant 0 : index
    %500 = vector.load %arg2[%c0_84, %c0_85] : memref<19x256xf32, #tpu.memory_space<vmem>>, vector<16x256xf32>
    %501 = arith.truncf %500 : vector<16x256xf32> to vector<16x256xbf16>
    %c0_86 = arith.constant 0 : index
    %c0_87 = arith.constant 0 : index
    %502 = vector.load %arg8[%c0_86, %c0_87] : memref<256x128xf32, #tpu.memory_space<vmem>>, vector<256x128xf32>
    %503 = arith.truncf %502 : vector<256x128xf32> to vector<256x128xbf16>
    %cst_88 = arith.constant dense<0.000000e+00> : vector<16x128xf32>
    %504 = tpu.matmul %501, %503, %cst_88 {dimension_numbers = #tpu.dot_dimension_numbers<[1], [0], [0], [1], [0, 0, 1, 1], [], []>} : vector<16x256xbf16>, vector<256x128xbf16>, vector<16x128xf32> -> vector<16x128xf32>
    %cst_89 = arith.constant 0.00999999977 : f32
    %505 = vector.broadcast %cst_89 : f32 to vector<16x128xf32>
    %506 = arith.mulf %504, %505 : vector<16x128xf32>
    %c16 = arith.constant 16 : index
    %c0_90 = arith.constant 0 : index
    %507 = vector.load %arg2[%c16, %c0_90] : memref<19x256xf32, #tpu.memory_space<vmem>>, vector<1x256xf32>
    %508 = vector.extract_strided_slice %507 {offsets = [0, 0], sizes = [1, 250], strides = [1, 1]} : vector<1x256xf32> to vector<1x250xf32>
    %509 = vector.extract_strided_slice %506 {offsets = [0, 0], sizes = [1, 128], strides = [1, 1]} : vector<16x128xf32> to vector<1x128xf32>
    %510 = arith.truncf %509 : vector<1x128xf32> to vector<1x128xbf16>
    %c0_91 = arith.constant 0 : index
    %c0_92 = arith.constant 0 : index
    %511 = vector.load %arg9[%c0_91, %c0_92] : memref<1152x250xbf16, #tpu.memory_space<vmem>>, vector<128x250xbf16>
    %cst_93 = arith.constant dense<0.000000e+00> : vector<1x250xf32>
    %512 = tpu.matmul %510, %511, %cst_93 {dimension_numbers = #tpu.dot_dimension_numbers<[1], [0], [0], [1], [0, 0, 1, 1], [], []>} : vector<1x128xbf16>, vector<128x250xbf16>, vector<1x250xf32> -> vector<1x250xf32>
    %513 = arith.addf %508, %512 : vector<1x250xf32>
    %514 = vector.extract_strided_slice %506 {offsets = [1, 0], sizes = [1, 128], strides = [1, 1]} : vector<16x128xf32> to vector<1x128xf32>
    %515 = arith.truncf %514 : vector<1x128xf32> to vector<1x128xbf16>
    %c128_94 = arith.constant 128 : index
    %c0_95 = arith.constant 0 : index
    %516 = vector.load %arg9[%c128_94, %c0_95] : memref<1152x250xbf16, #tpu.memory_space<vmem>>, vector<128x250xbf16>
    %cst_96 = arith.constant dense<0.000000e+00> : vector<1x250xf32>
    %517 = tpu.matmul %515, %516, %cst_96 {dimension_numbers = #tpu.dot_dimension_numbers<[1], [0], [0], [1], [0, 0, 1, 1], [], []>} : vector<1x128xbf16>, vector<128x250xbf16>, vector<1x250xf32> -> vector<1x250xf32>
    %518 = arith.addf %513, %517 : vector<1x250xf32>
    %519 = vector.extract_strided_slice %506 {offsets = [2, 0], sizes = [1, 128], strides = [1, 1]} : vector<16x128xf32> to vector<1x128xf32>
    %520 = arith.truncf %519 : vector<1x128xf32> to vector<1x128xbf16>
    %c256_97 = arith.constant 256 : index
    %c0_98 = arith.constant 0 : index
    %521 = vector.load %arg9[%c256_97, %c0_98] : memref<1152x250xbf16, #tpu.memory_space<vmem>>, vector<128x250xbf16>
    %cst_99 = arith.constant dense<0.000000e+00> : vector<1x250xf32>
    %522 = tpu.matmul %520, %521, %cst_99 {dimension_numbers = #tpu.dot_dimension_numbers<[1], [0], [0], [1], [0, 0, 1, 1], [], []>} : vector<1x128xbf16>, vector<128x250xbf16>, vector<1x250xf32> -> vector<1x250xf32>
    %523 = arith.addf %518, %522 : vector<1x250xf32>
    %524 = vector.extract_strided_slice %506 {offsets = [3, 0], sizes = [1, 128], strides = [1, 1]} : vector<16x128xf32> to vector<1x128xf32>
    %525 = arith.truncf %524 : vector<1x128xf32> to vector<1x128xbf16>
    %c384 = arith.constant 384 : index
    %c0_100 = arith.constant 0 : index
    %526 = vector.load %arg9[%c384, %c0_100] : memref<1152x250xbf16, #tpu.memory_space<vmem>>, vector<128x250xbf16>
    %cst_101 = arith.constant dense<0.000000e+00> : vector<1x250xf32>
    %527 = tpu.matmul %525, %526, %cst_101 {dimension_numbers = #tpu.dot_dimension_numbers<[1], [0], [0], [1], [0, 0, 1, 1], [], []>} : vector<1x128xbf16>, vector<128x250xbf16>, vector<1x250xf32> -> vector<1x250xf32>
    %528 = arith.addf %523, %527 : vector<1x250xf32>
    %529 = vector.extract_strided_slice %506 {offsets = [4, 0], sizes = [1, 128], strides = [1, 1]} : vector<16x128xf32> to vector<1x128xf32>
    %530 = arith.truncf %529 : vector<1x128xf32> to vector<1x128xbf16>
    %c512 = arith.constant 512 : index
    %c0_102 = arith.constant 0 : index
    %531 = vector.load %arg9[%c512, %c0_102] : memref<1152x250xbf16, #tpu.memory_space<vmem>>, vector<128x250xbf16>
    %cst_103 = arith.constant dense<0.000000e+00> : vector<1x250xf32>
    %532 = tpu.matmul %530, %531, %cst_103 {dimension_numbers = #tpu.dot_dimension_numbers<[1], [0], [0], [1], [0, 0, 1, 1], [], []>} : vector<1x128xbf16>, vector<128x250xbf16>, vector<1x250xf32> -> vector<1x250xf32>
    %533 = arith.addf %528, %532 : vector<1x250xf32>
    %534 = vector.extract_strided_slice %506 {offsets = [5, 0], sizes = [1, 128], strides = [1, 1]} : vector<16x128xf32> to vector<1x128xf32>
    %535 = arith.truncf %534 : vector<1x128xf32> to vector<1x128xbf16>
    %c640 = arith.constant 640 : index
    %c0_104 = arith.constant 0 : index
    %536 = vector.load %arg9[%c640, %c0_104] : memref<1152x250xbf16, #tpu.memory_space<vmem>>, vector<128x250xbf16>
    %cst_105 = arith.constant dense<0.000000e+00> : vector<1x250xf32>
    %537 = tpu.matmul %535, %536, %cst_105 {dimension_numbers = #tpu.dot_dimension_numbers<[1], [0], [0], [1], [0, 0, 1, 1], [], []>} : vector<1x128xbf16>, vector<128x250xbf16>, vector<1x250xf32> -> vector<1x250xf32>
    %538 = arith.addf %533, %537 : vector<1x250xf32>
    %539 = vector.extract_strided_slice %506 {offsets = [6, 0], sizes = [1, 128], strides = [1, 1]} : vector<16x128xf32> to vector<1x128xf32>
    %540 = arith.truncf %539 : vector<1x128xf32> to vector<1x128xbf16>
    %c768 = arith.constant 768 : index
    %c0_106 = arith.constant 0 : index
    %541 = vector.load %arg9[%c768, %c0_106] : memref<1152x250xbf16, #tpu.memory_space<vmem>>, vector<128x250xbf16>
    %cst_107 = arith.constant dense<0.000000e+00> : vector<1x250xf32>
    %542 = tpu.matmul %540, %541, %cst_107 {dimension_numbers = #tpu.dot_dimension_numbers<[1], [0], [0], [1], [0, 0, 1, 1], [], []>} : vector<1x128xbf16>, vector<128x250xbf16>, vector<1x250xf32> -> vector<1x250xf32>
    %543 = arith.addf %538, %542 : vector<1x250xf32>
    %544 = vector.extract_strided_slice %506 {offsets = [7, 0], sizes = [1, 128], strides = [1, 1]} : vector<16x128xf32> to vector<1x128xf32>
    %545 = arith.truncf %544 : vector<1x128xf32> to vector<1x128xbf16>
    %c896 = arith.constant 896 : index
    %c0_108 = arith.constant 0 : index
    %546 = vector.load %arg9[%c896, %c0_108] : memref<1152x250xbf16, #tpu.memory_space<vmem>>, vector<128x250xbf16>
    %cst_109 = arith.constant dense<0.000000e+00> : vector<1x250xf32>
    %547 = tpu.matmul %545, %546, %cst_109 {dimension_numbers = #tpu.dot_dimension_numbers<[1], [0], [0], [1], [0, 0, 1, 1], [], []>} : vector<1x128xbf16>, vector<128x250xbf16>, vector<1x250xf32> -> vector<1x250xf32>
    %548 = arith.addf %543, %547 : vector<1x250xf32>
    %549 = vector.extract_strided_slice %506 {offsets = [8, 0], sizes = [1, 128], strides = [1, 1]} : vector<16x128xf32> to vector<1x128xf32>
    %550 = arith.truncf %549 : vector<1x128xf32> to vector<1x128xbf16>
    %c1024 = arith.constant 1024 : index
    %c0_110 = arith.constant 0 : index
    %551 = vector.load %arg9[%c1024, %c0_110] : memref<1152x250xbf16, #tpu.memory_space<vmem>>, vector<128x250xbf16>
    %cst_111 = arith.constant dense<0.000000e+00> : vector<1x250xf32>
    %552 = tpu.matmul %550, %551, %cst_111 {dimension_numbers = #tpu.dot_dimension_numbers<[1], [0], [0], [1], [0, 0, 1, 1], [], []>} : vector<1x128xbf16>, vector<128x250xbf16>, vector<1x250xf32> -> vector<1x250xf32>
    %553 = arith.addf %548, %552 : vector<1x250xf32>
    %c1_i32_112 = arith.constant 1 : i32
    %554 = tpu.memref_slice %arg11[%c1_i32_112] : memref<2x!tpu.dma_semaphore, #tpu.memory_space<semaphore_mem>> -> memref<1x!tpu.dma_semaphore, #tpu.memory_space<semaphore_mem>>
    %555 = tpu.memref_squeeze %554 : memref<1x!tpu.dma_semaphore, #tpu.memory_space<semaphore_mem>> -> memref<!tpu.dma_semaphore, #tpu.memory_space<semaphore_mem>>
    tpu.wait_dma2 semaphore(%555 : memref<!tpu.dma_semaphore, #tpu.memory_space<semaphore_mem>>) src(%arg3 : memref<320x64xf32, #tpu.memory_space<any>>) dst(%arg10 : memref<320x64xf32, #tpu.memory_space<vmem>>)
    %c0_113 = arith.constant 0 : index
    %c0_114 = arith.constant 0 : index
    %556 = vector.load %arg10[%c0_113, %c0_114] : memref<320x64xf32, #tpu.memory_space<vmem>>, vector<250x64xf32>
    %cst_115 = arith.constant dense<0.000000e+00> : vector<1x64xf32>
    %557 = tpu.matmul %553, %556, %cst_115 {dimension_numbers = #tpu.dot_dimension_numbers<[1], [0], [0], [1], [0, 0, 1, 1], [], []>} : vector<1x250xf32>, vector<250x64xf32>, vector<1x64xf32> -> vector<1x64xf32>
    %c17 = arith.constant 17 : index
    %c0_116 = arith.constant 0 : index
    %558 = vector.load %arg2[%c17, %c0_116] : memref<19x256xf32, #tpu.memory_space<vmem>>, vector<1x256xf32>
    %559 = vector.extract_strided_slice %558 {offsets = [0, 0], sizes = [1, 64], strides = [1, 1]} : vector<1x256xf32> to vector<1x64xf32>
    %560 = arith.addf %557, %559 : vector<1x64xf32>
    %cst_117 = arith.constant 0.000000e+00 : f32
    %561 = vector.broadcast %cst_117 : f32 to vector<1x64xf32>
    %562 = arith.maximumf %560, %561 : vector<1x64xf32>
    %c256_118 = arith.constant 256 : index
    %c0_119 = arith.constant 0 : index
    %563 = vector.load %arg10[%c256_118, %c0_119] : memref<320x64xf32, #tpu.memory_space<vmem>>, vector<64x64xf32>
    %cst_120 = arith.constant dense<0.000000e+00> : vector<1x64xf32>
    %564 = tpu.matmul %562, %563, %cst_120 {dimension_numbers = #tpu.dot_dimension_numbers<[1], [0], [0], [1], [0, 0, 1, 1], [], []>} : vector<1x64xf32>, vector<64x64xf32>, vector<1x64xf32> -> vector<1x64xf32>
    %565 = vector.extract_strided_slice %564 {offsets = [0, 0], sizes = [1, 10], strides = [1, 1]} : vector<1x64xf32> to vector<1x10xf32>
    %c18 = arith.constant 18 : index
    %c0_121 = arith.constant 0 : index
    %566 = vector.load %arg2[%c18, %c0_121] : memref<19x256xf32, #tpu.memory_space<vmem>>, vector<1x256xf32>
    %567 = vector.extract_strided_slice %566 {offsets = [0, 0], sizes = [1, 10], strides = [1, 1]} : vector<1x256xf32> to vector<1x10xf32>
    %568 = arith.addf %565, %567 : vector<1x10xf32>
    %c0_122 = arith.constant 0 : index
    %c0_123 = arith.constant 0 : index
    %569 = vector.load %arg5[%c0_122, %c0_123] : memref<1x10xf32, #tpu.memory_space<vmem>>, vector<1x10xf32>
    tpu.vector_store %arg5[%c0_122, %c0_123], %568 {strides = array<i32>} : memref<1x10xf32, #tpu.memory_space<vmem>>, vector<1x10xf32>,
    return
  }
}

</mosaic_0001>

<bundles_post_ra>
// kernel: forward.1
= control target key start
LH: loop header
LB: loop body
LE: loop exit
PB: predicated region body
PF: predicated region fallthrough
CT: control target
= control target key end

     0   :  { %10 = vsyncpa [#allocation9], 0  ;;  %s7974_s0 = inlined_call_operand.vmem [shape: f32[360,1], index: 0, kind: input, shape index: {}]   ;;  %s7975_s1 = inlined_call_operand.vmem [shape: f32[20,128], index: 1, kind: input, shape index: {}]   ;;  %s7976_s2 = inlined_call_operand.vmem [shape: f32[19,256], index: 2, kind: input, shape index: {}]   ;;  %s7977_s3 = inlined_call_operand.vmem [shape: f32[320,64], index: 3, kind: input, shape index: {}]   ;;  %s7978_s4 = inlined_call_operand.vmem [shape: bf16[1152,250], index: 4, kind: input, shape index: {}]   ;;  %s7979_s5 = inlined_call_operand.hbm [shape: f32[1,10], index: 5, kind: output, shape index: {}]  }
   0x1   :  { %v35_v0 = vld [vmem:[%s7978_s4] sm:$0xf]  ;;  %v37_v1 = vld [vmem:[%s7978_s4 + $0x8] sm:$0xf]  ;;  %v39_v2 = vld [vmem:[%s7978_s4 + $0x4] sm:$0xf] }
   0x2   :  { %36 = vst [vmem:[#allocation5] sm:$0xf] %v35_v0  ;;  %38 = vst [vmem:[#allocation5 + $0x4] sm:$0xf] %v37_v1  ;;  %v41_v3 = vld [vmem:[%s7978_s4 + $0xc] sm:$0xff]   ;;  %v49_v6 = vld [vmem:[%s7978_s4 + $0x1c] sm:$0xff]  }
   0x3   :  { %v45_v4 = vld [vmem:[%s7978_s4 + $0x18] sm:$0xf]  ;;  %40 = vst [vmem:[#allocation5 + $0x8] sm:$0xf] %v39_v2  ;;  %42 = vst [vmem:[#allocation5 + $0xc] sm:$0xff] %v41_v3   ;;  %v57_v9 = vld [vmem:[%s7978_s4 + $0x2c] sm:$0xff]  }
   0x4   :  { %46 = vst [vmem:[#allocation5 + $0x14] sm:$0xf] %v45_v4  ;;  %v47_v5 = vld [vmem:[%s7978_s4 + $0x14] sm:$0xf]  ;;  %v53_v7 = vld [vmem:[%s7978_s4 + $0x28] sm:$0xf] }
   0x5   :  { %48 = vst [vmem:[#allocation5 + $0x18] sm:$0xf] %v47_v5  ;;  %50 = vst [vmem:[#allocation5 + $0x1c] sm:$0xff] %v49_v6   ;;  %v55_v8 = vld [vmem:[%s7978_s4 + $0x24] sm:$0xf]  ;;  %v65_v12 = vld [vmem:[%s7978_s4 + $0x3c] sm:$0xff]  }
   0x6   :  { %54 = vst [vmem:[#allocation5 + $0x24] sm:$0xf] %v53_v7  ;;  %v61_v10 = vld [vmem:[%s7978_s4 + $0x38] sm:$0xf]  ;;  %56 = vst [vmem:[#allocation5 + $0x28] sm:$0xf] %v55_v8 }
   0x7   :  { %58 = vst [vmem:[#allocation5 + $0x2c] sm:$0xff] %v57_v9   ;;  %62 = vst [vmem:[#allocation5 + $0x34] sm:$0xf] %v61_v10  ;;  %v63_v11 = vld [vmem:[%s7978_s4 + $0x34] sm:$0xf]  ;;  %v73_v15 = vld [vmem:[%s7978_s4 + $0x4c] sm:$0xff]  }
   0x8   :  { %v69_v13 = vld [vmem:[%s7978_s4 + $0x48] sm:$0xf]  ;;  %64 = vst [vmem:[#allocation5 + $0x38] sm:$0xf] %v63_v11  ;;  %66 = vst [vmem:[#allocation5 + $0x3c] sm:$0xff] %v65_v12   ;;  %v81_v18 = vld [vmem:[%s7978_s4 + $0x5c] sm:$0xff]  }
   0x9   :  { %70 = vst [vmem:[#allocation5 + $0x44] sm:$0xf] %v69_v13  ;;  %v71_v14 = vld [vmem:[%s7978_s4 + $0x44] sm:$0xf]  ;;  %v77_v16 = vld [vmem:[%s7978_s4 + $0x58] sm:$0xf] }
   0xa   :  { %72 = vst [vmem:[#allocation5 + $0x48] sm:$0xf] %v71_v14  ;;  %74 = vst [vmem:[#allocation5 + $0x4c] sm:$0xff] %v73_v15   ;;  %v79_v17 = vld [vmem:[%s7978_s4 + $0x54] sm:$0xf]  ;;  %v89_v21 = vld [vmem:[%s7978_s4 + $0x6c] sm:$0xff]  }
   0xb   :  { %78 = vst [vmem:[#allocation5 + $0x54] sm:$0xf] %v77_v16  ;;  %v85_v19 = vld [vmem:[%s7978_s4 + $0x68] sm:$0xf]  ;;  %80 = vst [vmem:[#allocation5 + $0x58] sm:$0xf] %v79_v17 }
   0xc   :  { %82 = vst [vmem:[#allocation5 + $0x5c] sm:$0xff] %v81_v18   ;;  %86 = vst [vmem:[#allocation5 + $0x64] sm:$0xf] %v85_v19  ;;  %v87_v20 = vld [vmem:[%s7978_s4 + $0x64] sm:$0xf]  ;;  %v97_v24 = vld [vmem:[%s7978_s4 + $0x7c] sm:$0xff]  }
   0xd   :  { %v93_v22 = vld [vmem:[%s7978_s4 + $0x78] sm:$0xf]  ;;  %88 = vst [vmem:[#allocation5 + $0x68] sm:$0xf] %v87_v20  ;;  %90 = vst [vmem:[#allocation5 + $0x6c] sm:$0xff] %v89_v21   ;;  %v105_v27 = vld [vmem:[%s7978_s4 + $0x8c] sm:$0xff]  }
   0xe   :  { %94 = vst [vmem:[#allocation5 + $0x74] sm:$0xf] %v93_v22  ;;  %v95_v23 = vld [vmem:[%s7978_s4 + $0x74] sm:$0xf]  ;;  %v101_v25 = vld [vmem:[%s7978_s4 + $0x88] sm:$0xf] }
   0xf   :  { %96 = vst [vmem:[#allocation5 + $0x78] sm:$0xf] %v95_v23  ;;  %98 = vst [vmem:[#allocation5 + $0x7c] sm:$0xff] %v97_v24   ;;  %v103_v26 = vld [vmem:[%s7978_s4 + $0x84] sm:$0xf]  ;;  %v113_v30 = vld [vmem:[%s7978_s4 + $0x9c] sm:$0xff]  }
  0x10   :  { %102 = vst [vmem:[#allocation5 + $0x84] sm:$0xf] %v101_v25  ;;  %v109_v28 = vld [vmem:[%s7978_s4 + $0x98] sm:$0xf]  ;;  %104 = vst [vmem:[#allocation5 + $0x88] sm:$0xf] %v103_v26 }
  0x11   :  { %106 = vst [vmem:[#allocation5 + $0x8c] sm:$0xff] %v105_v27   ;;  %110 = vst [vmem:[#allocation5 + $0x94] sm:$0xf] %v109_v28  ;;  %v111_v29 = vld [vmem:[%s7978_s4 + $0x94] sm:$0xf]  ;;  %v121_v33 = vld [vmem:[%s7978_s4 + $0xac] sm:$0xff]  }
  0x12   :  { %v117_v31 = vld [vmem:[%s7978_s4 + $0xa8] sm:$0xf]  ;;  %112 = vst [vmem:[#allocation5 + $0x98] sm:$0xf] %v111_v29  ;;  %114 = vst [vmem:[#allocation5 + $0x9c] sm:$0xff] %v113_v30   ;;  %v129_v36 = vld [vmem:[%s7978_s4 + $0xbc] sm:$0xff]  }
  0x13   :  { %118 = vst [vmem:[#allocation5 + $0xa4] sm:$0xf] %v117_v31  ;;  %v119_v32 = vld [vmem:[%s7978_s4 + $0xa4] sm:$0xf]  ;;  %v125_v34 = vld [vmem:[%s7978_s4 + $0xb8] sm:$0xf] }
  0x14   :  { %120 = vst [vmem:[#allocation5 + $0xa8] sm:$0xf] %v119_v32  ;;  %122 = vst [vmem:[#allocation5 + $0xac] sm:$0xff] %v121_v33   ;;  %v127_v35 = vld [vmem:[%s7978_s4 + $0xb4] sm:$0xf]  ;;  %v137_v39 = vld [vmem:[%s7978_s4 + $0xcc] sm:$0xff]  }
  0x15   :  { %126 = vst [vmem:[#allocation5 + $0xb4] sm:$0xf] %v125_v34  ;;  %v133_v37 = vld [vmem:[%s7978_s4 + $0xc8] sm:$0xf]  ;;  %128 = vst [vmem:[#allocation5 + $0xb8] sm:$0xf] %v127_v35 }
  0x16   :  { %130 = vst [vmem:[#allocation5 + $0xbc] sm:$0xff] %v129_v36   ;;  %134 = vst [vmem:[#allocation5 + $0xc4] sm:$0xf] %v133_v37  ;;  %v135_v38 = vld [vmem:[%s7978_s4 + $0xc4] sm:$0xf]  ;;  %v145_v42 = vld [vmem:[%s7978_s4 + $0xdc] sm:$0xff]  }
  0x17   :  { %v141_v40 = vld [vmem:[%s7978_s4 + $0xd8] sm:$0xf]  ;;  %136 = vst [vmem:[#allocation5 + $0xc8] sm:$0xf] %v135_v38  ;;  %138 = vst [vmem:[#allocation5 + $0xcc] sm:$0xff] %v137_v39   ;;  %v153_v45 = vld [vmem:[%s7978_s4 + $0xec] sm:$0xff]  }
  0x18   :  { %142 = vst [vmem:[#allocation5 + $0xd4] sm:$0xf] %v141_v40  ;;  %v143_v41 = vld [vmem:[%s7978_s4 + $0xd4] sm:$0xf]  ;;  %v149_v43 = vld [vmem:[%s7978_s4 + $0xe8] sm:$0xf] }
  0x19   :  { %144 = vst [vmem:[#allocation5 + $0xd8] sm:$0xf] %v143_v41  ;;  %146 = vst [vmem:[#allocation5 + $0xdc] sm:$0xff] %v145_v42   ;;  %v151_v44 = vld [vmem:[%s7978_s4 + $0xe4] sm:$0xf]  ;;  %v161_v48 = vld [vmem:[%s7978_s4 + $0xfc] sm:$0xff]  }
  0x1a   :  { %150 = vst [vmem:[#allocation5 + $0xe4] sm:$0xf] %v149_v43  ;;  %v157_v46 = vld [vmem:[%s7978_s4 + $0xf8] sm:$0xf]  ;;  %152 = vst [vmem:[#allocation5 + $0xe8] sm:$0xf] %v151_v44 }
  0x1b   :  { %154 = vst [vmem:[#allocation5 + $0xec] sm:$0xff] %v153_v45   ;;  %158 = vst [vmem:[#allocation5 + $0xf4] sm:$0xf] %v157_v46  ;;  %v159_v47 = vld [vmem:[%s7978_s4 + $0xf4] sm:$0xf]  ;;  %v169_v51 = vld [vmem:[%s7978_s4 + $0x10c] sm:$0xff]  }
  0x1c   :  { %v165_v49 = vld [vmem:[%s7978_s4 + $0x108] sm:$0xf]  ;;  %160 = vst [vmem:[#allocation5 + $0xf8] sm:$0xf] %v159_v47  ;;  %162 = vst [vmem:[#allocation5 + $0xfc] sm:$0xff] %v161_v48   ;;  %v177_v54 = vld [vmem:[%s7978_s4 + $0x11c] sm:$0xff]  }
  0x1d   :  { %166 = vst [vmem:[#allocation5 + $0x104] sm:$0xf] %v165_v49  ;;  %v167_v50 = vld [vmem:[%s7978_s4 + $0x104] sm:$0xf]  ;;  %v173_v52 = vld [vmem:[%s7978_s4 + $0x118] sm:$0xf] }
  0x1e   :  { %168 = vst [vmem:[#allocation5 + $0x108] sm:$0xf] %v167_v50  ;;  %170 = vst [vmem:[#allocation5 + $0x10c] sm:$0xff] %v169_v51   ;;  %v175_v53 = vld [vmem:[%s7978_s4 + $0x114] sm:$0xf]  ;;  %v185_v57 = vld [vmem:[%s7978_s4 + $0x12c] sm:$0xff]  }
  0x1f   :  { %174 = vst [vmem:[#allocation5 + $0x114] sm:$0xf] %v173_v52  ;;  %v181_v55 = vld [vmem:[%s7978_s4 + $0x128] sm:$0xf]  ;;  %176 = vst [vmem:[#allocation5 + $0x118] sm:$0xf] %v175_v53 }
  0x20   :  { %178 = vst [vmem:[#allocation5 + $0x11c] sm:$0xff] %v177_v54   ;;  %182 = vst [vmem:[#allocation5 + $0x124] sm:$0xf] %v181_v55  ;;  %v183_v56 = vld [vmem:[%s7978_s4 + $0x124] sm:$0xf]  ;;  %v193_v60 = vld [vmem:[%s7978_s4 + $0x13c] sm:$0xff]  }
  0x21   :  { %v189_v58 = vld [vmem:[%s7978_s4 + $0x138] sm:$0xf]  ;;  %184 = vst [vmem:[#allocation5 + $0x128] sm:$0xf] %v183_v56  ;;  %186 = vst [vmem:[#allocation5 + $0x12c] sm:$0xff] %v185_v57   ;;  %v201_v63 = vld [vmem:[%s7978_s4 + $0x14c] sm:$0xff]  }
  0x22   :  { %190 = vst [vmem:[#allocation5 + $0x134] sm:$0xf] %v189_v58  ;;  %v191_v59 = vld [vmem:[%s7978_s4 + $0x134] sm:$0xf]  ;;  %v197_v61 = vld [vmem:[%s7978_s4 + $0x148] sm:$0xf] }
  0x23   :  { %192 = vst [vmem:[#allocation5 + $0x138] sm:$0xf] %v191_v59  ;;  %194 = vst [vmem:[#allocation5 + $0x13c] sm:$0xff] %v193_v60   ;;  %v199_v62 = vld [vmem:[%s7978_s4 + $0x144] sm:$0xf]  ;;  %v209_v2 = vld [vmem:[%s7978_s4 + $0x15c] sm:$0xff]  }
  0x24   :  { %198 = vst [vmem:[#allocation5 + $0x144] sm:$0xf] %v197_v61  ;;  %v205_v0 = vld [vmem:[%s7978_s4 + $0x158] sm:$0xf]  ;;  %200 = vst [vmem:[#allocation5 + $0x148] sm:$0xf] %v199_v62 }
  0x25   :  { %202 = vst [vmem:[#allocation5 + $0x14c] sm:$0xff] %v201_v63   ;;  %206 = vst [vmem:[#allocation5 + $0x154] sm:$0xf] %v205_v0  ;;  %v207_v1 = vld [vmem:[%s7978_s4 + $0x154] sm:$0xf]  ;;  %v217_v5 = vld [vmem:[%s7978_s4 + $0x16c] sm:$0xff]  }
  0x26   :  { %v213_v3 = vld [vmem:[%s7978_s4 + $0x168] sm:$0xf]  ;;  %208 = vst [vmem:[#allocation5 + $0x158] sm:$0xf] %v207_v1  ;;  %210 = vst [vmem:[#allocation5 + $0x15c] sm:$0xff] %v209_v2   ;;  %v225_v8 = vld [vmem:[%s7978_s4 + $0x17c] sm:$0xff]  }
  0x27   :  { %214 = vst [vmem:[#allocation5 + $0x164] sm:$0xf] %v213_v3  ;;  %v215_v4 = vld [vmem:[%s7978_s4 + $0x164] sm:$0xf]  ;;  %v221_v6 = vld [vmem:[%s7978_s4 + $0x178] sm:$0xf] }
  0x28   :  { %216 = vst [vmem:[#allocation5 + $0x168] sm:$0xf] %v215_v4  ;;  %218 = vst [vmem:[#allocation5 + $0x16c] sm:$0xff] %v217_v5   ;;  %v223_v7 = vld [vmem:[%s7978_s4 + $0x174] sm:$0xf]  ;;  %v233_v11 = vld [vmem:[%s7978_s4 + $0x18c] sm:$0xff]  }
  0x29   :  { %222 = vst [vmem:[#allocation5 + $0x174] sm:$0xf] %v221_v6  ;;  %v229_v9 = vld [vmem:[%s7978_s4 + $0x188] sm:$0xf]  ;;  %224 = vst [vmem:[#allocation5 + $0x178] sm:$0xf] %v223_v7 }
  0x2a   :  { %226 = vst [vmem:[#allocation5 + $0x17c] sm:$0xff] %v225_v8   ;;  %230 = vst [vmem:[#allocation5 + $0x184] sm:$0xf] %v229_v9  ;;  %v231_v10 = vld [vmem:[%s7978_s4 + $0x184] sm:$0xf]  ;;  %v241_v14 = vld [vmem:[%s7978_s4 + $0x19c] sm:$0xff]  }
  0x2b   :  { %v237_v12 = vld [vmem:[%s7978_s4 + $0x198] sm:$0xf]  ;;  %232 = vst [vmem:[#allocation5 + $0x188] sm:$0xf] %v231_v10  ;;  %234 = vst [vmem:[#allocation5 + $0x18c] sm:$0xff] %v233_v11   ;;  %v249_v17 = vld [vmem:[%s7978_s4 + $0x1ac] sm:$0xff]  }
  0x2c   :  { %238 = vst [vmem:[#allocation5 + $0x194] sm:$0xf] %v237_v12  ;;  %v239_v13 = vld [vmem:[%s7978_s4 + $0x194] sm:$0xf]  ;;  %v245_v15 = vld [vmem:[%s7978_s4 + $0x1a8] sm:$0xf] }
  0x2d   :  { %240 = vst [vmem:[#allocation5 + $0x198] sm:$0xf] %v239_v13  ;;  %242 = vst [vmem:[#allocation5 + $0x19c] sm:$0xff] %v241_v14   ;;  %v247_v16 = vld [vmem:[%s7978_s4 + $0x1a4] sm:$0xf]  ;;  %v257_v20 = vld [vmem:[%s7978_s4 + $0x1bc] sm:$0xff]  }
  0x2e   :  { %246 = vst [vmem:[#allocation5 + $0x1a4] sm:$0xf] %v245_v15  ;;  %v253_v18 = vld [vmem:[%s7978_s4 + $0x1b8] sm:$0xf]  ;;  %248 = vst [vmem:[#allocation5 + $0x1a8] sm:$0xf] %v247_v16 }
  0x2f   :  { %250 = vst [vmem:[#allocation5 + $0x1ac] sm:$0xff] %v249_v17   ;;  %254 = vst [vmem:[#allocation5 + $0x1b4] sm:$0xf] %v253_v18  ;;  %v255_v19 = vld [vmem:[%s7978_s4 + $0x1b4] sm:$0xf]  ;;  %v265_v23 = vld [vmem:[%s7978_s4 + $0x1cc] sm:$0xff]  }
  0x30   :  { %v261_v21 = vld [vmem:[%s7978_s4 + $0x1c8] sm:$0xf]  ;;  %256 = vst [vmem:[#allocation5 + $0x1b8] sm:$0xf] %v255_v19  ;;  %258 = vst [vmem:[#allocation5 + $0x1bc] sm:$0xff] %v257_v20   ;;  %v273_v26 = vld [vmem:[%s7978_s4 + $0x1dc] sm:$0xff]  }
  0x31   :  { %262 = vst [vmem:[#allocation5 + $0x1c4] sm:$0xf] %v261_v21  ;;  %v263_v22 = vld [vmem:[%s7978_s4 + $0x1c4] sm:$0xf]  ;;  %v269_v24 = vld [vmem:[%s7978_s4 + $0x1d8] sm:$0xf] }
  0x32   :  { %264 = vst [vmem:[#allocation5 + $0x1c8] sm:$0xf] %v263_v22  ;;  %266 = vst [vmem:[#allocation5 + $0x1cc] sm:$0xff] %v265_v23   ;;  %v271_v25 = vld [vmem:[%s7978_s4 + $0x1d4] sm:$0xf]  ;;  %v281_v29 = vld [vmem:[%s7978_s4 + $0x1ec] sm:$0xff]  }
  0x33   :  { %270 = vst [vmem:[#allocation5 + $0x1d4] sm:$0xf] %v269_v24  ;;  %v277_v27 = vld [vmem:[%s7978_s4 + $0x1e8] sm:$0xf]  ;;  %272 = vst [vmem:[#allocation5 + $0x1d8] sm:$0xf] %v271_v25 }
  0x34   :  { %274 = vst [vmem:[#allocation5 + $0x1dc] sm:$0xff] %v273_v26   ;;  %278 = vst [vmem:[#allocation5 + $0x1e4] sm:$0xf] %v277_v27  ;;  %v279_v28 = vld [vmem:[%s7978_s4 + $0x1e4] sm:$0xf]  ;;  %v289_v32 = vld [vmem:[%s7978_s4 + $0x1fc] sm:$0xff]  }
  0x35   :  { %v285_v30 = vld [vmem:[%s7978_s4 + $0x1f8] sm:$0xf]  ;;  %280 = vst [vmem:[#allocation5 + $0x1e8] sm:$0xf] %v279_v28  ;;  %282 = vst [vmem:[#allocation5 + $0x1ec] sm:$0xff] %v281_v29   ;;  %v297_v35 = vld [vmem:[%s7978_s4 + $0x20c] sm:$0xff]  }
  0x36   :  { %286 = vst [vmem:[#allocation5 + $0x1f4] sm:$0xf] %v285_v30  ;;  %v287_v31 = vld [vmem:[%s7978_s4 + $0x1f4] sm:$0xf]  ;;  %v293_v33 = vld [vmem:[%s7978_s4 + $0x208] sm:$0xf] }
  0x37   :  { %288 = vst [vmem:[#allocation5 + $0x1f8] sm:$0xf] %v287_v31  ;;  %290 = vst [vmem:[#allocation5 + $0x1fc] sm:$0xff] %v289_v32   ;;  %v295_v34 = vld [vmem:[%s7978_s4 + $0x204] sm:$0xf]  ;;  %v305_v38 = vld [vmem:[%s7978_s4 + $0x21c] sm:$0xff]  }
  0x38   :  { %294 = vst [vmem:[#allocation5 + $0x204] sm:$0xf] %v293_v33  ;;  %v301_v36 = vld [vmem:[%s7978_s4 + $0x218] sm:$0xf]  ;;  %296 = vst [vmem:[#allocation5 + $0x208] sm:$0xf] %v295_v34 }
  0x39   :  { %298 = vst [vmem:[#allocation5 + $0x20c] sm:$0xff] %v297_v35   ;;  %302 = vst [vmem:[#allocation5 + $0x214] sm:$0xf] %v301_v36  ;;  %v303_v37 = vld [vmem:[%s7978_s4 + $0x214] sm:$0xf]  ;;  %v313_v41 = vld [vmem:[%s7978_s4 + $0x22c] sm:$0xff]  }
  0x3a   :  { %v309_v39 = vld [vmem:[%s7978_s4 + $0x228] sm:$0xf]  ;;  %304 = vst [vmem:[#allocation5 + $0x218] sm:$0xf] %v303_v37  ;;  %306 = vst [vmem:[#allocation5 + $0x21c] sm:$0xff] %v305_v38   ;;  %v321_v44 = vld [vmem:[%s7978_s4 + $0x23c] sm:$0xff]  }
  0x3b   :  { %310 = vst [vmem:[#allocation5 + $0x224] sm:$0xf] %v309_v39  ;;  %v311_v40 = vld [vmem:[%s7978_s4 + $0x224] sm:$0xf]  ;;  %v317_v42 = vld [vmem:[%s7978_s4 + $0x238] sm:$0xf] }
  0x3c   :  { %312 = vst [vmem:[#allocation5 + $0x228] sm:$0xf] %v311_v40  ;;  %314 = vst [vmem:[#allocation5 + $0x22c] sm:$0xff] %v313_v41   ;;  %v319_v43 = vld [vmem:[%s7978_s4 + $0x234] sm:$0xf]  ;;  %v329_v47 = vld [vmem:[%s7978_s4 + $0x24c] sm:$0xff]  }
  0x3d   :  { %318 = vst [vmem:[#allocation5 + $0x234] sm:$0xf] %v317_v42  ;;  %v325_v45 = vld [vmem:[%s7978_s4 + $0x248] sm:$0xf]  ;;  %320 = vst [vmem:[#allocation5 + $0x238] sm:$0xf] %v319_v43 }
  0x3e   :  { %322 = vst [vmem:[#allocation5 + $0x23c] sm:$0xff] %v321_v44   ;;  %326 = vst [vmem:[#allocation5 + $0x244] sm:$0xf] %v325_v45  ;;  %v327_v46 = vld [vmem:[%s7978_s4 + $0x244] sm:$0xf]  ;;  %v337_v50 = vld [vmem:[%s7978_s4 + $0x25c] sm:$0xff]  }
  0x3f   :  { %v333_v48 = vld [vmem:[%s7978_s4 + $0x258] sm:$0xf]  ;;  %328 = vst [vmem:[#allocation5 + $0x248] sm:$0xf] %v327_v46  ;;  %330 = vst [vmem:[#allocation5 + $0x24c] sm:$0xff] %v329_v47   ;;  %v345_v53 = vld [vmem:[%s7978_s4 + $0x26c] sm:$0xff]  }
  0x40   :  { %334 = vst [vmem:[#allocation5 + $0x254] sm:$0xf] %v333_v48  ;;  %v335_v49 = vld [vmem:[%s7978_s4 + $0x254] sm:$0xf]  ;;  %v341_v51 = vld [vmem:[%s7978_s4 + $0x268] sm:$0xf] }
  0x41   :  { %336 = vst [vmem:[#allocation5 + $0x258] sm:$0xf] %v335_v49  ;;  %338 = vst [vmem:[#allocation5 + $0x25c] sm:$0xff] %v337_v50   ;;  %v343_v52 = vld [vmem:[%s7978_s4 + $0x264] sm:$0xf]  ;;  %v353_v56 = vld [vmem:[%s7978_s4 + $0x27c] sm:$0xff]  }
  0x42   :  { %342 = vst [vmem:[#allocation5 + $0x264] sm:$0xf] %v341_v51  ;;  %v349_v54 = vld [vmem:[%s7978_s4 + $0x278] sm:$0xf]  ;;  %344 = vst [vmem:[#allocation5 + $0x268] sm:$0xf] %v343_v52 }
  0x43   :  { %346 = vst [vmem:[#allocation5 + $0x26c] sm:$0xff] %v345_v53   ;;  %350 = vst [vmem:[#allocation5 + $0x274] sm:$0xf] %v349_v54  ;;  %v351_v55 = vld [vmem:[%s7978_s4 + $0x274] sm:$0xf]  ;;  %v361_v59 = vld [vmem:[%s7978_s4 + $0x28c] sm:$0xff]  }
  0x44   :  { %v357_v57 = vld [vmem:[%s7978_s4 + $0x288] sm:$0xf]  ;;  %352 = vst [vmem:[#allocation5 + $0x278] sm:$0xf] %v351_v55  ;;  %354 = vst [vmem:[#allocation5 + $0x27c] sm:$0xff] %v353_v56   ;;  %v369_v62 = vld [vmem:[%s7978_s4 + $0x29c] sm:$0xff]  }
  0x45   :  { %358 = vst [vmem:[#allocation5 + $0x284] sm:$0xf] %v357_v57  ;;  %v359_v58 = vld [vmem:[%s7978_s4 + $0x284] sm:$0xf]  ;;  %v365_v60 = vld [vmem:[%s7978_s4 + $0x298] sm:$0xf] }
  0x46   :  { %360 = vst [vmem:[#allocation5 + $0x288] sm:$0xf] %v359_v58  ;;  %362 = vst [vmem:[#allocation5 + $0x28c] sm:$0xff] %v361_v59   ;;  %v367_v61 = vld [vmem:[%s7978_s4 + $0x294] sm:$0xf]  ;;  %v377_v1 = vld [vmem:[%s7978_s4 + $0x2ac] sm:$0xff]  }
  0x47   :  { %366 = vst [vmem:[#allocation5 + $0x294] sm:$0xf] %v365_v60  ;;  %v373_v63 = vld [vmem:[%s7978_s4 + $0x2a8] sm:$0xf]  ;;  %368 = vst [vmem:[#allocation5 + $0x298] sm:$0xf] %v367_v61 }
  0x48   :  { %370 = vst [vmem:[#allocation5 + $0x29c] sm:$0xff] %v369_v62   ;;  %374 = vst [vmem:[#allocation5 + $0x2a4] sm:$0xf] %v373_v63  ;;  %v375_v0 = vld [vmem:[%s7978_s4 + $0x2a4] sm:$0xf]  ;;  %v385_v4 = vld [vmem:[%s7978_s4 + $0x2bc] sm:$0xff]  }
  0x49   :  { %v381_v2 = vld [vmem:[%s7978_s4 + $0x2b8] sm:$0xf]  ;;  %376 = vst [vmem:[#allocation5 + $0x2a8] sm:$0xf] %v375_v0  ;;  %378 = vst [vmem:[#allocation5 + $0x2ac] sm:$0xff] %v377_v1   ;;  %v393_v7 = vld [vmem:[%s7978_s4 + $0x2cc] sm:$0xff]  }
  0x4a   :  { %382 = vst [vmem:[#allocation5 + $0x2b4] sm:$0xf] %v381_v2  ;;  %v383_v3 = vld [vmem:[%s7978_s4 + $0x2b4] sm:$0xf]  ;;  %v389_v5 = vld [vmem:[%s7978_s4 + $0x2c8] sm:$0xf] }
  0x4b   :  { %384 = vst [vmem:[#allocation5 + $0x2b8] sm:$0xf] %v383_v3  ;;  %386 = vst [vmem:[#allocation5 + $0x2bc] sm:$0xff] %v385_v4   ;;  %v391_v6 = vld [vmem:[%s7978_s4 + $0x2c4] sm:$0xf]  ;;  %v401_v10 = vld [vmem:[%s7978_s4 + $0x2dc] sm:$0xff]  }
  0x4c   :  { %390 = vst [vmem:[#allocation5 + $0x2c4] sm:$0xf] %v389_v5  ;;  %v397_v8 = vld [vmem:[%s7978_s4 + $0x2d8] sm:$0xf]  ;;  %392 = vst [vmem:[#allocation5 + $0x2c8] sm:$0xf] %v391_v6 }
  0x4d   :  { %394 = vst [vmem:[#allocation5 + $0x2cc] sm:$0xff] %v393_v7   ;;  %398 = vst [vmem:[#allocation5 + $0x2d4] sm:$0xf] %v397_v8  ;;  %v399_v9 = vld [vmem:[%s7978_s4 + $0x2d4] sm:$0xf]  ;;  %v409_v13 = vld [vmem:[%s7978_s4 + $0x2ec] sm:$0xff]  }
  0x4e   :  { %v405_v11 = vld [vmem:[%s7978_s4 + $0x2e8] sm:$0xf]  ;;  %400 = vst [vmem:[#allocation5 + $0x2d8] sm:$0xf] %v399_v9  ;;  %402 = vst [vmem:[#allocation5 + $0x2dc] sm:$0xff] %v401_v10   ;;  %v417_v16 = vld [vmem:[%s7978_s4 + $0x2fc] sm:$0xff]  }
  0x4f   :  { %406 = vst [vmem:[#allocation5 + $0x2e4] sm:$0xf] %v405_v11  ;;  %v407_v12 = vld [vmem:[%s7978_s4 + $0x2e4] sm:$0xf]  ;;  %v413_v14 = vld [vmem:[%s7978_s4 + $0x2f8] sm:$0xf] }
  0x50   :  { %408 = vst [vmem:[#allocation5 + $0x2e8] sm:$0xf] %v407_v12  ;;  %410 = vst [vmem:[#allocation5 + $0x2ec] sm:$0xff] %v409_v13   ;;  %v415_v15 = vld [vmem:[%s7978_s4 + $0x2f4] sm:$0xf]  ;;  %v425_v19 = vld [vmem:[%s7978_s4 + $0x30c] sm:$0xff]  }
  0x51   :  { %414 = vst [vmem:[#allocation5 + $0x2f4] sm:$0xf] %v413_v14  ;;  %v421_v17 = vld [vmem:[%s7978_s4 + $0x308] sm:$0xf]  ;;  %416 = vst [vmem:[#allocation5 + $0x2f8] sm:$0xf] %v415_v15 }
  0x52   :  { %418 = vst [vmem:[#allocation5 + $0x2fc] sm:$0xff] %v417_v16   ;;  %422 = vst [vmem:[#allocation5 + $0x304] sm:$0xf] %v421_v17  ;;  %v423_v18 = vld [vmem:[%s7978_s4 + $0x304] sm:$0xf]  ;;  %v433_v22 = vld [vmem:[%s7978_s4 + $0x31c] sm:$0xff]  }
  0x53   :  { %v429_v20 = vld [vmem:[%s7978_s4 + $0x318] sm:$0xf]  ;;  %424 = vst [vmem:[#allocation5 + $0x308] sm:$0xf] %v423_v18  ;;  %426 = vst [vmem:[#allocation5 + $0x30c] sm:$0xff] %v425_v19   ;;  %v441_v25 = vld [vmem:[%s7978_s4 + $0x32c] sm:$0xff]  }
  0x54   :  { %430 = vst [vmem:[#allocation5 + $0x314] sm:$0xf] %v429_v20  ;;  %v431_v21 = vld [vmem:[%s7978_s4 + $0x314] sm:$0xf]  ;;  %v437_v23 = vld [vmem:[%s7978_s4 + $0x328] sm:$0xf] }
  0x55   :  { %432 = vst [vmem:[#allocation5 + $0x318] sm:$0xf] %v431_v21  ;;  %434 = vst [vmem:[#allocation5 + $0x31c] sm:$0xff] %v433_v22   ;;  %v439_v24 = vld [vmem:[%s7978_s4 + $0x324] sm:$0xf]  ;;  %v449_v28 = vld [vmem:[%s7978_s4 + $0x33c] sm:$0xff]  }
  0x56   :  { %438 = vst [vmem:[#allocation5 + $0x324] sm:$0xf] %v437_v23  ;;  %v445_v26 = vld [vmem:[%s7978_s4 + $0x338] sm:$0xf]  ;;  %440 = vst [vmem:[#allocation5 + $0x328] sm:$0xf] %v439_v24 }
  0x57   :  { %442 = vst [vmem:[#allocation5 + $0x32c] sm:$0xff] %v441_v25   ;;  %446 = vst [vmem:[#allocation5 + $0x334] sm:$0xf] %v445_v26  ;;  %v447_v27 = vld [vmem:[%s7978_s4 + $0x334] sm:$0xf]  ;;  %v457_v31 = vld [vmem:[%s7978_s4 + $0x34c] sm:$0xff]  }
  0x58   :  { %v453_v29 = vld [vmem:[%s7978_s4 + $0x348] sm:$0xf]  ;;  %448 = vst [vmem:[#allocation5 + $0x338] sm:$0xf] %v447_v27  ;;  %450 = vst [vmem:[#allocation5 + $0x33c] sm:$0xff] %v449_v28   ;;  %v465_v34 = vld [vmem:[%s7978_s4 + $0x35c] sm:$0xff]  }
  0x59   :  { %454 = vst [vmem:[#allocation5 + $0x344] sm:$0xf] %v453_v29  ;;  %v455_v30 = vld [vmem:[%s7978_s4 + $0x344] sm:$0xf]  ;;  %v461_v32 = vld [vmem:[%s7978_s4 + $0x358] sm:$0xf] }
  0x5a   :  { %456 = vst [vmem:[#allocation5 + $0x348] sm:$0xf] %v455_v30  ;;  %458 = vst [vmem:[#allocation5 + $0x34c] sm:$0xff] %v457_v31   ;;  %v463_v33 = vld [vmem:[%s7978_s4 + $0x354] sm:$0xf]  ;;  %v473_v37 = vld [vmem:[%s7978_s4 + $0x36c] sm:$0xff]  }
  0x5b   :  { %462 = vst [vmem:[#allocation5 + $0x354] sm:$0xf] %v461_v32  ;;  %v469_v35 = vld [vmem:[%s7978_s4 + $0x368] sm:$0xf]  ;;  %464 = vst [vmem:[#allocation5 + $0x358] sm:$0xf] %v463_v33 }
  0x5c   :  { %466 = vst [vmem:[#allocation5 + $0x35c] sm:$0xff] %v465_v34   ;;  %470 = vst [vmem:[#allocation5 + $0x364] sm:$0xf] %v469_v35  ;;  %v471_v36 = vld [vmem:[%s7978_s4 + $0x364] sm:$0xf]  ;;  %v481_v40 = vld [vmem:[%s7978_s4 + $0x37c] sm:$0xff]  }
  0x5d   :  { %v477_v38 = vld [vmem:[%s7978_s4 + $0x378] sm:$0xf]  ;;  %472 = vst [vmem:[#allocation5 + $0x368] sm:$0xf] %v471_v36  ;;  %474 = vst [vmem:[#allocation5 + $0x36c] sm:$0xff] %v473_v37   ;;  %v489_v43 = vld [vmem:[%s7978_s4 + $0x38c] sm:$0xff]  }
  0x5e   :  { %478 = vst [vmem:[#allocation5 + $0x374] sm:$0xf] %v477_v38  ;;  %v479_v39 = vld [vmem:[%s7978_s4 + $0x374] sm:$0xf]  ;;  %v485_v41 = vld [vmem:[%s7978_s4 + $0x388] sm:$0xf] }
  0x5f   :  { %480 = vst [vmem:[#allocation5 + $0x378] sm:$0xf] %v479_v39  ;;  %482 = vst [vmem:[#allocation5 + $0x37c] sm:$0xff] %v481_v40   ;;  %v487_v42 = vld [vmem:[%s7978_s4 + $0x384] sm:$0xf]  ;;  %v497_v46 = vld [vmem:[%s7978_s4 + $0x39c] sm:$0xff]  }
  0x60   :  { %486 = vst [vmem:[#allocation5 + $0x384] sm:$0xf] %v485_v41  ;;  %v493_v44 = vld [vmem:[%s7978_s4 + $0x398] sm:$0xf]  ;;  %488 = vst [vmem:[#allocation5 + $0x388] sm:$0xf] %v487_v42 }
  0x61   :  { %490 = vst [vmem:[#allocation5 + $0x38c] sm:$0xff] %v489_v43   ;;  %494 = vst [vmem:[#allocation5 + $0x394] sm:$0xf] %v493_v44  ;;  %v495_v45 = vld [vmem:[%s7978_s4 + $0x394] sm:$0xf]  ;;  %v505_v49 = vld [vmem:[%s7978_s4 + $0x3ac] sm:$0xff]  }
  0x62   :  { %v501_v47 = vld [vmem:[%s7978_s4 + $0x3a8] sm:$0xf]  ;;  %496 = vst [vmem:[#allocation5 + $0x398] sm:$0xf] %v495_v45  ;;  %498 = vst [vmem:[#allocation5 + $0x39c] sm:$0xff] %v497_v46   ;;  %v513_v52 = vld [vmem:[%s7978_s4 + $0x3bc] sm:$0xff]  }
  0x63   :  { %502 = vst [vmem:[#allocation5 + $0x3a4] sm:$0xf] %v501_v47  ;;  %v503_v48 = vld [vmem:[%s7978_s4 + $0x3a4] sm:$0xf]  ;;  %v509_v50 = vld [vmem:[%s7978_s4 + $0x3b8] sm:$0xf] }
  0x64   :  { %504 = vst [vmem:[#allocation5 + $0x3a8] sm:$0xf] %v503_v48  ;;  %506 = vst [vmem:[#allocation5 + $0x3ac] sm:$0xff] %v505_v49   ;;  %v511_v51 = vld [vmem:[%s7978_s4 + $0x3b4] sm:$0xf]  ;;  %v521_v55 = vld [vmem:[%s7978_s4 + $0x3cc] sm:$0xff]  }
  0x65   :  { %510 = vst [vmem:[#allocation5 + $0x3b4] sm:$0xf] %v509_v50  ;;  %v517_v53 = vld [vmem:[%s7978_s4 + $0x3c8] sm:$0xf]  ;;  %512 = vst [vmem:[#allocation5 + $0x3b8] sm:$0xf] %v511_v51 }
  0x66   :  { %514 = vst [vmem:[#allocation5 + $0x3bc] sm:$0xff] %v513_v52   ;;  %518 = vst [vmem:[#allocation5 + $0x3c4] sm:$0xf] %v517_v53  ;;  %v519_v54 = vld [vmem:[%s7978_s4 + $0x3c4] sm:$0xf]  ;;  %v529_v58 = vld [vmem:[%s7978_s4 + $0x3dc] sm:$0xff]  }
  0x67   :  { %v525_v56 = vld [vmem:[%s7978_s4 + $0x3d8] sm:$0xf]  ;;  %520 = vst [vmem:[#allocation5 + $0x3c8] sm:$0xf] %v519_v54  ;;  %522 = vst [vmem:[#allocation5 + $0x3cc] sm:$0xff] %v521_v55   ;;  %v537_v61 = vld [vmem:[%s7978_s4 + $0x3ec] sm:$0xff]  }
  0x68   :  { %526 = vst [vmem:[#allocation5 + $0x3d4] sm:$0xf] %v525_v56  ;;  %v527_v57 = vld [vmem:[%s7978_s4 + $0x3d4] sm:$0xf]  ;;  %v533_v59 = vld [vmem:[%s7978_s4 + $0x3e8] sm:$0xf] }
  0x69   :  { %528 = vst [vmem:[#allocation5 + $0x3d8] sm:$0xf] %v527_v57  ;;  %530 = vst [vmem:[#allocation5 + $0x3dc] sm:$0xff] %v529_v58   ;;  %v535_v60 = vld [vmem:[%s7978_s4 + $0x3e4] sm:$0xf]  ;;  %v545_v0 = vld [vmem:[%s7978_s4 + $0x3fc] sm:$0xff]  }
  0x6a   :  { %534 = vst [vmem:[#allocation5 + $0x3e4] sm:$0xf] %v533_v59  ;;  %v541_v62 = vld [vmem:[%s7978_s4 + $0x3f8] sm:$0xf]  ;;  %536 = vst [vmem:[#allocation5 + $0x3e8] sm:$0xf] %v535_v60 }
  0x6b   :  { %538 = vst [vmem:[#allocation5 + $0x3ec] sm:$0xff] %v537_v61   ;;  %542 = vst [vmem:[#allocation5 + $0x3f4] sm:$0xf] %v541_v62  ;;  %v543_v63 = vld [vmem:[%s7978_s4 + $0x3f4] sm:$0xf]  ;;  %v553_v3 = vld [vmem:[%s7978_s4 + $0x40c] sm:$0xff]  }
  0x6c   :  { %v549_v1 = vld [vmem:[%s7978_s4 + $0x408] sm:$0xf]  ;;  %544 = vst [vmem:[#allocation5 + $0x3f8] sm:$0xf] %v543_v63  ;;  %546 = vst [vmem:[#allocation5 + $0x3fc] sm:$0xff] %v545_v0   ;;  %v561_v6 = vld [vmem:[%s7978_s4 + $0x41c] sm:$0xff]  }
  0x6d   :  { %550 = vst [vmem:[#allocation5 + $0x404] sm:$0xf] %v549_v1  ;;  %v551_v2 = vld [vmem:[%s7978_s4 + $0x404] sm:$0xf]  ;;  %v557_v4 = vld [vmem:[%s7978_s4 + $0x418] sm:$0xf] }
  0x6e   :  { %552 = vst [vmem:[#allocation5 + $0x408] sm:$0xf] %v551_v2  ;;  %554 = vst [vmem:[#allocation5 + $0x40c] sm:$0xff] %v553_v3   ;;  %v559_v5 = vld [vmem:[%s7978_s4 + $0x414] sm:$0xf]  ;;  %v569_v9 = vld [vmem:[%s7978_s4 + $0x42c] sm:$0xff]  }
  0x6f   :  { %558 = vst [vmem:[#allocation5 + $0x414] sm:$0xf] %v557_v4  ;;  %v565_v7 = vld [vmem:[%s7978_s4 + $0x428] sm:$0xf]  ;;  %560 = vst [vmem:[#allocation5 + $0x418] sm:$0xf] %v559_v5 }
  0x70   :  { %562 = vst [vmem:[#allocation5 + $0x41c] sm:$0xff] %v561_v6   ;;  %566 = vst [vmem:[#allocation5 + $0x424] sm:$0xf] %v565_v7  ;;  %v567_v8 = vld [vmem:[%s7978_s4 + $0x424] sm:$0xf]  ;;  %v577_v12 = vld [vmem:[%s7978_s4 + $0x43c] sm:$0xff]  }
  0x71   :  { %v573_v10 = vld [vmem:[%s7978_s4 + $0x438] sm:$0xf]  ;;  %568 = vst [vmem:[#allocation5 + $0x428] sm:$0xf] %v567_v8  ;;  %570 = vst [vmem:[#allocation5 + $0x42c] sm:$0xff] %v569_v9   ;;  %v585_v15 = vld [vmem:[%s7978_s4 + $0x44c] sm:$0xff]  }
  0x72   :  { %574 = vst [vmem:[#allocation5 + $0x434] sm:$0xf] %v573_v10  ;;  %v575_v11 = vld [vmem:[%s7978_s4 + $0x434] sm:$0xf]  ;;  %v581_v13 = vld [vmem:[%s7978_s4 + $0x448] sm:$0xf] }
  0x73   :  { %576 = vst [vmem:[#allocation5 + $0x438] sm:$0xf] %v575_v11  ;;  %578 = vst [vmem:[#allocation5 + $0x43c] sm:$0xff] %v577_v12   ;;  %v583_v14 = vld [vmem:[%s7978_s4 + $0x444] sm:$0xf]  ;;  %v593_v18 = vld [vmem:[%s7978_s4 + $0x45c] sm:$0xff]  }
  0x74   :  { %582 = vst [vmem:[#allocation5 + $0x444] sm:$0xf] %v581_v13  ;;  %v589_v16 = vld [vmem:[%s7978_s4 + $0x458] sm:$0xf]  ;;  %584 = vst [vmem:[#allocation5 + $0x448] sm:$0xf] %v583_v14 }
  0x75   :  { %586 = vst [vmem:[#allocation5 + $0x44c] sm:$0xff] %v585_v15   ;;  %590 = vst [vmem:[#allocation5 + $0x454] sm:$0xf] %v589_v16  ;;  %v591_v17 = vld [vmem:[%s7978_s4 + $0x454] sm:$0xf]  ;;  %v601_v21 = vld [vmem:[%s7978_s4 + $0x46c] sm:$0xff]  }
  0x76   :  { %v597_v19 = vld [vmem:[%s7978_s4 + $0x468] sm:$0xf]  ;;  %592 = vst [vmem:[#allocation5 + $0x458] sm:$0xf] %v591_v17  ;;  %594 = vst [vmem:[#allocation5 + $0x45c] sm:$0xff] %v593_v18  }
  0x77   :  { %598 = vst [vmem:[#allocation5 + $0x464] sm:$0xf] %v597_v19  ;;  %v599_v20 = vld [vmem:[%s7978_s4 + $0x464] sm:$0xf]  ;;  %v605_v22 = vld [vmem:[%s7978_s4 + $0x478] sm:$0xf] }
  0x78   :  { %600 = vst [vmem:[#allocation5 + $0x468] sm:$0xf] %v599_v20  ;;  %602 = vst [vmem:[#allocation5 + $0x46c] sm:$0xff] %v601_v21   ;;  %v607_v23 = vld [vmem:[%s7978_s4 + $0x474] sm:$0xf] }
  0x79   :  { %606 = vst [vmem:[#allocation5 + $0x474] sm:$0xf] %v605_v22  ;;  %v609_v24 = vld [vmem:[%s7978_s4 + $0x47c] sm:$0xf]  ;;  %608 = vst [vmem:[#allocation5 + $0x478] sm:$0xf] %v607_v23 }
  0x7a   :  { %610 = vst [vmem:[#allocation5 + $0x47c] sm:$0xf] %v609_v24 }
  0x7b   :  { %1217 = vsyncadd [#allocation7], 18432  ;;  %v1251_v25 = vld [vmem:[%s7977_s3] sm:$0xff]  ;;  %v1253_v26 = vld [vmem:[%s7977_s3 + $0x8] sm:$0xff]  ;;  %v7980_v3 = vmov 0  }
  0x7c   :  { %1252 = vst [vmem:[#allocation6] sm:$0xff] %v1251_v25  ;;  %1254 = vst [vmem:[#allocation6 + $0x8] sm:$0xff] %v1253_v26  ;;  %v1255_v27 = vld [vmem:[%s7977_s3 + $0x10] sm:$0xff]  ;;  %v1257_v28 = vld [vmem:[%s7977_s3 + $0x18] sm:$0xff]  ;;  %4793 = vset.pattern.permute.xlu1 %v7980_v3  ;;  %4792 = vset.pattern.permute.xlu0 %v7980_v3 }
  0x7d   :  { %v1259_v29 = vld [vmem:[%s7977_s3 + $0x20] sm:$0xff]  ;;  %1256 = vst [vmem:[#allocation6 + $0x10] sm:$0xff] %v1255_v27  ;;  %1258 = vst [vmem:[#allocation6 + $0x18] sm:$0xff] %v1257_v28  ;;  %v1261_v30 = vld [vmem:[%s7977_s3 + $0x28] sm:$0xff] }
  0x7e   :  { %1260 = vst [vmem:[#allocation6 + $0x20] sm:$0xff] %v1259_v29  ;;  %v1263_v31 = vld [vmem:[%s7977_s3 + $0x30] sm:$0xff]  ;;  %v1265_v32 = vld [vmem:[%s7977_s3 + $0x38] sm:$0xff]  ;;  %1262 = vst [vmem:[#allocation6 + $0x28] sm:$0xff] %v1261_v30 }
  0x7f   :  { %1264 = vst [vmem:[#allocation6 + $0x30] sm:$0xff] %v1263_v31  ;;  %1266 = vst [vmem:[#allocation6 + $0x38] sm:$0xff] %v1265_v32  ;;  %v1267_v33 = vld [vmem:[%s7977_s3 + $0x40] sm:$0xff]  ;;  %v1269_v34 = vld [vmem:[%s7977_s3 + $0x48] sm:$0xff] }
  0x80   :  { %v1271_v35 = vld [vmem:[%s7977_s3 + $0x50] sm:$0xff]  ;;  %1268 = vst [vmem:[#allocation6 + $0x40] sm:$0xff] %v1267_v33  ;;  %1270 = vst [vmem:[#allocation6 + $0x48] sm:$0xff] %v1269_v34  ;;  %v1273_v36 = vld [vmem:[%s7977_s3 + $0x58] sm:$0xff] }
  0x81   :  { %1272 = vst [vmem:[#allocation6 + $0x50] sm:$0xff] %v1271_v35  ;;  %v1275_v37 = vld [vmem:[%s7977_s3 + $0x60] sm:$0xff]  ;;  %v1277_v38 = vld [vmem:[%s7977_s3 + $0x68] sm:$0xff]  ;;  %1274 = vst [vmem:[#allocation6 + $0x58] sm:$0xff] %v1273_v36 }
  0x82   :  { %1276 = vst [vmem:[#allocation6 + $0x60] sm:$0xff] %v1275_v37  ;;  %1278 = vst [vmem:[#allocation6 + $0x68] sm:$0xff] %v1277_v38  ;;  %v1279_v39 = vld [vmem:[%s7977_s3 + $0x70] sm:$0xff]  ;;  %v1281_v40 = vld [vmem:[%s7977_s3 + $0x78] sm:$0xff] }
  0x83   :  { %v1283_v41 = vld [vmem:[%s7977_s3 + $0x80] sm:$0xff]  ;;  %1280 = vst [vmem:[#allocation6 + $0x70] sm:$0xff] %v1279_v39  ;;  %1282 = vst [vmem:[#allocation6 + $0x78] sm:$0xff] %v1281_v40  ;;  %v1285_v42 = vld [vmem:[%s7977_s3 + $0x88] sm:$0xff] }
  0x84   :  { %1284 = vst [vmem:[#allocation6 + $0x80] sm:$0xff] %v1283_v41  ;;  %v1287_v43 = vld [vmem:[%s7977_s3 + $0x90] sm:$0xff]  ;;  %v1289_v44 = vld [vmem:[%s7977_s3 + $0x98] sm:$0xff]  ;;  %1286 = vst [vmem:[#allocation6 + $0x88] sm:$0xff] %v1285_v42 }
  0x85   :  { %1288 = vst [vmem:[#allocation6 + $0x90] sm:$0xff] %v1287_v43  ;;  %1290 = vst [vmem:[#allocation6 + $0x98] sm:$0xff] %v1289_v44  ;;  %v1291_v45 = vld [vmem:[%s7977_s3 + $0xa0] sm:$0xff]  ;;  %v1293_v46 = vld [vmem:[%s7977_s3 + $0xa8] sm:$0xff] }
  0x86   :  { %v1295_v47 = vld [vmem:[%s7977_s3 + $0xb0] sm:$0xff]  ;;  %1292 = vst [vmem:[#allocation6 + $0xa0] sm:$0xff] %v1291_v45  ;;  %1294 = vst [vmem:[#allocation6 + $0xa8] sm:$0xff] %v1293_v46  ;;  %v1297_v48 = vld [vmem:[%s7977_s3 + $0xb8] sm:$0xff] }
  0x87   :  { %1296 = vst [vmem:[#allocation6 + $0xb0] sm:$0xff] %v1295_v47  ;;  %v1299_v49 = vld [vmem:[%s7977_s3 + $0xc0] sm:$0xff]  ;;  %v1301_v50 = vld [vmem:[%s7977_s3 + $0xc8] sm:$0xff]  ;;  %1298 = vst [vmem:[#allocation6 + $0xb8] sm:$0xff] %v1297_v48 }
  0x88   :  { %1300 = vst [vmem:[#allocation6 + $0xc0] sm:$0xff] %v1299_v49  ;;  %1302 = vst [vmem:[#allocation6 + $0xc8] sm:$0xff] %v1301_v50  ;;  %v1303_v51 = vld [vmem:[%s7977_s3 + $0xd0] sm:$0xff]  ;;  %v1305_v52 = vld [vmem:[%s7977_s3 + $0xd8] sm:$0xff] }
  0x89   :  { %v1307_v53 = vld [vmem:[%s7977_s3 + $0xe0] sm:$0xff]  ;;  %1304 = vst [vmem:[#allocation6 + $0xd0] sm:$0xff] %v1303_v51  ;;  %1306 = vst [vmem:[#allocation6 + $0xd8] sm:$0xff] %v1305_v52  ;;  %v1309_v54 = vld [vmem:[%s7977_s3 + $0xe8] sm:$0xff] }
  0x8a   :  { %1308 = vst [vmem:[#allocation6 + $0xe0] sm:$0xff] %v1307_v53  ;;  %v1311_v55 = vld [vmem:[%s7977_s3 + $0xf0] sm:$0xff]  ;;  %v1313_v56 = vld [vmem:[%s7977_s3 + $0xf8] sm:$0xff]  ;;  %1310 = vst [vmem:[#allocation6 + $0xe8] sm:$0xff] %v1309_v54 }
  0x8b   :  { %1312 = vst [vmem:[#allocation6 + $0xf0] sm:$0xff] %v1311_v55  ;;  %1314 = vst [vmem:[#allocation6 + $0xf8] sm:$0xff] %v1313_v56  ;;  %v1315_v57 = vld [vmem:[%s7977_s3 + $0x100] sm:$0xff]  ;;  %v1317_v58 = vld [vmem:[%s7977_s3 + $0x108] sm:$0xff] }
  0x8c   :  { %v1319_v59 = vld [vmem:[%s7977_s3 + $0x110] sm:$0xff]  ;;  %1316 = vst [vmem:[#allocation6 + $0x100] sm:$0xff] %v1315_v57  ;;  %1318 = vst [vmem:[#allocation6 + $0x108] sm:$0xff] %v1317_v58  ;;  %v1321_v60 = vld [vmem:[%s7977_s3 + $0x118] sm:$0xff] }
  0x8d   :  { %1320 = vst [vmem:[#allocation6 + $0x110] sm:$0xff] %v1319_v59  ;;  %v1323_v61 = vld [vmem:[%s7977_s3 + $0x120] sm:$0xff]  ;;  %v1325_v62 = vld [vmem:[%s7977_s3 + $0x128] sm:$0xff]  ;;  %1322 = vst [vmem:[#allocation6 + $0x118] sm:$0xff] %v1321_v60 }
  0x8e   :  { %1324 = vst [vmem:[#allocation6 + $0x120] sm:$0xff] %v1323_v61  ;;  %1326 = vst [vmem:[#allocation6 + $0x128] sm:$0xff] %v1325_v62  ;;  %v1327_v63 = vld [vmem:[%s7977_s3 + $0x130] sm:$0xff]  ;;  %v1329_v0 = vld [vmem:[%s7977_s3 + $0x138] sm:$0xff] }
  0x8f   :  { %1328 = vst [vmem:[#allocation6 + $0x130] sm:$0xff] %v1327_v63  ;;  %1330 = vst [vmem:[#allocation6 + $0x138] sm:$0xff] %v1329_v0  ;;  %v1341_v1 = vld [vmem:[%s7974_s0 + $0x10] sm:$0xff]  ;;  %v1339_v2 = vld [vmem:[%s7974_s0] sm:$0xff] }
  0x90   :  { %1396 = vperm.xlu1 %4793, %v1341_v1   ;;  %1386 = vperm.xlu0 %4792, %v1339_v2   ;;  %v1342_v4 = vld [vmem:[%s7974_s0 + $0x18] sm:$0xff]  ;;  %v1340_v5 = vld [vmem:[%s7974_s0 + $0x8] sm:$0xff]  ;;  %v1343_v7 = vld [vmem:[%s7974_s0 + $0x20] sm:$0xff] }
  0x91   :  { %v1344_v6 = vld [vmem:[%s7974_s0 + $0x28] sm:$0xff]  ;;  %v1346_v8 = vld [vmem:[%s7974_s0 + $0x38] sm:$0xff]  ;;  %v1345_v9 = vld [vmem:[%s7974_s0 + $0x30] sm:$0xff] }
  0x92   :  { %v1348_v10 = vld [vmem:[%s7974_s0 + $0x48] sm:$0xff]  ;;  %v1347_v11 = vld [vmem:[%s7974_s0 + $0x40] sm:$0xff] }
  0x94   :  { %1401 = vperm.xlu1 %4793, %v1342_v4   ;;  %1391 = vperm.xlu0 %4792, %v1340_v5  }
  0x98   :  { %1411 = vperm.xlu1 %4793, %v1344_v6   ;;  %1406 = vperm.xlu0 %4792, %v1343_v7  }
  0x9c   :  { %1421 = vperm.xlu1 %4793, %v1346_v8   ;;  %1416 = vperm.xlu0 %4792, %v1345_v9  }
  0x9d   :  { %1338 = vsyncadd [#allocation7 + $0x1], 5120  ;;  %v1350_v12 = vld [vmem:[%s7974_s0 + $0x58] sm:$0xff]  ;;  %v1349_v13 = vld [vmem:[%s7974_s0 + $0x50] sm:$0xff]  ;;  %v1669_v47 = vlaneseq }
  0x9e   :  { %v1352_v14 = vld [vmem:[%s7974_s0 + $0x68] sm:$0xff]  ;;  %v1351_v15 = vld [vmem:[%s7974_s0 + $0x60] sm:$0xff]  ;;  %v1354_v16 = vld [vmem:[%s7974_s0 + $0x78] sm:$0xff] }
  0x9f   :  { %v1353_v17 = vld [vmem:[%s7974_s0 + $0x70] sm:$0xff]  ;;  %v1356_v18 = vld [vmem:[%s7974_s0 + $0x88] sm:$0xff]  ;;  %v1355_v19 = vld [vmem:[%s7974_s0 + $0x80] sm:$0xff]  ;;  %v5797_v48 = vshrl.u32 %v1669_v47, 7 }
  0xa0   :  { %1431 = vperm.xlu1 %4793, %v1348_v10   ;;  %1426 = vperm.xlu0 %4792, %v1347_v11   ;;  %v1358_v20 = vld [vmem:[%s7974_s0 + $0x98] sm:$0xff]  ;;  %v1357_v21 = vld [vmem:[%s7974_s0 + $0x90] sm:$0xff]  ;;  %v1360_v22 = vld [vmem:[%s7974_s0 + $0xa8] sm:$0xff] }
  0xa1   :  { %v1359_v23 = vld [vmem:[%s7974_s0 + $0xa0] sm:$0xff]  ;;  %v1362_v24 = vld [vmem:[%s7974_s0 + $0xb8] sm:$0xff]  ;;  %v1361_v25 = vld [vmem:[%s7974_s0 + $0xb0] sm:$0xff]  ;;  %8032 = vst [vmem:[#allocation15_spill] sm:$0xff] %v5797_v48  ;;  %v5800_v49 = vsub.s32 0, %v5797_v48  ;;  %v1691_v50 = vsub.s32 3, %v5797_v48 }
  0xa2   :  { %v1364_v26 = vld [vmem:[%s7974_s0 + $0xc8] sm:$0xff]  ;;  %v1363_v27 = vld [vmem:[%s7974_s0 + $0xc0] sm:$0xff]  ;;  %v1366_v28 = vld [vmem:[%s7974_s0 + $0xd8] sm:$0xff]  ;;  %v1711_v54 = vsub.s32 6, %v5797_v48  ;;  %v5808_v55 = vsub.s32 1, %v5797_v48  ;;  %v1763_v56 = vsub.s32 4, %v5797_v48 }
  0xa3   :  { %v1365_v29 = vld [vmem:[%s7974_s0 + $0xd0] sm:$0xff]  ;;  %v1368_v30 = vld [vmem:[%s7974_s0 + $0xe8] sm:$0xff]  ;;  %v1367_v31 = vld [vmem:[%s7974_s0 + $0xe0] sm:$0xff]  ;;  %8033 = vst [vmem:[#allocation16_spill] sm:$0xff] %v5800_v49  ;;  %v1815_v59 = vsub.s32 2, %v5797_v48  ;;  %v1835_v60 = vsub.s32 5, %v5797_v48 }
  0xa4   :  { %1441 = vperm.xlu1 %4793, %v1350_v12   ;;  %1436 = vperm.xlu0 %4792, %v1349_v13   ;;  %v1370_v32 = vld [vmem:[%s7974_s0 + $0xf8] sm:$0xff]  ;;  %v1369_v33 = vld [vmem:[%s7974_s0 + $0xf0] sm:$0xff]  ;;  %v1372_v34 = vld [vmem:[%s7974_s0 + $0x108] sm:$0xff]  ;;  %8034 = vst [vmem:[#allocation17_spill] sm:$0xff] %v5808_v55  ;;  %v1783_v63 = vsub.s32 7, %v5797_v48 }
  0xa5   :  { %v1371_v35 = vld [vmem:[%s7974_s0 + $0x100] sm:$0xff]  ;;  %v1374_v36 = vld [vmem:[%s7974_s0 + $0x118] sm:$0xff]  ;;  %v1373_v37 = vld [vmem:[%s7974_s0 + $0x110] sm:$0xff] }
  0xa6   :  { %v1376_v38 = vld [vmem:[%s7974_s0 + $0x128] sm:$0xff]  ;;  %v1375_v39 = vld [vmem:[%s7974_s0 + $0x120] sm:$0xff]  ;;  %v1378_v40 = vld [vmem:[%s7974_s0 + $0x138] sm:$0xff] }
  0xa7   :  { %v1377_v41 = vld [vmem:[%s7974_s0 + $0x130] sm:$0xff]  ;;  %v1380_v42 = vld [vmem:[%s7974_s0 + $0x148] sm:$0xff]  ;;  %v1379_v43 = vld [vmem:[%s7974_s0 + $0x140] sm:$0xff] }
  0xa8   :  { %1451 = vperm.xlu1 %4793, %v1352_v14   ;;  %1446 = vperm.xlu0 %4792, %v1351_v15   ;;  %v1382_v44 = vld [vmem:[%s7974_s0 + $0x158] sm:$0xff]  ;;  %v1381_v45 = vld [vmem:[%s7974_s0 + $0x150] sm:$0xff]  ;;  %v1383_v46 = vld [vmem:[%s7974_s0 + $0x160] sm:$0xff] }
  0xa9   :  { %v1654_v53 = vld [vmem:[%s7975_s1] sm:$0xff]  ;;  %v2717_v1 = vld [vmem:[%s7975_s1 + $0xa] sm:$0xff] }
  0xaa   :  { %v5812_v57 = vrot.slane %v1654_v53, %v5800_v49  ;;  %v5814_v58 = vrot.slane %v1654_v53, %v1691_v50  ;;  %v5819_v0 = vrot.slane %v1654_v53, %v1711_v54  ;;  %v5825_v2 = vrot.slane %v1654_v53, %v5808_v55 }
  0xab   :  { %v5827_v4 = vrot.slane %v1654_v53, %v1763_v56  ;;  %v5831_v7 = vrot.slane %v1654_v53, %v1815_v59  ;;  %v5833_v8 = vrot.slane %v1654_v53, %v1835_v60  ;;  %v5837_v13 = vrot.slane %v1654_v53, %v1783_v63 }
  0xac   :  { %1461 = vperm.xlu1 %4793, %v1354_v16   ;;  %1456 = vperm.xlu0 %4792, %v1353_v17   ;;  %8035 = vst [vmem:[#allocation18_spill] sm:$0xff] %v5819_v0  ;;  %v5840_v14 = vrot.slane %v2717_v1, %v5800_v49  ;;  %v5844_v17 = vrot.slane %v2717_v1, %v1691_v50 }
  0xad   :  { %8036 = vst [vmem:[#allocation19_spill] sm:$0xff] %v5831_v7  ;;  %8037 = vst [vmem:[#allocation20_spill] sm:$0xff] %v5833_v8 }
  0xae   :  { %8038 = vst [vmem:[#allocation21_spill] sm:$0xff] %v5840_v14 }
  0xb0   :  { %1471 = vperm.xlu1 %4793, %v1356_v18   ;;  %1466 = vperm.xlu0 %4792, %v1355_v19   ;;  %v5847_v18 = vrot.slane %v2717_v1, %v5808_v55 }
  0xb4   :  { %1481 = vperm.xlu1 %4793, %v1358_v20   ;;  %1476 = vperm.xlu0 %4792, %v1357_v21   ;;  %v5851_v21 = vrot.slane %v2717_v1, %v1815_v59 }
  0xb8   :  { %1491 = vperm.xlu1 %4793, %v1360_v22   ;;  %1486 = vperm.xlu0 %4792, %v1359_v23   ;;  %v5853_v22 = vrot.slane %v2717_v1, %v1711_v54 }
  0xbc   :  { %1501 = vperm.xlu1 %4793, %v1362_v24   ;;  %1496 = vperm.xlu0 %4792, %v1361_v25  }
  0xc0   :  { %1511 = vperm.xlu1 %4793, %v1364_v26   ;;  %1506 = vperm.xlu0 %4792, %v1363_v27  }
  0xc4   :  { %1521 = vperm.xlu1 %4793, %v1366_v28   ;;  %1516 = vperm.xlu0 %4792, %v1365_v29   ;;  %v5856_v29 = vrot.slane %v2717_v1, %v1763_v56 }
  0xc8   :  { %1531 = vperm.xlu1 %4793, %v1368_v30   ;;  %1526 = vperm.xlu0 %4792, %v1367_v31   ;;  %v5858_v30 = vrot.slane %v2717_v1, %v1835_v60 }
  0xcc   :  { %1541 = vperm.xlu1 %4793, %v1370_v32   ;;  %1536 = vperm.xlu0 %4792, %v1369_v33  }
  0xd0   :  { %1551 = vperm.xlu1 %4793, %v1372_v34   ;;  %1546 = vperm.xlu0 %4792, %v1371_v35  }
  0xd4   :  { %1561 = vperm.xlu1 %4793, %v1374_v36   ;;  %1556 = vperm.xlu0 %4792, %v1373_v37   ;;  %v5862_v36 = vrot.slane %v2717_v1, %v1783_v63 }
  0xd8   :  { %1571 = vperm.xlu1 %4793, %v1376_v38   ;;  %1566 = vperm.xlu0 %4792, %v1375_v39  }
  0xdc   :  { %1581 = vperm.xlu1 %4793, %v1378_v40   ;;  %1576 = vperm.xlu0 %4792, %v1377_v41  }
  0xe0   :  { %1591 = vperm.xlu1 %4793, %v1380_v42   ;;  %1586 = vperm.xlu0 %4792, %v1379_v43  }
  0xe4   :  { %1601 = vperm.xlu1 %4793, %v1382_v44   ;;  %1596 = vperm.xlu0 %4792, %v1381_v45  }
  0xe8   :  { %1606 = vperm.xlu0 %4792, %v1383_v46  }
 0x10f   :  { %v1397_v51 = vpop.permute.xlu1 %1396  ;;  %v1387_v52 = vpop.permute.xlu0 %1386 }
 0x110   :  { %1611 = vst [vmem:[#allocation2 + $0x10] sm:$0xff] %v1397_v51  ;;  %1609 = vst [vmem:[#allocation2] sm:$0xff] %v1387_v52  ;;  %v1693_v5 = vmul.f32 %v5814_v58, %v1397_v51  ;;  %v1673_v6 = vmul.f32 %v5812_v57, %v1387_v52  ;;  %v1675_v31 = vmul.f32 %v5812_v57, %v1397_v51 }
 0x112   :  { %v1701_v23 = vadd.f32 %v1693_v5, %v1673_v6 }
 0x113   :  { %v1402_v61 = vpop.permute.xlu1 %1401  ;;  %v1392_v62 = vpop.permute.xlu0 %1391 }
 0x114   :  { %1612 = vst [vmem:[#allocation2 + $0x18] sm:$0xff] %v1402_v61  ;;  %1610 = vst [vmem:[#allocation2 + $0x8] sm:$0xff] %v1392_v62  ;;  %v1694_v11 = vmul.f32 %v5814_v58, %v1402_v61  ;;  %v1674_v12 = vmul.f32 %v5812_v57, %v1392_v62  ;;  %v1676_v24 = vmul.f32 %v5812_v57, %v1402_v61 }
 0x116   :  { %v1702_v33 = vadd.f32 %v1694_v11, %v1674_v12 }
 0x117   :  { %v1412_v9 = vpop.permute.xlu1 %1411  ;;  %v1407_v10 = vpop.permute.xlu0 %1406 }
 0x118   :  { %1614 = vst [vmem:[#allocation2 + $0x28] sm:$0xff] %v1412_v9  ;;  %1613 = vst [vmem:[#allocation2 + $0x20] sm:$0xff] %v1407_v10  ;;  %v1696_v15 = vmul.f32 %v5814_v58, %v1412_v9  ;;  %v1713_v16 = vmul.f32 %v5819_v0, %v1407_v10  ;;  %v1714_v19 = vmul.f32 %v5819_v0, %v1412_v9 }
 0x119   :  { %v1695_v20 = vmul.f32 %v5814_v58, %v1407_v10  ;;  %v1678_v35 = vmul.f32 %v5812_v57, %v1412_v9  ;;  %v1677_v41 = vmul.f32 %v5812_v57, %v1407_v10 }
 0x11a   :  { %v1704_v40 = vadd.f32 %v1696_v15, %v1676_v24  ;;  %v1721_v42 = vadd.f32 %v1713_v16, %v1701_v23  ;;  %v1722_v45 = vadd.f32 %v1714_v19, %v1702_v33 }
 0x11b   :  { %v1731_v25 = vld [vmem:[#allocation2 + $0x11] sm:$0xff]  ;;  %v1729_v26 = vld [vmem:[#allocation2 + $0x1] sm:$0xff]  ;;  %v1422_v27 = vpop.permute.xlu1 %1421  ;;  %v1417_v28 = vpop.permute.xlu0 %1416  ;;  %v1730_v34 = vld [vmem:[#allocation2 + $0x9] sm:$0xff]  ;;  %v1703_v46 = vadd.f32 %v1695_v20, %v1675_v31 }
 0x11c   :  { %v1803_v32 = vld [vmem:[#allocation2 + $0x12] sm:$0xff]  ;;  %1616 = vst [vmem:[#allocation2 + $0x38] sm:$0xff] %v1422_v27  ;;  %1615 = vst [vmem:[#allocation2 + $0x30] sm:$0xff] %v1417_v28  ;;  %v1745_v37 = vmul.f32 %v5825_v2, %v1729_v26  ;;  %v1801_v38 = vld [vmem:[#allocation2 + $0x2] sm:$0xff]  ;;  %v1747_v43 = vmul.f32 %v5825_v2, %v1731_v25  ;;  %v1746_v44 = vmul.f32 %v5825_v2, %v1730_v34 }
 0x11d   :  { %v1802_v39 = vld [vmem:[#allocation2 + $0xa] sm:$0xff]  ;;  %v1765_v47 = vmul.f32 %v5827_v4, %v1731_v25  ;;  %v5870_v50 = vmul.f32 %v5831_v7, %v1803_v32  ;;  %v1837_v51 = vmul.f32 %v5833_v8, %v1803_v32  ;;  %v1817_v60 = vmul.f32 %v5831_v7, %v1801_v38  ;;  %v5896_v20 = vld [vmem:[%s7975_s1 + $0x8] ss:$0 sm:$0xff] }
 0x11e   :  { %v1753_v54 = vadd.f32 %v1745_v37, %v1721_v42  ;;  %v1818_v61 = vmul.f32 %v5831_v7, %v1802_v39  ;;  %v1715_v63 = vmul.f32 %v5819_v0, %v1417_v28  ;;  %v5885_v10 = vmul.f32 %v5812_v57, %v1422_v27 }
 0x11f   :  { %v1732_v52 = vld [vmem:[#allocation2 + $0x19] sm:$0xff]  ;;  %v1733_v53 = vld [vmem:[#allocation2 + $0x21] sm:$0xff]  ;;  %v5873_v56 = vpop.permute.xlu1 %1431  ;;  %v5875_v59 = vpop.permute.xlu0 %1426  ;;  %v1698_v11 = vmul.f32 %v5814_v58, %v1422_v27  ;;  %v1754_v12 = vadd.f32 %v1746_v44, %v1722_v45  ;;  %v1716_v15 = vmul.f32 %v5819_v0, %v1422_v27  ;;  %v5890_v16 = vmul.f32 %v5812_v57, %v1417_v28 }
 0x120   :  { %v1766_v62 = vmul.f32 %v5827_v4, %v1732_v52  ;;  %1618 = vst [vmem:[#allocation2 + $0x48] sm:$0xff] %v5873_v56  ;;  %1617 = vst [vmem:[#allocation2 + $0x40] sm:$0xff] %v5875_v59  ;;  %v1773_v1 = vadd.f32 %v1765_v47, %v1753_v54  ;;  %v1785_v5 = vmul.f32 %v5837_v13, %v1733_v53  ;;  %v1804_v6 = vld [vmem:[#allocation2 + $0x1a] sm:$0xff]  ;;  %v1805_v9 = vld [vmem:[#allocation2 + $0x22] sm:$0xff] }
 0x121   :  { %v1697_v19 = vmul.f32 %v5814_v58, %v1417_v28  ;;  %v1748_v23 = vmul.f32 %v5825_v2, %v1732_v52  ;;  %v5900_v24 = vmul.f32 %v5825_v2, %v1733_v53  ;;  %v1767_v25 = vmul.f32 %v5827_v4, %v1733_v53 }
 0x122   :  { %v1793_v26 = vadd.f32 %v1785_v5, %v1773_v1  ;;  %v1774_v28 = vadd.f32 %v1766_v62, %v1754_v12  ;;  %v5908_v34 = vmul.f32 %v5831_v7, %v1804_v6  ;;  %v5911_v37 = vmul.f32 %v5831_v7, %v1805_v9 }
 0x123   :  { %v1734_v31 = vld [vmem:[#allocation2 + $0x29] sm:$0xff]  ;;  %v1735_v27 = vld [vmem:[#allocation2 + $0x31] sm:$0xff]  ;;  %v5903_v32 = vpop.permute.xlu1 %1441  ;;  %v5905_v33 = vpop.permute.xlu0 %1436  ;;  %v1723_v38 = vadd.f32 %v1715_v63, %v1703_v46  ;;  %v1838_v42 = vmul.f32 %v5833_v8, %v1804_v6  ;;  %v1839_v44 = vmul.f32 %v5833_v8, %v1805_v9  ;;  %v1857_v47 = vmul.f32 %v5896_v20, %v1805_v9 }
 0x124   :  { %1620 = vst [vmem:[#allocation2 + $0x58] sm:$0xff] %v5903_v32  ;;  %1619 = vst [vmem:[#allocation2 + $0x50] sm:$0xff] %v5905_v33  ;;  %v1825_v39 = vadd.f32 %v1817_v60, %v1793_v26  ;;  %v1786_v45 = vmul.f32 %v5837_v13, %v1734_v31  ;;  %v5919_v52 = vadd.f32 %v1698_v11, %v1678_v35  ;;  %v1806_v5 = vld [vmem:[#allocation2 + $0x2a] sm:$0xff]  ;;  %v1807_v60 = vld [vmem:[#allocation2 + $0x32] sm:$0xff] }
 0x125   :  { %v1755_v53 = vadd.f32 %v1747_v43, %v1723_v38  ;;  %v1787_v54 = vmul.f32 %v5837_v13, %v1735_v27  ;;  %v1724_v46 = vadd.f32 %v1716_v15, %v1704_v40  ;;  %v1768_v63 = vmul.f32 %v5827_v4, %v1734_v31  ;;  %v5930_v9 = vld [vmem:[%s7975_s1 + $0x9] ss:$0 sm:$0xff] }
 0x126   :  { %v1845_v62 = vadd.f32 %v1837_v51, %v1825_v39  ;;  %v1794_v1 = vadd.f32 %v1786_v45, %v1774_v28  ;;  %v1705_v35 = vadd.f32 %v1697_v19, %v1677_v41  ;;  %v1750_v43 = vmul.f32 %v5825_v2, %v1734_v31 }
 0x127   :  { %v5923_v12 = vpop.permute.xlu1 %1451  ;;  %v5925_v6 = vpop.permute.xlu0 %1446  ;;  %v5934_v51 = vmul.f32 %v5825_v2, %v1735_v27  ;;  %v1775_v40 = vadd.f32 %v1767_v25, %v1755_v53  ;;  %v1756_v15 = vadd.f32 %v1748_v23, %v1724_v46  ;;  %v1769_v26 = vmul.f32 %v5827_v4, %v1735_v27  ;;  %v1736_v23 = vld [vmem:[#allocation2 + $0x39] sm:$0xff]  ;;  %v1809_v55 = vld [vmem:[#allocation2 + $0x42] sm:$0xff] }
 0x128   :  { %1622 = vst [vmem:[#allocation2 + $0x68] sm:$0xff] %v5923_v12  ;;  %1621 = vst [vmem:[#allocation2 + $0x60] sm:$0xff] %v5925_v6  ;;  %v1865_v11 = vadd.f32 %v1857_v47, %v1845_v62  ;;  %v1826_v28 = vadd.f32 %v1818_v61, %v1794_v1  ;;  %v5940_v39 = vmul.f32 %v5831_v7, %v1806_v5  ;;  %v5956_v1 = vld [vmem:[#allocation2 + $0x41] sm:$0xff] }
 0x129   :  { %v1795_v38 = vadd.f32 %v1787_v54, %v1775_v40  ;;  %v5943_v41 = vmul.f32 %v5831_v7, %v1807_v60  ;;  %v1717_v19 = vmul.f32 %v5819_v0, %v5875_v59  ;;  %v1776_v31 = vadd.f32 %v1768_v63, %v1756_v15  ;;  %v1808_v49 = vld [vmem:[#allocation2 + $0x3a] sm:$0xff] }
 0x12a   :  { %v1877_v25 = vadd.f32 %v5930_v9, %v1865_v11  ;;  %v1846_v45 = vadd.f32 %v1838_v42, %v1826_v28  ;;  %v1858_v47 = vmul.f32 %v5896_v20, %v1806_v5  ;;  %v1840_v54 = vmul.f32 %v5833_v8, %v1806_v5 }
 0x12b   :  { %v5949_v53 = vpop.permute.xlu1 %1461  ;;  %v5951_v61 = vpop.permute.xlu0 %1456  ;;  %v1827_v27 = vadd.f32 %v5870_v50, %v1795_v38  ;;  %v1859_v62 = vmul.f32 %v5896_v20, %v1807_v60  ;;  %v1725_v46 = vadd.f32 %v1717_v19, %v1705_v35  ;;  %v1700_v40 = vmul.f32 %v5814_v58, %v5873_v56 }
 0x12c   :  { %1624 = vst [vmem:[#allocation2 + $0x78] sm:$0xff] %v5949_v53  ;;  %1623 = vst [vmem:[#allocation2 + $0x70] sm:$0xff] %v5951_v61  ;;  %v1885_v42 = vmax.f32 %v1877_v25, 0.0  ;;  %v1866_v63 = vadd.f32 %v1858_v47, %v1846_v45  ;;  %v1718_v11 = vmul.f32 %v5819_v0, %v5873_v56  ;;  %v1699_v5 = vmul.f32 %v5814_v58, %v5875_v59 }
 0x12d   :  { %v1847_v50 = vadd.f32 %v1839_v44, %v1827_v27  ;;  %v1757_v35 = vadd.f32 %v5900_v24, %v1725_v46  ;;  %v1788_v15 = vmul.f32 %v5837_v13, %v1736_v23  ;;  %v1841_v38 = vmul.f32 %v5833_v8, %v1807_v60 }
 0x12e   :  { %1893 = vst [vmem:[#allocation3] sm:$0xff] %v1885_v42  ;;  %v2736_v28 = vmul.f32 %v5840_v14, %v1885_v42  ;;  %v1878_v19 = vadd.f32 %v5930_v9, %v1866_v63  ;;  %v1789_v25 = vmul.f32 %v5837_v13, %v5956_v1  ;;  %v5979_v24 = vmul.f32 %v5812_v57, %v5873_v56 }
 0x12f   :  { %v5973_v45 = vpop.permute.xlu1 %1471  ;;  %v5975_v44 = vpop.permute.xlu0 %1466  ;;  %v1867_v47 = vadd.f32 %v1859_v62, %v1847_v50  ;;  %v1777_v27 = vadd.f32 %v1769_v26, %v1757_v35  ;;  %v1796_v46 = vadd.f32 %v1788_v15, %v1776_v31  ;;  %v1708_v42 = vadd.f32 %v1700_v40, %v5885_v10 }
 0x130   :  { %8039 = vst [vmem:[#allocation22_spill] sm:$0xff] %v5973_v45  ;;  %8040 = vst [vmem:[#allocation23_spill] sm:$0xff] %v5975_v44  ;;  %v1886_v60 = vmax.f32 %v1878_v19, 0.0  ;;  %v1726_v63 = vadd.f32 %v1718_v11, %v5919_v52  ;;  %v1770_v3 = vmul.f32 %v5827_v4, %v1736_v23  ;;  %v1707_v50 = vadd.f32 %v1699_v5, %v5890_v16  ;;  %v6001_v19 = vld [vmem:[#allocation2 + $0x49] sm:$0xff] }
 0x131   :  { %1626 = vst [vmem:[#allocation2 + $0x88] sm:$0xff] %v5973_v45  ;;  %1625 = vst [vmem:[#allocation2 + $0x80] sm:$0xff] %v5975_v44  ;;  %v1879_v62 = vadd.f32 %v5930_v9, %v1867_v47  ;;  %v1797_v56 = vadd.f32 %v1789_v25, %v1777_v27  ;;  %v1828_v26 = vadd.f32 %v5908_v34, %v1796_v46 }
 0x132   :  { %1894 = vst [vmem:[#allocation3 + $0x8] sm:$0xff] %v1886_v60  ;;  %v5990_v31 = vmul.f32 %v5840_v14, %v1886_v60  ;;  %v1758_v35 = vadd.f32 %v1750_v43, %v1726_v63  ;;  %v1752_v10 = vmul.f32 %v5825_v2, %v1736_v23  ;;  %v1771_v52 = vmul.f32 %v5827_v4, %v5956_v1  ;;  %v6013_v60 = vld [vmem:[#allocation2 + $0x51] sm:$0xff] }
 0x133   :  { %v5995_v40 = vpop.permute.xlu1 %1481  ;;  %v5997_v11 = vpop.permute.xlu0 %1476  ;;  %v1887_v15 = vmax.f32 %v1879_v62, 0.0  ;;  %v1829_v16 = vadd.f32 %v5911_v37, %v1797_v56  ;;  %v1848_v5 = vadd.f32 %v1840_v54, %v1828_v26  ;;  %v1860_v34 = vmul.f32 %v5896_v20, %v1808_v49 }
 0x134   :  { %8041 = vst [vmem:[#allocation24_spill] sm:$0xff] %v5995_v40  ;;  %8042 = vst [vmem:[#allocation25_spill] sm:$0xff] %v5997_v11  ;;  %v1778_v43 = vadd.f32 %v1770_v3, %v1758_v35  ;;  %v6006_v23 = vmul.f32 %v5831_v7, %v1808_v49  ;;  %v1861_v25 = vmul.f32 %v5896_v20, %v1809_v55 }
 0x135   :  { %1628 = vst [vmem:[#allocation2 + $0x98] sm:$0xff] %v5995_v40  ;;  %1627 = vst [vmem:[#allocation2 + $0x90] sm:$0xff] %v5997_v11  ;;  %v1719_v47 = vmul.f32 %v5819_v0, %v5905_v33  ;;  %v2738_v37 = vmul.f32 %v5840_v14, %v1887_v15  ;;  %v2756_v54 = vmul.f32 %v5844_v17, %v1887_v15 }
 0x136   :  { %1895 = vst [vmem:[#allocation3 + $0x10] sm:$0xff] %v1887_v15  ;;  %v1849_v27 = vadd.f32 %v1841_v38, %v1829_v16  ;;  %v1868_v46 = vadd.f32 %v1860_v34, %v1848_v5  ;;  %v1842_v63 = vmul.f32 %v5833_v8, %v1808_v49  ;;  %v1720_v3 = vmul.f32 %v5819_v0, %v5903_v32 }
 0x137   :  { %v1727_v62 = vadd.f32 %v1719_v47, %v1707_v50  ;;  %v1790_v56 = vmul.f32 %v5837_v13, %v6001_v19  ;;  %v6020_v26 = vpop.permute.xlu1 %1491  ;;  %v6022_v35 = vpop.permute.xlu0 %1486  ;;  %v2764_v48 = vadd.f32 %v2756_v54, %v2736_v28  ;;  %v1843_v15 = vmul.f32 %v5833_v8, %v1809_v55 }
 0x138   :  { %8043 = vst [vmem:[#allocation26_spill] sm:$0xff] %v6020_v26  ;;  %8044 = vst [vmem:[#allocation27_spill] sm:$0xff] %v6022_v35  ;;  %v1869_v38 = vadd.f32 %v1861_v25, %v1849_v27  ;;  %v1880_v16 = vadd.f32 %v5930_v9, %v1868_v46  ;;  %v1930_v49 = vmul.f32 %v5814_v58, %v5903_v32 }
 0x139   :  { %1630 = vst [vmem:[#allocation2 + $0xa8] sm:$0xff] %v6020_v26  ;;  %1629 = vst [vmem:[#allocation2 + $0xa0] sm:$0xff] %v6022_v35  ;;  %v1759_v50 = vadd.f32 %v5934_v51, %v1727_v62  ;;  %v1791_v5 = vmul.f32 %v5837_v13, %v6013_v60  ;;  %v1798_v34 = vadd.f32 %v1790_v56, %v1778_v43  ;;  %v2792_v27 = vld [vmem:[#allocation3 + $0x1] sm:$0xff] }
 0x13a   :  { %v1881_v28 = vadd.f32 %v5930_v9, %v1869_v38  ;;  %v1888_v47 = vmax.f32 %v1880_v16, 0.0  ;;  %v1913_v25 = vmul.f32 %v5812_v57, %v5875_v59  ;;  %v6038_v54 = vmul.f32 %v5825_v2, %v5956_v1  ;;  %v1810_v43 = vld [vmem:[#allocation2 + $0x4a] sm:$0xff] }
 0x13b   :  { %v6041_v46 = vmul.f32 %v5831_v7, %v1809_v55  ;;  %v1728_v35 = vadd.f32 %v1720_v3, %v1708_v42  ;;  %v1916_v51 = vmul.f32 %v5812_v57, %v5903_v32  ;;  %v1779_v62 = vadd.f32 %v1771_v52, %v1759_v50  ;;  %v6045_v56 = vpop.permute.xlu1 %1501  ;;  %v6047_v38 = vpop.permute.xlu0 %1496  ;;  %v1811_v50 = vld [vmem:[#allocation2 + $0x52] sm:$0xff]  ;;  %v2864_v26 = vld [vmem:[#allocation3 + $0x2] sm:$0xff] }
 0x13c   :  { %8045 = vst [vmem:[#allocation28_spill] sm:$0xff] %v6045_v56  ;;  %8046 = vst [vmem:[#allocation29_spill] sm:$0xff] %v6047_v38  ;;  %v1889_v16 = vmax.f32 %v1881_v28, 0.0  ;;  %v6050_v59 = vmul.f32 %v5840_v14, %v1888_v47  ;;  %v2757_v1 = vmul.f32 %v5844_v17, %v1888_v47  ;;  %v1830_v55 = vadd.f32 %v5940_v39, %v1798_v34 }
 0x13d   :  { %1896 = vst [vmem:[#allocation3 + $0x18] sm:$0xff] %v1888_v47  ;;  %1632 = vst [vmem:[#allocation2 + $0xb8] sm:$0xff] %v6045_v56  ;;  %v6057_v32 = vadd.f32 %v1930_v49, %v5979_v24  ;;  %v1760_v42 = vadd.f32 %v1752_v10, %v1728_v35  ;;  %v1772_v52 = vmul.f32 %v5827_v4, %v6001_v19 }
 0x13e   :  { %1631 = vst [vmem:[#allocation2 + $0xb0] sm:$0xff] %v6047_v38  ;;  %v1799_v3 = vadd.f32 %v1791_v5, %v1779_v62  ;;  %v2808_v28 = vmul.f32 %v5847_v18, %v2792_v27  ;;  %1897 = vst [vmem:[#allocation3 + $0x20] sm:$0xff] %v1889_v16  ;;  %v6063_v47 = vmul.f32 %v5840_v14, %v1889_v16  ;;  %v2793_v27 = vld [vmem:[#allocation3 + $0x9] sm:$0xff] }
 0x13f   :  { %v2758_v39 = vmul.f32 %v5844_v17, %v1889_v16  ;;  %v1862_v34 = vmul.f32 %v5896_v20, %v1810_v43  ;;  %v6068_v24 = vadd.f32 %v2757_v1, %v5990_v31  ;;  %v2776_v10 = vmul.f32 %v5853_v22, %v1889_v16  ;;  %v1512_v5 = vpop.permute.xlu1 %1511  ;;  %v1507_v62 = vpop.permute.xlu0 %1506  ;;  %v2865_v31 = vld [vmem:[#allocation3 + $0xa] sm:$0xff] }
 0x140   :  { %v1831_v35 = vadd.f32 %v5943_v41, %v1799_v3  ;;  %v1850_v49 = vadd.f32 %v1842_v63, %v1830_v55  ;;  %v6073_v56 = vmul.f32 %v5833_v8, %v1810_v43  ;;  %v1863_v11 = vmul.f32 %v5896_v20, %v1811_v50  ;;  %1634 = vst [vmem:[#allocation2 + $0xc8] sm:$0xff] %v1512_v5 }
 0x141   :  { %v2766_v38 = vadd.f32 %v2758_v39, %v2738_v37  ;;  %v1929_v40 = vmul.f32 %v5814_v58, %v5905_v33  ;;  %1633 = vst [vmem:[#allocation2 + $0xc0] sm:$0xff] %v1507_v62  ;;  %v6079_v16 = vmul.f32 %v5851_v21, %v2864_v26  ;;  %v2784_v41 = vadd.f32 %v2776_v10, %v2764_v48 }
 0x142   :  { %v1851_v63 = vadd.f32 %v1843_v15, %v1831_v35  ;;  %v1870_v1 = vadd.f32 %v1862_v34, %v1850_v49  ;;  %v1780_v55 = vadd.f32 %v1772_v52, %v1760_v42  ;;  %v6083_v37 = vmul.f32 %v5812_v57, %v5905_v33 }
 0x143   :  { %v6087_v3 = vmul.f32 %v5825_v2, %v6001_v19  ;;  %v1932_v39 = vmul.f32 %v5814_v58, %v5923_v12  ;;  %v2809_v5 = vmul.f32 %v5847_v18, %v2793_v27  ;;  %v2816_v26 = vadd.f32 %v2808_v28, %v2784_v41  ;;  %v6108_v28 = vld [vmem:[#allocation2 + $0x59] sm:$0xff]  ;;  %v1522_v35 = vpop.permute.xlu1 %1521 }
 0x144   :  { %v2794_v62 = vld [vmem:[#allocation3 + $0x11] sm:$0xff]  ;;  %v1871_v44 = vadd.f32 %v1863_v11, %v1851_v63  ;;  %v1882_v48 = vadd.f32 %v5930_v9, %v1870_v1  ;;  %v6094_v15 = vmul.f32 %v5851_v21, %v2865_v31  ;;  %v1937_v42 = vadd.f32 %v1929_v40, %v1913_v25  ;;  %1636 = vst [vmem:[#allocation2 + $0xd8] sm:$0xff] %v1522_v35  ;;  %v1517_v63 = vpop.permute.xlu0 %1516 }
 0x145   :  { %v2828_v33 = vmul.f32 %v5856_v29, %v2794_v62  ;;  %v6099_v19 = vmul.f32 %v5825_v2, %v6013_v60  ;;  %v6104_v10 = vmul.f32 %v5827_v4, %v6013_v60  ;;  %v6106_v11 = vadd.f32 %v1932_v39, %v1916_v51  ;;  %v2866_v31 = vld [vmem:[#allocation3 + $0x12] sm:$0xff]  ;;  %1635 = vst [vmem:[#allocation2 + $0xd0] sm:$0xff] %v1517_v63  ;;  %v2867_v35 = vld [vmem:[#allocation3 + $0x1a] sm:$0xff] }
 0x146   :  { %v1883_v52 = vadd.f32 %v5930_v9, %v1871_v44  ;;  %v1890_v34 = vmax.f32 %v1882_v48, 0.0  ;;  %v6111_v27 = vmul.f32 %v5831_v7, %v1810_v43  ;;  %v6114_v40 = vmul.f32 %v5831_v7, %v1811_v50  ;;  %v2795_v44 = vld [vmem:[#allocation3 + $0x19] sm:$0xff] }
 0x147   :  { %8047 = vst [vmem:[#allocation30_spill] sm:$0xff] %v6099_v19  ;;  %v2836_v49 = vadd.f32 %v2828_v33, %v2816_v26  ;;  %v6117_v25 = vmul.f32 %v5833_v8, %v1811_v50  ;;  %v6125_v43 = vmul.f32 %v5812_v57, %v5923_v12  ;;  %v2810_v1 = vmul.f32 %v5847_v18, %v2794_v62  ;;  %v6150_v19 = vld [vmem:[#allocation2 + $0x5a] sm:$0xff] }
 0x148   :  { %8048 = vst [vmem:[#allocation31_spill] sm:$0xff] %v6111_v27  ;;  %8049 = vst [vmem:[#allocation32_spill] sm:$0xff] %v6114_v40  ;;  %v1891_v60 = vmax.f32 %v1883_v52, 0.0  ;;  %v6120_v51 = vmul.f32 %v5840_v14, %v1890_v34  ;;  %v2759_v41 = vmul.f32 %v5844_v17, %v1890_v34  ;;  %v2777_v50 = vmul.f32 %v5853_v22, %v1890_v34 }
 0x149   :  { %1898 = vst [vmem:[#allocation3 + $0x28] sm:$0xff] %v1890_v34  ;;  %v1946_v39 = vmul.f32 %v5819_v0, %v5923_v12  ;;  %v1792_v26 = vmul.f32 %v5837_v13, %v6108_v28  ;;  %v2829_v34 = vmul.f32 %v5856_v29, %v2795_v44  ;;  %v6143_v12 = vmul.f32 %v5851_v21, %v2866_v31 }
 0x14a   :  { %1899 = vst [vmem:[#allocation3 + $0x30] sm:$0xff] %v1891_v60  ;;  %v6134_v48 = vmul.f32 %v5840_v14, %v1891_v60  ;;  %v2760_v33 = vmul.f32 %v5844_v17, %v1891_v60  ;;  %v6138_v52 = vadd.f32 %v2759_v41, %v6050_v59  ;;  %v2778_v62 = vmul.f32 %v5853_v22, %v1891_v60 }
 0x14b   :  { %v2785_v45 = vadd.f32 %v2777_v50, %v6068_v24  ;;  %v1800_v63 = vadd.f32 %v1792_v26, %v1780_v55  ;;  %v2900_v40 = vmul.f32 %v5858_v30, %v2866_v31  ;;  %v1945_v59 = vmul.f32 %v5819_v0, %v5925_v6 }
 0x14c   :  { %8050 = vst [vmem:[#allocation33_spill] sm:$0xff] %v6134_v48  ;;  %v6148_v27 = vadd.f32 %v2760_v33, %v6063_v47  ;;  %v2786_v48 = vadd.f32 %v2778_v62, %v2766_v38  ;;  %v1954_v41 = vadd.f32 %v1946_v39, %v6057_v32  ;;  %v1931_v24 = vmul.f32 %v5814_v58, %v5925_v6  ;;  %v1965_v32 = vld [vmem:[#allocation2 + $0x61] sm:$0xff] }
 0x14d   :  { %v2817_v60 = vadd.f32 %v2809_v5, %v2785_v45  ;;  %v1832_v8 = vadd.f32 %v6006_v23, %v1800_v63  ;;  %v6159_v55 = vmul.f32 %v5847_v18, %v2795_v44  ;;  %v6162_v47 = vmul.f32 %v5851_v21, %v2867_v35 }
 0x14e   :  { %v2818_v38 = vadd.f32 %v2810_v1, %v2786_v48  ;;  %v1953_v31 = vadd.f32 %v1945_v59, %v1937_v42  ;;  %v2901_v50 = vmul.f32 %v5858_v30, %v2867_v35  ;;  %v1864_v23 = vmul.f32 %v5896_v20, %v6150_v19 }
 0x14f   :  { %v2837_v33 = vadd.f32 %v2829_v34, %v2817_v60  ;;  %v1852_v45 = vadd.f32 %v6073_v56, %v1832_v8  ;;  %v6171_v39 = vadd.f32 %v6087_v3, %v1954_v41  ;;  %v6175_v42 = vmul.f32 %v5812_v57, %v5925_v6  ;;  %v6188_v3 = vld [vmem:[%s7975_s1 + $0x12] ss:$0 sm:$0xff] }
 0x150   :  { %v2796_v26 = vld [vmem:[#allocation3 + $0x21] sm:$0xff]  ;;  %v6178_v62 = vadd.f32 %v1931_v24, %v6083_v37  ;;  %v6182_v8 = vmul.f32 %v5825_v2, %v6108_v28  ;;  %v1981_v56 = vadd.f32 %v6038_v54, %v1953_v31  ;;  %v6194_v63 = vmul.f32 %v1965_v32, %v5825_v2 }
 0x151   :  { %v2830_v5 = vmul.f32 %v5856_v29, %v2796_v26  ;;  %v2848_v44 = vmul.f32 %v5862_v36, %v2796_v26  ;;  %v2797_v1 = vld [vmem:[#allocation3 + $0x29] sm:$0xff]  ;;  %v1872_v48 = vadd.f32 %v1864_v23, %v1852_v45  ;;  %v2005_v37 = vmul.f32 %v1965_v32, %v5837_v13 }
 0x152   :  { %v2849_v6 = vmul.f32 %v5862_v36, %v2797_v1  ;;  %v2868_v35 = vld [vmem:[#allocation3 + $0x22] sm:$0xff]  ;;  %v1990_v60 = vmul.f32 %v5827_v4, %v6108_v28  ;;  %v6200_v54 = vmul.f32 %v1965_v32, %v5827_v4  ;;  %v6204_v41 = vmul.f32 %v5831_v7, %v6150_v19  ;;  %v2869_v31 = vld [vmem:[#allocation3 + $0x2a] sm:$0xff] }
 0x153   :  { %v6190_v34 = vadd.f32 %v2830_v5, %v2818_v38  ;;  %v2856_v59 = vadd.f32 %v2848_v44, %v2836_v49  ;;  %v6207_v24 = vmul.f32 %v5847_v18, %v2796_v26  ;;  %v1884_v45 = vadd.f32 %v5930_v9, %v1872_v48 }
 0x154   :  { %8051 = vst [vmem:[#allocation34_spill] sm:$0xff] %v6204_v41  ;;  %v2857_v38 = vadd.f32 %v2849_v6, %v2837_v33  ;;  %v1997_v23 = vadd.f32 %v6104_v10, %v1981_v56  ;;  %v6212_v49 = vmul.f32 %v5851_v21, %v2868_v35  ;;  %v6216_v32 = vmul.f32 %v5858_v30, %v2868_v35  ;;  %v2025_v56 = vld [vmem:[#allocation2 + $0x62] sm:$0xff] }
 0x155   :  { %v2888_v28 = vadd.f32 %v6079_v16, %v2856_v59  ;;  %v2920_v5 = vmul.f32 %v6188_v3, %v2868_v35  ;;  %v6220_v44 = vmul.f32 %v5847_v18, %v2797_v1  ;;  %v1892_v33 = vmax.f32 %v1884_v45, 0.0  ;;  %v6231_v35 = vld [vmem:[%s7975_s1 + $0x13] ss:$0 sm:$0xff] }
 0x156   :  { %8052 = vst [vmem:[#allocation35_spill] sm:$0xff] %v6212_v49  ;;  %v2889_v26 = vadd.f32 %v6094_v15, %v2857_v38  ;;  %v2013_v6 = vadd.f32 %v2005_v37, %v1997_v23  ;;  %v2921_v10 = vmul.f32 %v6188_v3, %v2869_v31  ;;  %v1934_v49 = vmul.f32 %v5814_v58, %v5949_v53  ;;  %v1532_v38 = vpop.permute.xlu1 %1531 }
 0x157   :  { %8053 = vst [vmem:[#allocation36_spill] sm:$0xff] %v6220_v44  ;;  %v2908_v48 = vadd.f32 %v2900_v40, %v2888_v28  ;;  %v1948_v16 = vmul.f32 %v5819_v0, %v5949_v53  ;;  %1900 = vst [vmem:[#allocation3 + $0x38] sm:$0xff] %v1892_v33  ;;  %v6235_v40 = vmul.f32 %v5840_v14, %v1892_v33 }
 0x158   :  { %v2909_v59 = vadd.f32 %v2901_v50, %v2889_v26  ;;  %v2041_v15 = vadd.f32 %v6041_v46, %v2013_v6  ;;  %v2761_v37 = vmul.f32 %v5844_v17, %v1892_v33  ;;  %v2779_v23 = vmul.f32 %v5853_v22, %v1892_v33  ;;  %1638 = vst [vmem:[#allocation2 + $0xe8] sm:$0xff] %v1532_v38 }
 0x159   :  { %v2928_v45 = vadd.f32 %v2920_v5, %v2908_v48  ;;  %v6240_v28 = vadd.f32 %v1934_v49, %v6125_v43  ;;  %v1956_v41 = vadd.f32 %v1948_v16, %v6106_v11  ;;  %v2065_v46 = vmul.f32 %v5896_v20, %v2025_v56  ;;  %v1966_v48 = vld [vmem:[#allocation2 + $0x69] sm:$0xff] }
 0x15a   :  { %v2929_v44 = vadd.f32 %v2921_v10, %v2909_v59  ;;  %v2057_v50 = vadd.f32 %v6117_v25, %v2041_v15  ;;  %v6246_v26 = vadd.f32 %v2761_v37, %v6120_v51  ;;  %v2831_v6 = vmul.f32 %v5856_v29, %v2797_v1  ;;  %v1527_v1 = vpop.permute.xlu0 %1526 }
 0x15b   :  { %v6250_v5 = vadd.f32 %v6231_v35, %v2928_v45  ;;  %v2787_v33 = vadd.f32 %v2779_v23, %v6138_v52  ;;  %v1933_v43 = vmul.f32 %v5814_v58, %v5951_v61  ;;  %v6256_v11 = vmul.f32 %v5851_v21, %v2869_v31  ;;  %1637 = vst [vmem:[#allocation2 + $0xe0] sm:$0xff] %v1527_v1  ;;  %v1967_v45 = vld [vmem:[#allocation2 + $0x71] sm:$0xff] }
 0x15c   :  { %v6259_v25 = vadd.f32 %v6231_v35, %v2929_v44  ;;  %v2073_v49 = vadd.f32 %v2065_v46, %v2057_v50  ;;  %v1947_v51 = vmul.f32 %v5819_v0, %v5951_v61  ;;  %v6264_v10 = vmul.f32 %v5858_v30, %v2869_v31  ;;  %v8058_v23 = vld [vmem:[#allocation20_spill] sm:$0xff]  ;;  %v8061_v44 = vld [vmem:[#allocation33_spill] sm:$0xff] }
 0x15d   :  { %8054 = vst [vmem:[#allocation37_spill] sm:$0xff] %v6250_v5  ;;  %8055 = vst [vmem:[#allocation38_spill] sm:$0xff] %v6256_v11  ;;  %v2819_v16 = vadd.f32 %v6159_v55, %v2787_v33  ;;  %v6269_v59 = vadd.f32 %v1933_v43, %v6175_v42  ;;  %v1998_v15 = vadd.f32 %v1990_v60, %v6171_v39 }
 0x15e   :  { %8056 = vst [vmem:[#allocation39_spill] sm:$0xff] %v6259_v25  ;;  %v2081_v37 = vadd.f32 %v5930_v9, %v2073_v49  ;;  %v1955_v38 = vadd.f32 %v1947_v51, %v6178_v62  ;;  %v6276_v31 = vmul.f32 %v2025_v56, %v5831_v7  ;;  %v2050_v50 = vmul.f32 %v8058_v23, %v6150_v19  ;;  %v2798_v55 = vld [vmem:[#allocation3 + $0x31] sm:$0xff]  ;;  %v8059_v51 = vld [vmem:[#allocation30_spill] sm:$0xff] }
 0x15f   :  { %v2839_v46 = vadd.f32 %v2831_v6, %v2819_v16  ;;  %v2006_v42 = vmul.f32 %v1966_v48, %v5837_v13  ;;  %v2051_v33 = vmul.f32 %v2025_v56, %v8058_v23  ;;  %v2850_v39 = vmul.f32 %v5862_v36, %v2798_v55 }
 0x160   :  { %8057 = vst [vmem:[#allocation40_spill] sm:$0xff] %v6276_v31  ;;  %v2089_v43 = vmax.f32 %v2081_v37, 0.0  ;;  %v1920_v60 = vmul.f32 %v5812_v57, %v5949_v53  ;;  %v1984_v62 = vadd.f32 %v6182_v8, %v1956_v41  ;;  %v6288_v49 = vmul.f32 %v5812_v57, %v5951_v61  ;;  %v2870_v53 = vld [vmem:[#allocation3 + $0x32] sm:$0xff]  ;;  %v8062_v31 = vld [vmem:[#allocation31_spill] sm:$0xff] }
 0x161   :  { %v1983_v19 = vadd.f32 %v8059_v51, %v1955_v38  ;;  %v2007_v6 = vmul.f32 %v1967_v45, %v5837_v13  ;;  %v2858_v16 = vadd.f32 %v2850_v39, %v6190_v34  ;;  %v6299_v8 = vmul.f32 %v1966_v48, %v5825_v2  ;;  %v2026_v51 = vld [vmem:[#allocation2 + $0x6a] sm:$0xff] }
 0x162   :  { %2097 = vst [vmem:[#allocation3 + $0x40] sm:$0xff] %v2089_v43  ;;  %v2762_v1 = vmul.f32 %v5844_v17, %v2089_v43  ;;  %v2780_v56 = vmul.f32 %v5853_v22, %v2089_v43  ;;  %v6296_v37 = vmul.f32 %v5840_v14, %v2089_v43  ;;  %v6302_v61 = vmul.f32 %v1967_v45, %v5825_v2 }
 0x163   :  { %v1999_v41 = vadd.f32 %v6200_v54, %v1983_v19  ;;  %v2014_v38 = vadd.f32 %v2006_v42, %v1998_v15  ;;  %v2832_v34 = vmul.f32 %v5856_v29, %v2798_v55  ;;  %v2890_v43 = vadd.f32 %v6143_v12, %v2858_v16  ;;  %v8063_v19 = vld [vmem:[#allocation32_spill] sm:$0xff] }
 0x164   :  { %8060 = vst [vmem:[#allocation20_spill] sm:$0xff] %v6302_v61  ;;  %v6306_v52 = vadd.f32 %v2762_v1, %v8061_v44  ;;  %v2788_v25 = vadd.f32 %v2780_v56, %v6148_v27  ;;  %v1992_v39 = vmul.f32 %v1966_v48, %v5827_v4  ;;  %v6313_v5 = vmul.f32 %v1967_v45, %v5827_v4  ;;  %v2027_v61 = vld [vmem:[#allocation2 + $0x72] sm:$0xff]  ;;  %v8064_v56 = vld [vmem:[#allocation22_spill] sm:$0xff] }
 0x165   :  { %v2015_v11 = vadd.f32 %v2007_v6, %v1999_v41  ;;  %v2042_v54 = vadd.f32 %v8062_v31, %v2014_v38  ;;  %v2910_v44 = vadd.f32 %v6216_v32, %v2890_v43  ;;  %v2922_v42 = vmul.f32 %v6188_v3, %v2870_v53 }
 0x166   :  { %v2820_v15 = vadd.f32 %v6207_v24, %v2788_v25  ;;  %v2066_v27 = vmul.f32 %v5896_v20, %v2026_v51  ;;  %v1936_v48 = vmul.f32 %v5814_v58, %v8064_v56  ;;  %v1950_v45 = vmul.f32 %v5819_v0, %v8064_v56 }
 0x167   :  { %v2043_v1 = vadd.f32 %v8063_v19, %v2015_v11  ;;  %v2058_v12 = vadd.f32 %v2050_v50, %v2042_v54  ;;  %v6326_v6 = vmul.f32 %v5847_v18, %v2798_v55  ;;  %v2930_v24 = vadd.f32 %v2922_v42, %v2910_v44  ;;  %v1542_v44 = vpop.permute.xlu1 %1541 }
 0x168   :  { %v6328_v31 = vadd.f32 %v2832_v34, %v2820_v15  ;;  %v2067_v32 = vmul.f32 %v5896_v20, %v2027_v61  ;;  %v6331_v38 = vadd.f32 %v1936_v48, %v1920_v60  ;;  %v1958_v11 = vadd.f32 %v1950_v45, %v6240_v28  ;;  %1640 = vst [vmem:[#allocation2 + $0xf8] sm:$0xff] %v1542_v44 }
 0x169   :  { %v2799_v25 = vld [vmem:[#allocation3 + $0x39] sm:$0xff]  ;;  %v2059_v16 = vadd.f32 %v2051_v33, %v2043_v1  ;;  %v2074_v41 = vadd.f32 %v2066_v27, %v2058_v12  ;;  %v6336_v43 = vmul.f32 %v5851_v21, %v2870_v53  ;;  %v6339_v55 = vmul.f32 %v5858_v30, %v2870_v53  ;;  %v1968_v53 = vld [vmem:[#allocation2 + $0x79] sm:$0xff] }
 0x16a   :  { %v2851_v50 = vmul.f32 %v5862_v36, %v2799_v25  ;;  %v2000_v34 = vadd.f32 %v1992_v39, %v1984_v62  ;;  %v2871_v54 = vld [vmem:[#allocation3 + $0x3a] sm:$0xff]  ;;  %v6342_v15 = vadd.f32 %v6231_v35, %v2930_v24  ;;  %v6345_v33 = vmul.f32 %v2026_v51, %v5831_v7 }
 0x16b   :  { %8065 = vst [vmem:[#allocation30_spill] sm:$0xff] %v6336_v43  ;;  %v6348_v60 = vmul.f32 %v2027_v61, %v5831_v7  ;;  %v2075_v28 = vadd.f32 %v2067_v32, %v2059_v16  ;;  %v2052_v27 = vmul.f32 %v2026_v51, %v8058_v23  ;;  %v6352_v19 = vmul.f32 %v2027_v61, %v8058_v23  ;;  %v6355_v39 = vld [vmem:[#allocation2 + $0x81] sm:$0xff] }
 0x16c   :  { %8066 = vst [vmem:[#allocation33_spill] sm:$0xff] %v6342_v15  ;;  %8067 = vst [vmem:[#allocation31_spill] sm:$0xff] %v6345_v33  ;;  %v2859_v42 = vadd.f32 %v2851_v50, %v2839_v46  ;;  %v2082_v62 = vadd.f32 %v5930_v9, %v2074_v41  ;;  %v6361_v48 = vmul.f32 %v5812_v57, %v8064_v56  ;;  %v8069_v46 = vld [vmem:[#allocation23_spill] sm:$0xff] }
 0x16d   :  { %8068 = vst [vmem:[#allocation32_spill] sm:$0xff] %v6348_v60  ;;  %v2083_v12 = vadd.f32 %v5930_v9, %v2075_v28  ;;  %v1949_v51 = vmul.f32 %v5819_v0, %v8069_v46  ;;  %v2923_v45 = vmul.f32 %v6188_v3, %v2871_v54  ;;  %v1935_v32 = vmul.f32 %v5814_v58, %v8069_v46  ;;  %v1537_v28 = vpop.permute.xlu0 %1536 }
 0x16e   :  { %v2891_v61 = vadd.f32 %v6162_v47, %v2859_v42  ;;  %v2090_v24 = vmax.f32 %v2082_v62, 0.0  ;;  %v2008_v50 = vmul.f32 %v1968_v53, %v5837_v13  ;;  %v2009_v56 = vmul.f32 %v6355_v39, %v5837_v13  ;;  %1639 = vst [vmem:[#allocation2 + $0xf0] sm:$0xff] %v1537_v28 }
 0x16f   :  { %v2091_v16 = vmax.f32 %v2083_v12, 0.0  ;;  %v1957_v41 = vadd.f32 %v1949_v51, %v6269_v59 }
 0x170   :  { %v2911_v44 = vadd.f32 %v6264_v10, %v2891_v61  ;;  %2098 = vst [vmem:[#allocation3 + $0x48] sm:$0xff] %v2090_v24  ;;  %v2763_v47 = vmul.f32 %v5844_v17, %v2090_v24  ;;  %v2781_v42 = vmul.f32 %v5853_v22, %v2090_v24  ;;  %v6377_v62 = vmul.f32 %v5840_v14, %v2090_v24 }
 0x171   :  { %2099 = vst [vmem:[#allocation3 + $0x50] sm:$0xff] %v2091_v16  ;;  %v2782_v59 = vmul.f32 %v5853_v22, %v2091_v16  ;;  %v6381_v12 = vmul.f32 %v5840_v14, %v2091_v16  ;;  %v2992_v51 = vmul.f32 %v5844_v17, %v2091_v16  ;;  %v1985_v1 = vadd.f32 %v6194_v63, %v1957_v41 }
 0x172   :  { %v2833_v10 = vmul.f32 %v5856_v29, %v2799_v25  ;;  %v2931_v61 = vadd.f32 %v2923_v45, %v2911_v44  ;;  %v6387_v15 = vadd.f32 %v2763_v47, %v6235_v40  ;;  %v2789_v24 = vadd.f32 %v2781_v42, %v6246_v26  ;;  %v8071_v45 = vld [vmem:[#allocation36_spill] sm:$0xff]  ;;  %v8072_v44 = vld [vmem:[#allocation34_spill] sm:$0xff] }
 0x173   :  { %v2790_v28 = vadd.f32 %v2782_v59, %v6306_v52  ;;  %v6392_v43 = vadd.f32 %v2992_v51, %v6296_v37  ;;  %v2001_v60 = vadd.f32 %v6313_v5, %v1985_v1  ;;  %v2016_v33 = vadd.f32 %v2008_v50, %v2000_v34  ;;  %v2028_v50 = vld [vmem:[#allocation2 + $0x7a] sm:$0xff]  ;;  %v6411_v42 = vld [vmem:[#allocation2 + $0x82] sm:$0xff] }
 0x174   :  { %v6396_v16 = vmul.f32 %v5847_v18, %v2799_v25  ;;  %v6399_v63 = vadd.f32 %v6231_v35, %v2931_v61  ;;  %v2821_v41 = vadd.f32 %v8071_v45, %v2789_v24  ;;  %v1994_v40 = vmul.f32 %v1968_v53, %v5827_v4  ;;  %v1552_v24 = vpop.permute.xlu1 %1551  ;;  %v8080_v25 = vld [vmem:[#allocation25_spill] sm:$0xff] }
 0x175   :  { %v6404_v26 = vmul.f32 %v5851_v21, %v2871_v54  ;;  %v2822_v52 = vadd.f32 %v6326_v6, %v2790_v28  ;;  %v2017_v37 = vadd.f32 %v2009_v56, %v2001_v60  ;;  %v2044_v47 = vadd.f32 %v8072_v44, %v2016_v33  ;;  %v8073_v33 = vld [vmem:[#allocation40_spill] sm:$0xff]  ;;  %1642 = vst [vmem:[#allocation2 + $0x108] sm:$0xff] %v1552_v24 }
 0x176   :  { %8070 = vst [vmem:[#allocation22_spill] sm:$0xff] %v6399_v63  ;;  %v2905_v5 = vmul.f32 %v5858_v30, %v2871_v54  ;;  %v2841_v34 = vadd.f32 %v2833_v10, %v2821_v41  ;;  %v1986_v1 = vadd.f32 %v6299_v8, %v1958_v11  ;;  %v1943_v51 = vadd.f32 %v1935_v32, %v6288_v49  ;;  %v1547_v63 = vpop.permute.xlu0 %1546 }
 0x177   :  { %v2800_v59 = vld [vmem:[#allocation3 + $0x41] sm:$0xff]  ;;  %v6415_v61 = vmul.f32 %v1968_v53, %v5825_v2  ;;  %v6419_v6 = vmul.f32 %v6355_v39, %v5827_v4  ;;  %v2045_v54 = vadd.f32 %v8073_v33, %v2017_v37  ;;  %v2060_v10 = vadd.f32 %v2052_v27, %v2044_v47  ;;  %1641 = vst [vmem:[#allocation2 + $0x100] sm:$0xff] %v1547_v63 }
 0x178   :  { %v6422_v60 = vld [vmem:[#allocation3 + $0x49] sm:$0xff]  ;;  %v2834_v56 = vmul.f32 %v5856_v29, %v2800_v59  ;;  %v2852_v8 = vmul.f32 %v5862_v36, %v2800_v59  ;;  %v6426_v11 = vadd.f32 %v1994_v40, %v1986_v1  ;;  %v6433_v32 = vmul.f32 %v2028_v50, %v5831_v7 }
 0x179   :  { %v2853_v49 = vmul.f32 %v5862_v36, %v6422_v60  ;;  %v6430_v53 = vld [vmem:[#allocation3 + $0x42] sm:$0xff]  ;;  %v6436_v28 = vmul.f32 %v2028_v50, %v8058_v23  ;;  %v6440_v45 = vmul.f32 %v6411_v42, %v8058_v23  ;;  %v2068_v40 = vmul.f32 %v5896_v20, %v2028_v50  ;;  %v2873_v47 = vld [vmem:[#allocation3 + $0x4a] sm:$0xff] }
 0x17a   :  { %8074 = vst [vmem:[#allocation23_spill] sm:$0xff] %v6433_v32  ;;  %v6442_v41 = vadd.f32 %v2834_v56, %v2822_v52  ;;  %v2860_v27 = vadd.f32 %v2852_v8, %v6328_v31  ;;  %v2069_v37 = vmul.f32 %v5896_v20, %v6411_v42  ;;  %v2061_v1 = vadd.f32 %v6352_v19, %v2045_v54  ;;  %v8077_v52 = vld [vmem:[#allocation35_spill] sm:$0xff]  ;;  %v8078_v20 = vld [vmem:[#allocation24_spill] sm:$0xff]  ;;  %v8079_v54 = vld [vmem:[#allocation38_spill] sm:$0xff] }
 0x17b   :  { %v2861_v44 = vadd.f32 %v2853_v49, %v2841_v34  ;;  %v6451_v33 = vmul.f32 %v5812_v57, %v8069_v46  ;;  %v6455_v24 = vmul.f32 %v6355_v39, %v5825_v2  ;;  %v6460_v31 = vmul.f32 %v5858_v30, %v6430_v53 }
 0x17c   :  { %v2892_v56 = vadd.f32 %v8077_v52, %v2860_v27  ;;  %v2076_v50 = vadd.f32 %v2068_v40, %v2060_v10  ;;  %v1952_v34 = vmul.f32 %v5819_v0, %v8078_v20  ;;  %v2835_v19 = vmul.f32 %v5856_v29, %v6422_v60  ;;  %v6474_v40 = vld [vmem:[#allocation2 + $0x89] sm:$0xff] }
 0x17d   :  { %8075 = vst [vmem:[#allocation36_spill] sm:$0xff] %v6451_v33  ;;  %8076 = vst [vmem:[#allocation34_spill] sm:$0xff] %v6455_v24  ;;  %v2893_v46 = vadd.f32 %v8079_v54, %v2861_v44  ;;  %v2924_v8 = vmul.f32 %v6188_v3, %v6430_v53  ;;  %v2077_v39 = vadd.f32 %v2069_v37, %v2061_v1 }
 0x17e   :  { %v2912_v49 = vadd.f32 %v6339_v55, %v2892_v56  ;;  %v2925_v27 = vmul.f32 %v6188_v3, %v2873_v47  ;;  %v2084_v52 = vadd.f32 %v5930_v9, %v2076_v50  ;;  %v1951_v10 = vmul.f32 %v5819_v0, %v8080_v25 }
 0x17f   :  { %v2913_v24 = vadd.f32 %v2905_v5, %v2893_v46  ;;  %v3036_v32 = vmul.f32 %v5847_v18, %v2800_v59  ;;  %v2085_v44 = vadd.f32 %v5930_v9, %v2077_v39  ;;  %v2134_v37 = vmul.f32 %v5814_v58, %v8078_v20 }
 0x180   :  { %v2932_v55 = vadd.f32 %v2924_v8, %v2912_v49  ;;  %v2092_v1 = vmax.f32 %v2084_v52, 0.0  ;;  %v1960_v56 = vadd.f32 %v1952_v34, %v6331_v38  ;;  %v1959_v50 = vadd.f32 %v1951_v10, %v1943_v51  ;;  %v1971_v51 = vld [vmem:[#allocation2 + $0x91] sm:$0xff] }
 0x181   :  { %v2933_v54 = vadd.f32 %v2925_v27, %v2913_v24  ;;  %v2093_v33 = vmax.f32 %v2085_v44, 0.0  ;;  %v1996_v0 = vmul.f32 %v6474_v40, %v5827_v4  ;;  %v2010_v5 = vmul.f32 %v6474_v40, %v5837_v13  ;;  %v8083_v52 = vld [vmem:[#allocation20_spill] sm:$0xff] }
 0x182   :  { %v6486_v59 = vadd.f32 %v6231_v35, %v2932_v55  ;;  %2100 = vst [vmem:[#allocation3 + $0x58] sm:$0xff] %v2092_v1  ;;  %v2783_v9 = vmul.f32 %v5853_v22, %v2092_v1  ;;  %v6490_v63 = vmul.f32 %v5840_v14, %v2092_v1  ;;  %v2993_v38 = vmul.f32 %v5844_v17, %v2092_v1  ;;  %v8086_v44 = vld [vmem:[#allocation32_spill] sm:$0xff] }
 0x183   :  { %v6494_v24 = vadd.f32 %v6231_v35, %v2933_v54  ;;  %2101 = vst [vmem:[#allocation3 + $0x60] sm:$0xff] %v2093_v33  ;;  %v6497_v34 = vmul.f32 %v5840_v14, %v2093_v33  ;;  %v2994_v46 = vmul.f32 %v5844_v17, %v2093_v33  ;;  %v3008_v8 = vmul.f32 %v5853_v22, %v2093_v33 }
 0x184   :  { %8081 = vst [vmem:[#allocation40_spill] sm:$0xff] %v6486_v59  ;;  %v2791_v49 = vadd.f32 %v2783_v9, %v6387_v15  ;;  %v6504_v27 = vadd.f32 %v2993_v38, %v6377_v62  ;;  %v1987_v10 = vadd.f32 %v8083_v52, %v1959_v50  ;;  %v2011_v54 = vmul.f32 %v1971_v51, %v5837_v13  ;;  %v2030_v50 = vld [vmem:[#allocation2 + $0x8a] sm:$0xff] }
 0x185   :  { %8082 = vst [vmem:[#allocation35_spill] sm:$0xff] %v6494_v24  ;;  %v6509_v55 = vadd.f32 %v2994_v46, %v6381_v12  ;;  %v3016_v1 = vadd.f32 %v3008_v8, %v6392_v43  ;;  %v2907_v33 = vmul.f32 %v5858_v30, %v2873_v47  ;;  %v6516_v39 = vmul.f32 %v5847_v18, %v6422_v60  ;;  %v8085_v8 = vld [vmem:[#allocation31_spill] sm:$0xff] }
 0x186   :  { %v2823_v15 = vadd.f32 %v6396_v16, %v2791_v49  ;;  %v2018_v62 = vadd.f32 %v2010_v5, %v6426_v11  ;;  %v6522_v9 = vmul.f32 %v5851_v21, %v6430_v53  ;;  %v1988_v43 = vadd.f32 %v6415_v61, %v1960_v56  ;;  %v6537_v5 = vld [vmem:[#allocation2 + $0x92] sm:$0xff] }
 0x187   :  { %v3044_v12 = vadd.f32 %v3036_v32, %v3016_v1  ;;  %v2003_v38 = vadd.f32 %v6419_v6, %v1987_v10  ;;  %v6527_v46 = vmul.f32 %v5851_v21, %v2873_v47  ;;  %v6531_v60 = vmul.f32 %v6411_v42, %v5831_v7 }
 0x188   :  { %v2843_v16 = vadd.f32 %v2835_v19, %v2823_v15  ;;  %v6535_v11 = vmul.f32 %v5812_v57, %v8078_v20  ;;  %v6540_v32 = vadd.f32 %v2134_v37, %v6361_v48  ;;  %v2004_v61 = vadd.f32 %v1996_v0, %v1988_v43  ;;  %v6551_v20 = vld [vmem:[%s7975_s1 + $0x8] ss:$0 sm:$0xff] }
 0x189   :  { %8084 = vst [vmem:[#allocation24_spill] sm:$0xff] %v6531_v60  ;;  %v2802_v53 = vld [vmem:[#allocation3 + $0x51] sm:$0xff]  ;;  %v2019_v6 = vadd.f32 %v2011_v54, %v2003_v38  ;;  %v6543_v47 = vmul.f32 %v2030_v50, %v8058_v23  ;;  %v2046_v49 = vadd.f32 %v8085_v8, %v2018_v62  ;;  %v2070_v48 = vmul.f32 %v6551_v20, %v2030_v50 }
 0x18a   :  { %v2803_v56 = vld [vmem:[#allocation3 + $0x59] sm:$0xff]  ;;  %v2854_v42 = vmul.f32 %v5862_v36, %v2802_v53  ;;  %v3052_v19 = vmul.f32 %v5856_v29, %v2802_v53  ;;  %v2071_v52 = vmul.f32 %v6551_v20, %v6537_v5  ;;  %v6559_v10 = vmul.f32 %v5812_v57, %v8080_v25  ;;  %v6584_v60 = vld [vmem:[#allocation2 + $0x99] sm:$0xff] }
 0x18b   :  { %v2855_v0 = vmul.f32 %v5862_v36, %v2803_v56  ;;  %v2874_v37 = vld [vmem:[#allocation3 + $0x52] sm:$0xff]  ;;  %v2133_v1 = vmul.f32 %v5814_v58, %v8080_v25  ;;  %v2875_v15 = vld [vmem:[#allocation3 + $0x5a] sm:$0xff]  ;;  %v6568_v43 = vmul.f32 %v6474_v40, %v5825_v2  ;;  %v6571_v38 = vmul.f32 %v1971_v51, %v5825_v2 }
 0x18c   :  { %v2862_v54 = vadd.f32 %v2854_v42, %v6442_v41  ;;  %v6564_v62 = vadd.f32 %v3052_v19, %v3044_v12  ;;  %v2047_v24 = vadd.f32 %v8086_v44, %v2019_v6  ;;  %v6575_v59 = vmul.f32 %v1971_v51, %v5827_v4  ;;  %v8088_v41 = vld [vmem:[#allocation30_spill] sm:$0xff] }
 0x18d   :  { %v2863_v8 = vadd.f32 %v2855_v0, %v2843_v16  ;;  %v6578_v25 = vmul.f32 %v2030_v50, %v5831_v7  ;;  %v2926_v12 = vmul.f32 %v6188_v3, %v2874_v37  ;;  %v3038_v19 = vmul.f32 %v5847_v18, %v2802_v53 }
 0x18e   :  { %v2894_v42 = vadd.f32 %v8088_v41, %v2862_v54  ;;  %v2062_v40 = vadd.f32 %v6436_v28, %v2046_v49  ;;  %v2927_v44 = vmul.f32 %v6188_v3, %v2875_v15  ;;  %v6589_v51 = vmul.f32 %v5847_v18, %v2803_v56 }
 0x18f   :  { %8087 = vst [vmem:[#allocation38_spill] sm:$0xff] %v6578_v25  ;;  %v2895_v16 = vadd.f32 %v6404_v26, %v2863_v8  ;;  %v2063_v50 = vadd.f32 %v6440_v45, %v2047_v24  ;;  %v3053_v0 = vmul.f32 %v5856_v29, %v2803_v56  ;;  %v6595_v54 = vmul.f32 %v5851_v21, %v2874_v37 }
 0x190   :  { %v2914_v6 = vadd.f32 %v6460_v31, %v2894_v42  ;;  %v2078_v53 = vadd.f32 %v2070_v48, %v2062_v40  ;;  %v6598_v49 = vmul.f32 %v5851_v21, %v2875_v15  ;;  %v2012_v8 = vmul.f32 %v6584_v60, %v5837_v13  ;;  %v6611_v31 = vld [vmem:[%s7975_s1 + $0x9] ss:$0 sm:$0xff] }
 0x191   :  { %8089 = vst [vmem:[#allocation25_spill] sm:$0xff] %v6595_v54  ;;  %v2915_v28 = vadd.f32 %v2907_v33, %v2895_v16  ;;  %v2079_v26 = vadd.f32 %v2071_v52, %v2063_v50  ;;  %v6603_v25 = vmul.f32 %v5858_v30, %v2874_v37  ;;  %v6606_v45 = vmul.f32 %v5858_v30, %v2875_v15  ;;  %v1562_v33 = vpop.permute.xlu1 %1561  ;;  %v8091_v52 = vld [vmem:[#allocation36_spill] sm:$0xff]  ;;  %v8093_v40 = vld [vmem:[#allocation26_spill] sm:$0xff] }
 0x192   :  { %8090 = vst [vmem:[#allocation20_spill] sm:$0xff] %v6598_v49  ;;  %v2934_v41 = vadd.f32 %v2926_v12, %v2914_v6  ;;  %v2086_v24 = vadd.f32 %v6611_v31, %v2078_v53  ;;  %v2141_v42 = vadd.f32 %v2133_v1, %v8091_v52  ;;  %v2020_v12 = vadd.f32 %v2012_v8, %v2004_v61  ;;  %v8094_v50 = vld [vmem:[#allocation18_spill] sm:$0xff]  ;;  %v1557_v49 = vpop.permute.xlu0 %1556  ;;  %v8097_v61 = vld [vmem:[#allocation27_spill] sm:$0xff] }
 0x193   :  { %v2935_v56 = vadd.f32 %v2927_v44, %v2915_v28  ;;  %v2087_v48 = vadd.f32 %v6611_v31, %v2079_v26  ;;  %1644 = vst [vmem:[#allocation2 + $0x118] sm:$0xff] %v1562_v33  ;;  %v2136_v16 = vmul.f32 %v5814_v58, %v8093_v40  ;;  %v2150_v6 = vmul.f32 %v8094_v50, %v8093_v40  ;;  %v2032_v28 = vld [vmem:[#allocation2 + $0x9a] sm:$0xff]  ;;  %v8096_v26 = vld [vmem:[#allocation23_spill] sm:$0xff] }
 0x194   :  { %v6617_v37 = vadd.f32 %v6231_v35, %v2934_v41  ;;  %v2094_v15 = vmax.f32 %v2086_v24, 0.0  ;;  %v2048_v1 = vadd.f32 %v8096_v26, %v2020_v12  ;;  %v2149_v8 = vmul.f32 %v8094_v50, %v8097_v61  ;;  %1643 = vst [vmem:[#allocation2 + $0x110] sm:$0xff] %v1557_v49 }
 0x195   :  { %v6624_v53 = vadd.f32 %v6231_v35, %v2935_v56  ;;  %v2095_v44 = vmax.f32 %v2087_v48, 0.0  ;;  %v2072_v54 = vmul.f32 %v6551_v20, %v2032_v28 }
 0x196   :  { %8092 = vst [vmem:[#allocation31_spill] sm:$0xff] %v6617_v37  ;;  %2102 = vst [vmem:[#allocation3 + $0x68] sm:$0xff] %v2094_v15  ;;  %v6631_v24 = vmul.f32 %v5840_v14, %v2094_v15  ;;  %v2995_v33 = vmul.f32 %v5844_v17, %v2094_v15  ;;  %v3009_v52 = vmul.f32 %v5853_v22, %v2094_v15 }
 0x197   :  { %8095 = vst [vmem:[#allocation32_spill] sm:$0xff] %v6624_v53  ;;  %2103 = vst [vmem:[#allocation3 + $0x70] sm:$0xff] %v2095_v44  ;;  %v6637_v48 = vmul.f32 %v5840_v14, %v2095_v44  ;;  %v2996_v12 = vmul.f32 %v5844_v17, %v2095_v44  ;;  %v3010_v49 = vmul.f32 %v5853_v22, %v2095_v44 }
 0x198   :  { %v3003_v26 = vadd.f32 %v2995_v33, %v6490_v63  ;;  %v3017_v41 = vadd.f32 %v3009_v52, %v6504_v27  ;;  %v2064_v37 = vadd.f32 %v6543_v47, %v2048_v1  ;;  %v2135_v53 = vmul.f32 %v5814_v58, %v8097_v61  ;;  %v2169_v33 = vld [vmem:[#allocation2 + $0xa1] sm:$0xff] }
 0x199   :  { %8098 = vst [vmem:[#allocation30_spill] sm:$0xff] %v6637_v48  ;;  %v6646_v15 = vadd.f32 %v2996_v12, %v6497_v34  ;;  %v3018_v56 = vadd.f32 %v3010_v49, %v6509_v55  ;;  %v2157_v48 = vadd.f32 %v2149_v8, %v2141_v42  ;;  %v6653_v44 = vmul.f32 %v6537_v5, %v5831_v7 }
 0x19a   :  { %v2253_v63 = vmul.f32 %v6537_v5, %v8058_v23  ;;  %v3045_v27 = vadd.f32 %v6516_v39, %v3017_v41  ;;  %v2080_v47 = vadd.f32 %v2072_v54, %v2064_v37  ;;  %v6660_v34 = vmul.f32 %v5812_v57, %v8093_v40  ;;  %v8099_v39 = vld [vmem:[#allocation34_spill] sm:$0xff] }
 0x19b   :  { %v3046_v1 = vadd.f32 %v3038_v19, %v3018_v56  ;;  %v2158_v55 = vadd.f32 %v2150_v6, %v6540_v32  ;;  %v2194_v42 = vmul.f32 %v6584_v60, %v5827_v4  ;;  %v6666_v52 = vadd.f32 %v2136_v16, %v6535_v11 }
 0x19c   :  { %v3061_v8 = vadd.f32 %v3053_v0, %v3045_v27  ;;  %v6670_v5 = vmul.f32 %v5812_v57, %v8097_v61  ;;  %v2185_v19 = vadd.f32 %v8099_v39, %v2157_v48  ;;  %v2088_v40 = vadd.f32 %v6611_v31, %v2080_v47  ;;  %v2229_v0 = vld [vmem:[#allocation2 + $0xa2] sm:$0xff] }
 0x19d   :  { %v3028_v54 = vld [vmem:[#allocation3 + $0x61] sm:$0xff]  ;;  %v2186_v37 = vadd.f32 %v6568_v43, %v2158_v55  ;;  %v2143_v32 = vadd.f32 %v2135_v53, %v6559_v10  ;;  %v6678_v6 = vmul.f32 %v6584_v60, %v5825_v2  ;;  %v6683_v41 = vmul.f32 %v2169_v33, %v5825_v2 }
 0x19e   :  { %v3029_v11 = vld [vmem:[#allocation3 + $0x69] sm:$0xff]  ;;  %v3054_v16 = vmul.f32 %v3028_v54, %v5856_v29  ;;  %v3068_v61 = vmul.f32 %v3028_v54, %v5862_v36  ;;  %v2209_v56 = vmul.f32 %v2169_v33, %v5837_v13  ;;  %v6688_v10 = vmul.f32 %v2169_v33, %v5827_v4 }
 0x19f   :  { %8100 = vst [vmem:[#allocation36_spill] sm:$0xff] %v6683_v41  ;;  %v3069_v43 = vmul.f32 %v3029_v11, %v5862_v36  ;;  %v3088_v48 = vld [vmem:[#allocation3 + $0x62] sm:$0xff]  ;;  %v6690_v53 = vadd.f32 %v2194_v42, %v2186_v37  ;;  %v6693_v60 = vmul.f32 %v2032_v28, %v5831_v7  ;;  %v2201_v27 = vadd.f32 %v6575_v59, %v2185_v19 }
 0x1a0   :  { %v6695_v12 = vadd.f32 %v3054_v16, %v3046_v1  ;;  %v3076_v49 = vadd.f32 %v3068_v61, %v6564_v62  ;;  %v6700_v47 = vmul.f32 %v2229_v0, %v5831_v7  ;;  %v2096_v39 = vmax.f32 %v2088_v40, 0.0  ;;  %v3089_v1 = vld [vmem:[#allocation3 + $0x6a] sm:$0xff] }
 0x1a1   :  { %8101 = vst [vmem:[#allocation26_spill] sm:$0xff] %v6693_v60  ;;  %v3077_v55 = vadd.f32 %v3069_v43, %v3061_v8  ;;  %v6703_v41 = vmul.f32 %v2032_v28, %v8058_v23  ;;  %v6706_v33 = vmul.f32 %v2229_v0, %v8058_v23  ;;  %v6709_v42 = vmul.f32 %v3028_v54, %v5847_v18  ;;  %v8104_v43 = vld [vmem:[#allocation24_spill] sm:$0xff] }
 0x1a2   :  { %8102 = vst [vmem:[#allocation23_spill] sm:$0xff] %v6700_v47  ;;  %v6712_v37 = vmul.f32 %v3088_v48, %v5851_v21  ;;  %v3104_v59 = vadd.f32 %v6522_v9, %v3076_v49  ;;  %v2217_v62 = vadd.f32 %v2209_v56, %v2201_v27  ;;  %2104 = vst [vmem:[#allocation3 + $0x78] sm:$0xff] %v2096_v39  ;;  %v8105_v47 = vld [vmem:[#allocation28_spill] sm:$0xff] }
 0x1a3   :  { %v3105_v19 = vadd.f32 %v6527_v46, %v3077_v55  ;;  %v6717_v8 = vmul.f32 %v5840_v14, %v2096_v39  ;;  %v2997_v28 = vmul.f32 %v5844_v17, %v2096_v39  ;;  %v3011_v40 = vmul.f32 %v5853_v22, %v2096_v39 }
 0x1a4   :  { %8103 = vst [vmem:[#allocation27_spill] sm:$0xff] %v6712_v37  ;;  %v3055_v54 = vmul.f32 %v3029_v11, %v5856_v29  ;;  %v3120_v16 = vadd.f32 %v6603_v25, %v3104_v59  ;;  %v3128_v61 = vmul.f32 %v6188_v3, %v3088_v48  ;;  %v2245_v37 = vadd.f32 %v8104_v43, %v2217_v62  ;;  %v1572_v43 = vpop.permute.xlu1 %1571 }
 0x1a5   :  { %v3121_v9 = vadd.f32 %v6606_v45, %v3105_v19  ;;  %v3129_v46 = vmul.f32 %v6188_v3, %v3089_v1  ;;  %v6728_v56 = vadd.f32 %v2997_v28, %v6631_v24  ;;  %v3019_v49 = vadd.f32 %v3011_v40, %v3003_v26  ;;  %v8106_v45 = vld [vmem:[#allocation29_spill] sm:$0xff]  ;;  %1646 = vst [vmem:[#allocation2 + $0x128] sm:$0xff] %v1572_v43  ;;  %v4797_v28 = vld [vmem:[#allocation2 + $0xb0] sm:$0xff] }
 0x1a6   :  { %v3136_v27 = vadd.f32 %v3128_v61, %v3120_v16  ;;  %v2261_v55 = vadd.f32 %v2253_v63, %v2245_v37  ;;  %v2269_v39 = vmul.f32 %v6551_v20, %v2229_v0  ;;  %v2152_v60 = vmul.f32 %v8094_v50, %v8105_v47  ;;  %v4796_v0 = vld [vmem:[#allocation2 + $0xb8] sm:$0xff] }
 0x1a7   :  { %v6734_v25 = vmul.f32 %v3029_v11, %v5847_v18  ;;  %v3137_v59 = vadd.f32 %v3129_v46, %v3121_v9  ;;  %v3047_v62 = vadd.f32 %v6589_v51, %v3019_v49  ;;  %v2151_v19 = vmul.f32 %v8094_v50, %v8106_v45  ;;  %v1567_v11 = vpop.permute.xlu0 %1566 }
 0x1a8   :  { %v6740_v24 = vmul.f32 %v3089_v1, %v5851_v21  ;;  %v6743_v26 = vadd.f32 %v6231_v35, %v3136_v27  ;;  %v2277_v63 = vadd.f32 %v2269_v39, %v2261_v55  ;;  %v2138_v47 = vmul.f32 %v4796_v0, %v5814_v58  ;;  %1645 = vst [vmem:[#allocation2 + $0x120] sm:$0xff] %v1567_v11  ;;  %v2170_v55 = vld [vmem:[#allocation2 + $0xa9] sm:$0xff] }
 0x1a9   :  { %v6747_v37 = vadd.f32 %v6231_v35, %v3137_v59  ;;  %v6749_v51 = vadd.f32 %v3055_v54, %v3047_v62  ;;  %v2137_v40 = vmul.f32 %v4797_v28, %v5814_v58  ;;  %v2159_v16 = vadd.f32 %v2151_v19, %v2143_v32  ;;  %v3030_v49 = vld [vmem:[#allocation3 + $0x71] sm:$0xff] }
 0x1aa   :  { %8107 = vst [vmem:[#allocation34_spill] sm:$0xff] %v6743_v26  ;;  %v3114_v61 = vmul.f32 %v3088_v48, %v5858_v30  ;;  %v2285_v46 = vadd.f32 %v6611_v31, %v2277_v63  ;;  %v2160_v27 = vadd.f32 %v2152_v60, %v6666_v52  ;;  %v6757_v39 = vmul.f32 %v3089_v1, %v5858_v30  ;;  %v2171_v52 = vld [vmem:[#allocation2 + $0xb1] sm:$0xff] }
 0x1ab   :  { %8108 = vst [vmem:[#allocation24_spill] sm:$0xff] %v6747_v37  ;;  %v3070_v59 = vmul.f32 %v3030_v49, %v5862_v36  ;;  %v6762_v32 = vmul.f32 %v4796_v0, %v5812_v57  ;;  %v6765_v48 = vadd.f32 %v2138_v47, %v6660_v34  ;;  %v6769_v19 = vmul.f32 %v4797_v28, %v5812_v57 }
 0x1ac   :  { %v2293_v62 = vmax.f32 %v2285_v46, 0.0  ;;  %v2188_v45 = vadd.f32 %v6678_v6, %v2160_v27  ;;  %v6773_v1 = vadd.f32 %v2137_v40, %v6670_v5  ;;  %v6776_v43 = vmul.f32 %v2170_v55, %v5825_v2  ;;  %v3090_v6 = vld [vmem:[#allocation3 + $0x72] sm:$0xff] }
 0x1ad   :  { %v3078_v60 = vadd.f32 %v3070_v59, %v6695_v12  ;;  %v2187_v63 = vadd.f32 %v6571_v38, %v2159_v16  ;;  %v2210_v11 = vmul.f32 %v2170_v55, %v5837_v13  ;;  %v8109_v12 = vld [vmem:[#allocation25_spill] sm:$0xff]  ;;  %v2196_v5 = vmul.f32 %v2170_v55, %v5827_v4  ;;  %v8110_v38 = vld [vmem:[#allocation30_spill] sm:$0xff] }
 0x1ae   :  { %2301 = vst [vmem:[#allocation3 + $0x80] sm:$0xff] %v2293_v62  ;;  %v2998_v34 = vmul.f32 %v5844_v17, %v2293_v62  ;;  %v3012_v0 = vmul.f32 %v5853_v22, %v2293_v62  ;;  %v6782_v47 = vmul.f32 %v5840_v14, %v2293_v62  ;;  %v2211_v46 = vmul.f32 %v2171_v52, %v5837_v13 }
 0x1af   :  { %v3106_v28 = vadd.f32 %v8109_v12, %v3078_v60  ;;  %v2203_v40 = vadd.f32 %v6688_v10, %v2187_v63  ;;  %v3056_v59 = vmul.f32 %v3030_v49, %v5856_v29  ;;  %v2218_v62 = vadd.f32 %v2210_v11, %v6690_v53  ;;  %v2230_v12 = vld [vmem:[#allocation2 + $0xaa] sm:$0xff] }
 0x1b0   :  { %v6790_v16 = vadd.f32 %v2998_v34, %v8110_v38  ;;  %v3020_v27 = vadd.f32 %v3012_v0, %v6646_v15  ;;  %v3130_v9 = vmul.f32 %v6188_v3, %v3090_v6  ;;  %v6797_v60 = vmul.f32 %v2171_v52, %v5825_v2  ;;  %v8112_v15 = vld [vmem:[#allocation38_spill] sm:$0xff] }
 0x1b1   :  { %v3122_v54 = vadd.f32 %v3114_v61, %v3106_v28  ;;  %v2219_v55 = vadd.f32 %v2211_v46, %v2203_v40  ;;  %v6800_v10 = vmul.f32 %v3030_v49, %v5847_v18  ;;  %v6804_v34 = vmul.f32 %v3090_v6, %v5851_v21  ;;  %v2231_v28 = vld [vmem:[#allocation2 + $0xb2] sm:$0xff] }
 0x1b2   :  { %v3048_v63 = vadd.f32 %v6709_v42, %v3020_v27  ;;  %v2246_v0 = vadd.f32 %v8112_v15, %v2218_v62  ;;  %v6808_v53 = vmul.f32 %v3090_v6, %v5858_v30  ;;  %v2197_v11 = vmul.f32 %v2171_v52, %v5827_v4  ;;  %v4798_v62 = vld [vmem:[#allocation2 + $0xc8] sm:$0xff]  ;;  %v1582_v52 = vpop.permute.xlu1 %1581  ;;  %v2172_v15 = vld [vmem:[#allocation2 + $0xb9] sm:$0xff] }
 0x1b3   :  { %8111 = vst [vmem:[#allocation28_spill] sm:$0xff] %v6804_v34  ;;  %v3138_v61 = vadd.f32 %v3130_v9, %v3122_v54  ;;  %v2247_v40 = vadd.f32 %v6653_v44, %v2219_v55  ;;  %v2204_v49 = vadd.f32 %v2196_v5, %v2188_v45  ;;  %v2270_v42 = vmul.f32 %v6551_v20, %v2230_v12  ;;  %v6839_v34 = vld [vmem:[#allocation2 + $0xc0] sm:$0xff] }
 0x1b4   :  { %v6812_v46 = vadd.f32 %v3056_v59, %v3048_v63  ;;  %v2262_v38 = vadd.f32 %v6703_v41, %v2246_v0  ;;  %v2140_v9 = vmul.f32 %v4798_v62, %v5814_v58  ;;  %v2154_v54 = vmul.f32 %v4798_v62, %v8094_v50  ;;  %1648 = vst [vmem:[#allocation2 + $0x138] sm:$0xff] %v1582_v52 }
 0x1b5   :  { %v3031_v27 = vld [vmem:[#allocation3 + $0x79] sm:$0xff]  ;;  %v6817_v37 = vadd.f32 %v6231_v35, %v3138_v61  ;;  %v2263_v6 = vadd.f32 %v6706_v33, %v2247_v40  ;;  %v6824_v45 = vmul.f32 %v2230_v12, %v5831_v7  ;;  %v6827_v41 = vmul.f32 %v2231_v28, %v5831_v7 }
 0x1b6   :  { %v3071_v44 = vmul.f32 %v3031_v27, %v5862_v36  ;;  %v2271_v5 = vmul.f32 %v6551_v20, %v2231_v28  ;;  %v2256_v33 = vmul.f32 %v2230_v12, %v8058_v23  ;;  %v6833_v55 = vmul.f32 %v2231_v28, %v8058_v23  ;;  %v3091_v61 = vld [vmem:[#allocation3 + $0x7a] sm:$0xff] }
 0x1b7   :  { %8113 = vst [vmem:[#allocation29_spill] sm:$0xff] %v6817_v37  ;;  %8114 = vst [vmem:[#allocation25_spill] sm:$0xff] %v6824_v45  ;;  %v2278_v63 = vadd.f32 %v2270_v42, %v2262_v38  ;;  %v6837_v26 = vmul.f32 %v4798_v62, %v5812_v57  ;;  %v2139_v52 = vmul.f32 %v6839_v34, %v5814_v58  ;;  %v6850_v38 = vld [vmem:[#allocation2 + $0xc1] sm:$0xff] }
 0x1b8   :  { %8115 = vst [vmem:[#allocation30_spill] sm:$0xff] %v6827_v41  ;;  %v3079_v0 = vadd.f32 %v3071_v44, %v6749_v51  ;;  %v2279_v40 = vadd.f32 %v2271_v5, %v2263_v6  ;;  %v6845_v12 = vadd.f32 %v2140_v9, %v6762_v32  ;;  %v2162_v28 = vadd.f32 %v2154_v54, %v6765_v48  ;;  %v8117_v6 = vld [vmem:[#allocation20_spill] sm:$0xff]  ;;  %v1577_v54 = vpop.permute.xlu0 %1576 }
 0x1b9   :  { %8116 = vst [vmem:[#allocation38_spill] sm:$0xff] %v6837_v26  ;;  %v2286_v59 = vadd.f32 %v6611_v31, %v2278_v63  ;;  %v2153_v51 = vmul.f32 %v6839_v34, %v8094_v50  ;;  %v6853_v42 = vmul.f32 %v3031_v27, %v5847_v18  ;;  %v2212_v5 = vmul.f32 %v2172_v15, %v5837_v13 }
 0x1ba   :  { %v3107_v62 = vadd.f32 %v8117_v6, %v3079_v0  ;;  %v2287_v44 = vadd.f32 %v6611_v31, %v2279_v40  ;;  %v3057_v63 = vmul.f32 %v3031_v27, %v5856_v29  ;;  %v3131_v32 = vmul.f32 %v6188_v3, %v3091_v61  ;;  %1647 = vst [vmem:[#allocation2 + $0x130] sm:$0xff] %v1577_v54  ;;  %v8118_v3 = vld [vmem:[#allocation36_spill] sm:$0xff] }
 0x1bb   :  { %v2294_v9 = vmax.f32 %v2286_v59, 0.0  ;;  %v2161_v48 = vadd.f32 %v2153_v51, %v6773_v1  ;;  %v2213_v26 = vmul.f32 %v6850_v38, %v5837_v13  ;;  %v2220_v45 = vadd.f32 %v2212_v5, %v2204_v49  ;;  %v8119_v5 = vld [vmem:[#allocation26_spill] sm:$0xff] }
 0x1bc   :  { %v3123_v37 = vadd.f32 %v6757_v39, %v3107_v62  ;;  %v2295_v41 = vmax.f32 %v2287_v44, 0.0 }
 0x1bd   :  { %2302 = vst [vmem:[#allocation3 + $0x88] sm:$0xff] %v2294_v9  ;;  %v2999_v0 = vmul.f32 %v5844_v17, %v2294_v9  ;;  %v3013_v40 = vmul.f32 %v5853_v22, %v2294_v9  ;;  %v6867_v27 = vmul.f32 %v5840_v14, %v2294_v9  ;;  %v2189_v59 = vadd.f32 %v8118_v3, %v2161_v48  ;;  %v2232_v3 = vld [vmem:[#allocation2 + $0xba] sm:$0xff] }
 0x1be   :  { %v3139_v1 = vadd.f32 %v3131_v32, %v3123_v37  ;;  %2303 = vst [vmem:[#allocation3 + $0x90] sm:$0xff] %v2295_v41  ;;  %v3014_v39 = vmul.f32 %v5853_v22, %v2295_v41  ;;  %v6872_v51 = vmul.f32 %v5840_v14, %v2295_v41  ;;  %v3196_v49 = vmul.f32 %v5844_v17, %v2295_v41 }
 0x1bf   :  { %v6876_v6 = vadd.f32 %v2999_v0, %v6717_v8  ;;  %v3021_v62 = vadd.f32 %v3013_v40, %v6728_v56  ;;  %v2205_v44 = vadd.f32 %v2197_v11, %v2189_v59  ;;  %v2248_v9 = vadd.f32 %v8119_v5, %v2220_v45 }
 0x1c0   :  { %v6881_v54 = vadd.f32 %v6231_v35, %v3139_v1  ;;  %v3022_v37 = vadd.f32 %v3014_v39, %v6790_v16  ;;  %v6885_v32 = vadd.f32 %v3196_v49, %v6782_v47  ;;  %v2198_v48 = vmul.f32 %v2172_v15, %v5827_v4  ;;  %v2233_v1 = vld [vmem:[#allocation2 + $0xc2] sm:$0xff]  ;;  %v1592_v49 = vpop.permute.xlu1 %1591  ;;  %v6963_v35 = vld [vmem:[#allocation2 + $0xd0] sm:$0xff] }
 0x1c1   :  { %v6889_v41 = vmul.f32 %v3091_v61, %v5851_v21  ;;  %v3049_v8 = vadd.f32 %v6734_v25, %v3021_v62  ;;  %v2221_v56 = vadd.f32 %v2213_v26, %v2205_v44  ;;  %v2264_v11 = vadd.f32 %v2256_v33, %v2248_v9  ;;  %1650 = vst [vmem:[#allocation2 + $0x148] sm:$0xff] %v1592_v49 }
 0x1c2   :  { %8120 = vst [vmem:[#allocation20_spill] sm:$0xff] %v6881_v54  ;;  %v3117_v45 = vmul.f32 %v3091_v61, %v5858_v30  ;;  %v3050_v0 = vadd.f32 %v6800_v10, %v3022_v37  ;;  %v2190_v16 = vadd.f32 %v6776_v43, %v2162_v28  ;;  %v2147_v40 = vadd.f32 %v2139_v52, %v6769_v19  ;;  %v8122_v43 = vld [vmem:[#allocation23_spill] sm:$0xff] }
 0x1c3   :  { %v3065_v47 = vadd.f32 %v3057_v63, %v3049_v8  ;;  %v6898_v59 = vmul.f32 %v2172_v15, %v5825_v2  ;;  %v2272_v39 = vmul.f32 %v6551_v20, %v2232_v3  ;;  %v6903_v26 = vmul.f32 %v6850_v38, %v5827_v4 }
 0x1c4   :  { %v3032_v25 = vld [vmem:[#allocation3 + $0x81] sm:$0xff]  ;;  %v6905_v33 = vadd.f32 %v2198_v48, %v2190_v16  ;;  %v6908_v10 = vmul.f32 %v2232_v3, %v5831_v7  ;;  %v2249_v61 = vadd.f32 %v8122_v43, %v2221_v56  ;;  %v6916_v52 = vmul.f32 %v2232_v3, %v8058_v23 }
 0x1c5   :  { %v6911_v28 = vld [vmem:[#allocation3 + $0x89] sm:$0xff]  ;;  %v3058_v19 = vmul.f32 %v3032_v25, %v5856_v29  ;;  %v3072_v15 = vmul.f32 %v3032_v25, %v5862_v36  ;;  %v2280_v63 = vadd.f32 %v2272_v39, %v2264_v11  ;;  %v6923_v5 = vmul.f32 %v2233_v1, %v8058_v23 }
 0x1c6   :  { %8121 = vst [vmem:[#allocation36_spill] sm:$0xff] %v6908_v10  ;;  %v3073_v62 = vmul.f32 %v6911_v28, %v5862_v36  ;;  %v6920_v44 = vld [vmem:[#allocation3 + $0x82] sm:$0xff]  ;;  %v2273_v9 = vmul.f32 %v6551_v20, %v2233_v1  ;;  %v6928_v37 = vmul.f32 %v6839_v34, %v5812_v57  ;;  %v6933_v8 = vld [vmem:[#allocation3 + $0x8a] sm:$0xff]  ;;  %v6937_v56 = vmul.f32 %v6850_v38, %v5825_v2 }
 0x1c7   :  { %v6930_v48 = vadd.f32 %v3058_v19, %v3050_v0  ;;  %v3080_v3 = vadd.f32 %v3072_v15, %v6812_v46  ;;  %v4800_v11 = vld [vmem:[#allocation2 + $0xd8] sm:$0xff]  ;;  %v2265_v43 = vadd.f32 %v6833_v55, %v2249_v61  ;;  %v6942_v34 = vmul.f32 %v2233_v1, %v5831_v7  ;;  %v8126_v19 = vld [vmem:[#allocation27_spill] sm:$0xff]  ;;  %v6953_v38 = vld [vmem:[%s7975_s1 + $0x12] ss:$0 sm:$0xff] }
 0x1c8   :  { %8123 = vst [vmem:[#allocation26_spill] sm:$0xff] %v6937_v56  ;;  %v2156_v16 = vmul.f32 %v4800_v11, %v8094_v50  ;;  %v3081_v39 = vadd.f32 %v3073_v62, %v3065_v47  ;;  %v6945_v0 = vmul.f32 %v4800_v11, %v5812_v57  ;;  %v3059_v46 = vmul.f32 %v6911_v28, %v5856_v29  ;;  %v6958_v1 = vld [vmem:[#allocation2 + $0xc9] sm:$0xff]  ;;  %v6971_v10 = vld [vmem:[#allocation2 + $0xd1] sm:$0xff] }
 0x1c9   :  { %8124 = vst [vmem:[#allocation23_spill] sm:$0xff] %v6942_v34  ;;  %v3108_v15 = vadd.f32 %v8126_v19, %v3080_v3  ;;  %v3132_v47 = vmul.f32 %v6953_v38, %v6920_v44  ;;  %v2288_v55 = vadd.f32 %v6611_v31, %v2280_v63  ;;  %v3133_v49 = vmul.f32 %v6953_v38, %v6933_v8  ;;  %v1587_v19 = vpop.permute.xlu0 %1586 }
 0x1ca   :  { %8125 = vst [vmem:[#allocation41_spill] sm:$0xff] %v6945_v0  ;;  %v3109_v61 = vadd.f32 %v6740_v24, %v3081_v39  ;;  %v2281_v62 = vadd.f32 %v2273_v9, %v2265_v43  ;;  %v2155_v3 = vmul.f32 %v6963_v35, %v8094_v50  ;;  %v3240_v34 = vmul.f32 %v3032_v25, %v5847_v18 }
 0x1cb   :  { %v3124_v54 = vadd.f32 %v6808_v53, %v3108_v15  ;;  %v2296_v56 = vmax.f32 %v2288_v55, 0.0  ;;  %v2164_v63 = vadd.f32 %v2156_v16, %v6845_v12  ;;  %1649 = vst [vmem:[#allocation2 + $0x140] sm:$0xff] %v1587_v19  ;;  %v2214_v9 = vmul.f32 %v6958_v1, %v5837_v13  ;;  %v6985_v15 = vld [vmem:[%s7975_s1 + $0x13] ss:$0 sm:$0xff] }
 0x1cc   :  { %v3125_v0 = vadd.f32 %v3117_v45, %v3109_v61  ;;  %v2289_v24 = vadd.f32 %v6611_v31, %v2281_v62  ;;  %v2163_v39 = vadd.f32 %v2155_v3, %v2147_v40  ;;  %v2338_v45 = vmul.f32 %v4800_v11, %v5814_v58 }
 0x1cd   :  { %v3140_v43 = vadd.f32 %v3132_v47, %v3124_v54  ;;  %2304 = vst [vmem:[#allocation3 + $0x98] sm:$0xff] %v2296_v56  ;;  %v3015_v7 = vmul.f32 %v5853_v22, %v2296_v56  ;;  %v6977_v53 = vmul.f32 %v5840_v14, %v2296_v56  ;;  %v3197_v25 = vmul.f32 %v5844_v17, %v2296_v56 }
 0x1ce   :  { %v3141_v12 = vadd.f32 %v3133_v49, %v3125_v0  ;;  %v2297_v16 = vmax.f32 %v2289_v24, 0.0  ;;  %v2191_v40 = vadd.f32 %v6797_v60, %v2163_v39  ;;  %v2215_v56 = vmul.f32 %v6971_v10, %v5837_v13  ;;  %v1602_v39 = vpop.permute.xlu1 %1601 }
 0x1cf   :  { %v6988_v54 = vadd.f32 %v6985_v15, %v3140_v43  ;;  %v3023_v47 = vadd.f32 %v3015_v7, %v6876_v6  ;;  %v6992_v55 = vadd.f32 %v3197_v25, %v6867_v27  ;;  %v2222_v6 = vadd.f32 %v2214_v9, %v6905_v33  ;;  %1652 = vst [vmem:[#allocation2 + $0x158] sm:$0xff] %v1602_v39 }
 0x1d0   :  { %v6997_v11 = vadd.f32 %v6985_v15, %v3141_v12  ;;  %2305 = vst [vmem:[#allocation3 + $0xa0] sm:$0xff] %v2297_v16  ;;  %v7000_v60 = vmul.f32 %v5840_v14, %v2297_v16  ;;  %v3198_v0 = vmul.f32 %v5844_v17, %v2297_v16  ;;  %v3212_v61 = vmul.f32 %v5853_v22, %v2297_v16  ;;  %v8129_v12 = vld [vmem:[#allocation25_spill] sm:$0xff] }
 0x1d1   :  { %8127 = vst [vmem:[#allocation27_spill] sm:$0xff] %v6988_v54  ;;  %v3051_v7 = vadd.f32 %v6853_v42, %v3023_v47  ;;  %v2207_v27 = vadd.f32 %v6903_v26, %v2191_v40  ;;  %v2200_v24 = vmul.f32 %v6958_v1, %v5827_v4  ;;  %v3118_v43 = vmul.f32 %v6920_v44, %v5858_v30  ;;  %v7025_v40 = vld [vmem:[#allocation2 + $0xca] sm:$0xff] }
 0x1d2   :  { %8128 = vst [vmem:[#allocation42_spill] sm:$0xff] %v6997_v11  ;;  %v7010_v3 = vadd.f32 %v3198_v0, %v6872_v51  ;;  %v3220_v19 = vadd.f32 %v3212_v61, %v6885_v32  ;;  %v2250_v26 = vadd.f32 %v8129_v12, %v2222_v6  ;;  %v3119_v33 = vmul.f32 %v6933_v8, %v5858_v30 }
 0x1d3   :  { %v3067_v25 = vadd.f32 %v3059_v46, %v3051_v7  ;;  %v2223_v42 = vadd.f32 %v2215_v56, %v2207_v27  ;;  %v7022_v51 = vmul.f32 %v6911_v28, %v5847_v18  ;;  %v2192_v16 = vadd.f32 %v6898_v59, %v2164_v63  ;;  %v7037_v28 = vld [vmem:[#allocation2 + $0xd2] sm:$0xff]  ;;  %v8131_v63 = vld [vmem:[#allocation30_spill] sm:$0xff] }
 0x1d4   :  { %v3034_v32 = vld [vmem:[#allocation3 + $0x91] sm:$0xff]  ;;  %v3248_v9 = vadd.f32 %v3240_v34, %v3220_v19  ;;  %v7029_v46 = vmul.f32 %v6920_v44, %v5851_v21  ;;  %v7033_v47 = vmul.f32 %v6933_v8, %v5851_v21  ;;  %v8130_v34 = vld [vmem:[#allocation38_spill] sm:$0xff]  ;;  %v2266_v44 = vadd.f32 %v6916_v52, %v2250_v26 }
 0x1d5   :  { %v3074_v56 = vmul.f32 %v3034_v32, %v5862_v36  ;;  %v3256_v0 = vmul.f32 %v3034_v32, %v5856_v29  ;;  %v3094_v61 = vld [vmem:[#allocation3 + $0x92] sm:$0xff]  ;;  %v7040_v7 = vadd.f32 %v2338_v45, %v8130_v34  ;;  %v7042_v59 = vadd.f32 %v2200_v24, %v2192_v16  ;;  %v8132_v26 = vld [vmem:[#allocation28_spill] sm:$0xff]  ;;  %v1597_v34 = vpop.permute.xlu0 %1596 }
 0x1d6   :  { %v2251_v27 = vadd.f32 %v8131_v63, %v2223_v42  ;;  %v7051_v39 = vmul.f32 %v7025_v40, %v8058_v23  ;;  %v2337_v12 = vmul.f32 %v6963_v35, %v5814_v58  ;;  %v2274_v24 = vmul.f32 %v6551_v20, %v7025_v40  ;;  %1651 = vst [vmem:[#allocation2 + $0x150] sm:$0xff] %v1597_v34 }
 0x1d7   :  { %v3035_v6 = vld [vmem:[#allocation3 + $0x99] sm:$0xff]  ;;  %v3082_v8 = vadd.f32 %v3074_v56, %v6930_v48  ;;  %v7047_v19 = vadd.f32 %v3256_v0, %v3248_v9  ;;  %v2275_v52 = vmul.f32 %v6551_v20, %v7037_v28  ;;  %v7062_v48 = vmul.f32 %v6963_v35, %v5812_v57 }
 0x1d8   :  { %v3075_v45 = vmul.f32 %v3035_v6, %v5862_v36  ;;  %v3095_v42 = vld [vmem:[#allocation3 + $0x9a] sm:$0xff]  ;;  %v3134_v16 = vmul.f32 %v6953_v38, %v3094_v61  ;;  %v3242_v56 = vmul.f32 %v3034_v32, %v5847_v18  ;;  %v2267_v0 = vadd.f32 %v6923_v5, %v2251_v27 }
 0x1d9   :  { %v3110_v9 = vadd.f32 %v8132_v26, %v3082_v8  ;;  %v7069_v62 = vmul.f32 %v3094_v61, %v5851_v21  ;;  %v7072_v49 = vmul.f32 %v3094_v61, %v5858_v30  ;;  %v2282_v11 = vadd.f32 %v2274_v24, %v2266_v44 }
 0x1da   :  { %v3083_v63 = vadd.f32 %v3075_v45, %v3067_v25  ;;  %v2283_v54 = vadd.f32 %v2275_v52, %v2267_v0  ;;  %v7075_v8 = vadd.f32 %v2337_v12, %v6928_v37  ;;  %v2382_v32 = vmul.f32 %v6958_v1, %v5825_v2  ;;  %v7085_v45 = vld [vmem:[#allocation2 + $0xd9] sm:$0xff] }
 0x1db   :  { %v3126_v35 = vadd.f32 %v3118_v43, %v3110_v9  ;;  %v3135_v25 = vmul.f32 %v6953_v38, %v3095_v42  ;;  %v7082_v27 = vmul.f32 %v3035_v6, %v5847_v18  ;;  %v2290_v61 = vadd.f32 %v6611_v31, %v2282_v11  ;;  %v4804_v9 = vld [vmem:[#allocation2 + $0xe8] sm:$0xff] }
 0x1dc   :  { %v3111_v5 = vadd.f32 %v6889_v41, %v3083_v63  ;;  %v3257_v43 = vmul.f32 %v3035_v6, %v5856_v29  ;;  %v7089_v37 = vmul.f32 %v3095_v42, %v5851_v21  ;;  %v2291_v12 = vadd.f32 %v6611_v31, %v2283_v54  ;;  %v1607_v54 = vpop.permute.xlu0 %1606 }
 0x1dd   :  { %v3142_v44 = vadd.f32 %v3134_v16, %v3126_v35  ;;  %v7093_v41 = vmul.f32 %v3095_v42, %v5858_v30  ;;  %v2298_v24 = vmax.f32 %v2290_v61, 0.0  ;;  %v7097_v52 = vmul.f32 %v6971_v10, %v5825_v2  ;;  %1653 = vst [vmem:[#allocation2 + $0x160] sm:$0xff] %v1607_v54 }
 0x1de   :  { %8133 = vst [vmem:[#allocation25_spill] sm:$0xff] %v7089_v37  ;;  %v3127_v1 = vadd.f32 %v3119_v33, %v3111_v5  ;;  %v2299_v26 = vmax.f32 %v2291_v12, 0.0  ;;  %v2354_v6 = vmul.f32 %v4804_v9, %v8094_v50  ;;  %v2216_v16 = vmul.f32 %v7085_v45, %v5837_v13 }
 0x1df   :  { %v7100_v11 = vadd.f32 %v6985_v15, %v3142_v44  ;;  %2306 = vst [vmem:[#allocation3 + $0xa8] sm:$0xff] %v2298_v24  ;;  %v7106_v42 = vmul.f32 %v5840_v14, %v2298_v24  ;;  %v3199_v0 = vmul.f32 %v5844_v17, %v2298_v24  ;;  %v3213_v34 = vmul.f32 %v5853_v22, %v2298_v24 }
 0x1e0   :  { %v3143_v33 = vadd.f32 %v3135_v25, %v3127_v1  ;;  %2307 = vst [vmem:[#allocation3 + $0xb0] sm:$0xff] %v2299_v26  ;;  %v7112_v35 = vmul.f32 %v5840_v14, %v2299_v26  ;;  %v3200_v5 = vmul.f32 %v5844_v17, %v2299_v26  ;;  %v3214_v61 = vmul.f32 %v5853_v22, %v2299_v26 }
 0x1e1   :  { %8134 = vst [vmem:[#allocation38_spill] sm:$0xff] %v7100_v11  ;;  %v2397_v44 = vmul.f32 %v6971_v10, %v5827_v4  ;;  %v7122_v12 = vadd.f32 %v3199_v0, %v6977_v53  ;;  %v3221_v1 = vadd.f32 %v3213_v34, %v6992_v55  ;;  %v2340_v63 = vmul.f32 %v4804_v9, %v5814_v58  ;;  %v8137_v11 = vld [vmem:[#allocation19_spill] sm:$0xff]  ;;  %v7137_v53 = vld [vmem:[#allocation2 + $0xda] sm:$0xff]  ;;  %v8138_v34 = vld [vmem:[#allocation36_spill] sm:$0xff] }
 0x1e2   :  { %v7117_v25 = vadd.f32 %v6985_v15, %v3143_v33  ;;  %v7126_v24 = vadd.f32 %v3200_v5, %v7000_v60  ;;  %v3222_v54 = vadd.f32 %v3214_v61, %v7010_v3  ;;  %v2224_v26 = vadd.f32 %v2216_v16, %v7042_v59  ;;  %v4805_v55 = vld [vmem:[#allocation2 + $0xe0] sm:$0xff] }
 0x1e3   :  { %v7134_v37 = vmul.f32 %v7025_v40, %v8137_v11  ;;  %v3249_v10 = vadd.f32 %v7022_v51, %v3221_v1  ;;  %v2353_v60 = vmul.f32 %v4805_v55, %v8094_v50  ;;  %v2362_v3 = vadd.f32 %v2354_v6, %v7040_v7  ;;  %v2373_v1 = vld [vmem:[#allocation2 + $0xe1] sm:$0xff] }
 0x1e4   :  { %8135 = vst [vmem:[#allocation30_spill] sm:$0xff] %v7117_v25  ;;  %8136 = vst [vmem:[#allocation28_spill] sm:$0xff] %v7126_v24  ;;  %v3250_v0 = vadd.f32 %v3242_v56, %v3222_v54  ;;  %v2252_v5 = vadd.f32 %v8138_v34, %v2224_v26  ;;  %v2339_v59 = vmul.f32 %v4805_v55, %v5814_v58  ;;  %v8140_v54 = vld [vmem:[#allocation41_spill] sm:$0xff] }
 0x1e5   :  { %v7145_v16 = vmul.f32 %v7037_v28, %v8137_v11  ;;  %v7149_v40 = vmul.f32 %v7037_v28, %v8058_v23  ;;  %v3265_v51 = vadd.f32 %v3257_v43, %v3249_v10  ;;  %v7152_v61 = vmul.f32 %v4804_v9, %v5812_v57 }
 0x1e6   :  { %v3232_v56 = vld [vmem:[#allocation3 + $0xa1] sm:$0xff]  ;;  %v7155_v7 = vadd.f32 %v2340_v63, %v8140_v54  ;;  %v2390_v6 = vadd.f32 %v2382_v32, %v2362_v3  ;;  %v2268_v26 = vadd.f32 %v7051_v39, %v2252_v5  ;;  %v2276_v34 = vmul.f32 %v6551_v20, %v7137_v53 }
 0x1e7   :  { %8139 = vst [vmem:[#allocation19_spill] sm:$0xff] %v7145_v16  ;;  %v3233_v33 = vld [vmem:[#allocation3 + $0xa9] sm:$0xff]  ;;  %v3258_v25 = vmul.f32 %v3232_v56, %v5856_v29  ;;  %v3272_v28 = vmul.f32 %v3232_v56, %v5862_v36  ;;  %v7163_v43 = vmul.f32 %v4805_v55, %v5812_v57  ;;  %v2361_v9 = vadd.f32 %v2353_v60, %v7075_v8 }
 0x1e8   :  { %v3273_v10 = vmul.f32 %v3233_v33, %v5862_v36  ;;  %v3292_v63 = vld [vmem:[#allocation3 + $0xa2] sm:$0xff]  ;;  %v2347_v32 = vadd.f32 %v2339_v59, %v7062_v48  ;;  %v7170_v39 = vmul.f32 %v7085_v45, %v5825_v2  ;;  %v7173_v3 = vmul.f32 %v2373_v1, %v5825_v2  ;;  %v3293_v16 = vld [vmem:[#allocation3 + $0xaa] sm:$0xff] }
 0x1e9   :  { %v7175_v5 = vadd.f32 %v3258_v25, %v3250_v0  ;;  %v3280_v54 = vadd.f32 %v3272_v28, %v7047_v19  ;;  %v2398_v55 = vmul.f32 %v7085_v45, %v5827_v4  ;;  %v7181_v8 = vmul.f32 %v2373_v1, %v5827_v4  ;;  %v8143_v0 = vld [vmem:[#allocation26_spill] sm:$0xff] }
 0x1ea   :  { %v3281_v60 = vadd.f32 %v3273_v10, %v3265_v51  ;;  %v2284_v48 = vadd.f32 %v2276_v34, %v2268_v26  ;;  %v2413_v59 = vmul.f32 %v2373_v1, %v5837_v13  ;;  %v7186_v24 = vmul.f32 %v7137_v53, %v8137_v11 }
 0x1eb   :  { %v7189_v25 = vmul.f32 %v3232_v56, %v5847_v18  ;;  %v7192_v19 = vmul.f32 %v3292_v63, %v5851_v21  ;;  %v3308_v45 = vadd.f32 %v7029_v46, %v3280_v54  ;;  %v2389_v28 = vadd.f32 %v8143_v0, %v2361_v9  ;;  %v2433_v0 = vld [vmem:[#allocation2 + $0xe2] sm:$0xff] }
 0x1ec   :  { %8141 = vst [vmem:[#allocation36_spill] sm:$0xff] %v7186_v24  ;;  %v7197_v51 = vmul.f32 %v3233_v33, %v5847_v18  ;;  %v3259_v26 = vmul.f32 %v3233_v33, %v5856_v29  ;;  %v3309_v1 = vadd.f32 %v7033_v47, %v3281_v60  ;;  %v2292_v34 = vadd.f32 %v6611_v31, %v2284_v48 }
 0x1ed   :  { %8142 = vst [vmem:[#allocation41_spill] sm:$0xff] %v7192_v19  ;;  %v7203_v10 = vmul.f32 %v3293_v16, %v5851_v21  ;;  %v3324_v56 = vadd.f32 %v7072_v49, %v3308_v45  ;;  %v3332_v19 = vmul.f32 %v6953_v38, %v3292_v63  ;;  %v2405_v24 = vadd.f32 %v2397_v44, %v2389_v28 }
 0x1ee   :  { %8144 = vst [vmem:[#allocation26_spill] sm:$0xff] %v7197_v51  ;;  %v7208_v46 = vmul.f32 %v3292_v63, %v5858_v30  ;;  %v3325_v9 = vadd.f32 %v7093_v41, %v3309_v1  ;;  %v3333_v54 = vmul.f32 %v6953_v38, %v3293_v16  ;;  %v2300_v33 = vmax.f32 %v2292_v34, 0.0 }
 0x1ef   :  { %8145 = vst [vmem:[#allocation43_spill] sm:$0xff] %v7203_v10  ;;  %v7213_v47 = vmul.f32 %v3293_v16, %v5858_v30  ;;  %v3340_v60 = vadd.f32 %v3332_v19, %v3324_v56  ;;  %v2406_v48 = vadd.f32 %v2398_v55, %v2390_v6  ;;  %v2421_v10 = vadd.f32 %v2413_v59, %v2405_v24  ;;  %v8147_v16 = vld [vmem:[#allocation23_spill] sm:$0xff]  ;;  %v4806_v19 = vld [vmem:[#allocation2 + $0xf8] sm:$0xff] }
 0x1f0   :  { %v3341_v51 = vadd.f32 %v3333_v54, %v3325_v9  ;;  %2308 = vst [vmem:[#allocation3 + $0xb8] sm:$0xff] %v2300_v33  ;;  %v7216_v49 = vmul.f32 %v5840_v14, %v2300_v33  ;;  %v3201_v44 = vmul.f32 %v5844_v17, %v2300_v33  ;;  %v3215_v63 = vmul.f32 %v5853_v22, %v2300_v33  ;;  %v2374_v54 = vld [vmem:[#allocation2 + $0xe9] sm:$0xff] }
 0x1f1   :  { %v7221_v41 = vadd.f32 %v6985_v15, %v3340_v60  ;;  %v7224_v45 = vmul.f32 %v2433_v0, %v8137_v11  ;;  %v2449_v28 = vadd.f32 %v8147_v16, %v2421_v10  ;;  %v2473_v6 = vmul.f32 %v6551_v20, %v2433_v0  ;;  %v4807_v10 = vld [vmem:[#allocation2 + $0xf0] sm:$0xff] }
 0x1f2   :  { %v7229_v24 = vadd.f32 %v6985_v15, %v3341_v51  ;;  %v7232_v55 = vadd.f32 %v3201_v44, %v7106_v42  ;;  %v3223_v59 = vadd.f32 %v3215_v63, %v7122_v12  ;;  %v2356_v1 = vmul.f32 %v4806_v19, %v8094_v50  ;;  %v2375_v60 = vld [vmem:[#allocation2 + $0xf1] sm:$0xff] }
 0x1f3   :  { %8146 = vst [vmem:[#allocation44_spill] sm:$0xff] %v7221_v41  ;;  %v2465_v56 = vadd.f32 %v7149_v40, %v2449_v28  ;;  %v2342_v9 = vmul.f32 %v4806_v19, %v5814_v58  ;;  %v2355_v20 = vmul.f32 %v4807_v10, %v8094_v50  ;;  %v2458_v42 = vmul.f32 %v7137_v53, %v8058_v23 }
 0x1f4   :  { %8148 = vst [vmem:[#allocation23_spill] sm:$0xff] %v7229_v24  ;;  %v3251_v12 = vadd.f32 %v7082_v27, %v3223_v59  ;;  %v2341_v33 = vmul.f32 %v4807_v10, %v5814_v58  ;;  %v2459_v44 = vmul.f32 %v2433_v0, %v8058_v23  ;;  %v7247_v40 = vmul.f32 %v4806_v19, %v5812_v57 }
 0x1f5   :  { %v2481_v63 = vadd.f32 %v2473_v6, %v2465_v56  ;;  %v2363_v16 = vadd.f32 %v2355_v20, %v2347_v32  ;;  %v2364_v34 = vadd.f32 %v2356_v1, %v7155_v7  ;;  %v7253_v51 = vmul.f32 %v4807_v10, %v5812_v57  ;;  %v2434_v32 = vld [vmem:[#allocation2 + $0xea] sm:$0xff] }
 0x1f6   :  { %v7249_v28 = vadd.f32 %v3259_v26, %v3251_v12  ;;  %v2414_v53 = vmul.f32 %v2374_v54, %v5837_v13  ;;  %v7258_v24 = vadd.f32 %v2342_v9, %v7152_v61  ;;  %v2415_v6 = vmul.f32 %v2375_v60, %v5837_v13  ;;  %v2435_v9 = vld [vmem:[#allocation2 + $0xf2] sm:$0xff] }
 0x1f7   :  { %v2489_v27 = vadd.f32 %v6611_v31, %v2481_v63  ;;  %v3234_v59 = vld [vmem:[#allocation3 + $0xb1] sm:$0xff]  ;;  %v2391_v0 = vadd.f32 %v7097_v52, %v2363_v16  ;;  %v2392_v7 = vadd.f32 %v7170_v39, %v2364_v34  ;;  %v2349_v19 = vadd.f32 %v2341_v33, %v7163_v43 }
 0x1f8   :  { %v3274_v26 = vmul.f32 %v3234_v59, %v5862_v36  ;;  %v2400_v1 = vmul.f32 %v2374_v54, %v5827_v4  ;;  %v7267_v31 = vmul.f32 %v2374_v54, %v5825_v2  ;;  %v7270_v61 = vmul.f32 %v2375_v60, %v5825_v2  ;;  %v3294_v12 = vld [vmem:[#allocation3 + $0xb2] sm:$0xff] }
 0x1f9   :  { %v2497_v56 = vmax.f32 %v2489_v27, 0.0  ;;  %v2407_v52 = vadd.f32 %v7181_v8, %v2391_v0  ;;  %v7275_v20 = vmul.f32 %v2375_v60, %v5827_v4  ;;  %v2422_v39 = vadd.f32 %v2414_v53, %v2406_v48  ;;  %v8152_v53 = vld [vmem:[#allocation28_spill] sm:$0xff] }
 0x1fa   :  { %8149 = vst [vmem:[#allocation45_spill] sm:$0xff] %v7270_v61  ;;  %v3282_v10 = vadd.f32 %v3274_v26, %v7175_v5  ;;  %v7278_v43 = vmul.f32 %v2434_v32, %v8137_v11  ;;  %v7286_v5 = vadd.f32 %v2400_v1, %v2392_v7  ;;  %v7289_v60 = vmul.f32 %v2435_v9, %v8137_v11  ;;  %v8153_v26 = vld [vmem:[#allocation19_spill] sm:$0xff]  ;;  %v7301_v7 = vld [vmem:[%s7975_s1 + $0x8] ss:$0 sm:$0xff] }
 0x1fb   :  { %2505 = vst [vmem:[#allocation3 + $0xc0] sm:$0xff] %v2497_v56  ;;  %v3202_v34 = vmul.f32 %v5844_v17, %v2497_v56  ;;  %v3216_v54 = vmul.f32 %v5853_v22, %v2497_v56  ;;  %v7283_v33 = vmul.f32 %v5840_v14, %v2497_v56  ;;  %v2423_v8 = vadd.f32 %v2415_v6, %v2407_v52 }
 0x1fc   :  { %8150 = vst [vmem:[#allocation46_spill] sm:$0xff] %v7278_v43  ;;  %v3310_v63 = vadd.f32 %v7069_v62, %v3282_v10  ;;  %8151 = vst [vmem:[#allocation47_spill] sm:$0xff] %v7289_v60  ;;  %v2450_v48 = vadd.f32 %v7134_v37, %v2422_v39  ;;  %v3260_v0 = vmul.f32 %v3234_v59, %v5856_v29 }
 0x1fd   :  { %v3210_v16 = vadd.f32 %v3202_v34, %v7112_v35  ;;  %v3224_v27 = vadd.f32 %v3216_v54, %v8152_v53  ;;  %v2451_v41 = vadd.f32 %v8153_v26, %v2423_v8  ;;  %v3334_v6 = vmul.f32 %v6953_v38, %v3294_v12 }
 0x1fe   :  { %v3326_v56 = vadd.f32 %v7208_v46, %v3310_v63  ;;  %v2466_v62 = vadd.f32 %v2458_v42, %v2450_v48  ;;  %v2474_v37 = vmul.f32 %v7301_v7, %v2434_v32  ;;  %v3246_v35 = vmul.f32 %v3234_v59, %v5847_v18  ;;  %v4809_v46 = vld [vmem:[#allocation2 + $0x108] sm:$0xff]  ;;  %v7308_v42 = vld [vmem:[#allocation2 + $0x100] sm:$0xff] }
 0x1ff   :  { %v3252_v1 = vadd.f32 %v7189_v25, %v3224_v27  ;;  %v2467_v52 = vadd.f32 %v2459_v44, %v2451_v41  ;;  %v2475_v10 = vmul.f32 %v7301_v7, %v2435_v9  ;;  %v2344_v54 = vmul.f32 %v4809_v46, %v5814_v58  ;;  %v7327_v27 = vld [vmem:[%s7975_s1 + $0x9] ss:$0 sm:$0xff] }
 0x200   :  { %v3342_v39 = vadd.f32 %v3334_v6, %v3326_v56  ;;  %v2482_v34 = vadd.f32 %v2474_v37, %v2466_v62  ;;  %v2357_v8 = vmul.f32 %v7308_v42, %v8094_v50  ;;  %v7315_v48 = vmul.f32 %v3294_v12, %v5851_v21  ;;  %v2376_v37 = vld [vmem:[#allocation2 + $0xf9] sm:$0xff] }
 0x201   :  { %v7312_v63 = vadd.f32 %v3260_v0, %v3252_v1  ;;  %v2483_v59 = vadd.f32 %v2475_v10, %v2467_v52  ;;  %v2358_v25 = vmul.f32 %v4809_v46, %v8094_v50  ;;  %v7319_v44 = vmul.f32 %v3294_v12, %v5858_v30  ;;  %v7336_v1 = vld [vmem:[#allocation2 + $0x101] sm:$0xff] }
 0x202   :  { %8154 = vst [vmem:[#allocation28_spill] sm:$0xff] %v7315_v48  ;;  %v3235_v41 = vld [vmem:[#allocation3 + $0xb9] sm:$0xff]  ;;  %v7322_v53 = vadd.f32 %v6985_v15, %v3342_v39  ;;  %v2490_v0 = vadd.f32 %v7327_v27, %v2482_v34  ;;  %v2365_v26 = vadd.f32 %v2357_v8, %v2349_v19  ;;  %v2460_v6 = vmul.f32 %v2434_v32, %v8058_v23 }
 0x203   :  { %v3275_v56 = vmul.f32 %v3235_v41, %v5862_v36  ;;  %v2461_v62 = vmul.f32 %v2435_v9, %v8058_v23  ;;  %v7334_v12 = vmul.f32 %v4809_v46, %v5812_v57  ;;  %v2491_v10 = vadd.f32 %v7327_v27, %v2483_v59  ;;  %v3295_v48 = vld [vmem:[#allocation3 + $0xba] sm:$0xff] }
 0x204   :  { %8155 = vst [vmem:[#allocation19_spill] sm:$0xff] %v7322_v53  ;;  %v7341_v39 = vadd.f32 %v2344_v54, %v7247_v40  ;;  %v2343_v19 = vmul.f32 %v7308_v42, %v5814_v58  ;;  %v2498_v34 = vmax.f32 %v2490_v0, 0.0  ;;  %v2366_v9 = vadd.f32 %v2358_v25, %v7258_v24  ;;  %v8157_v54 = vld [vmem:[#allocation25_spill] sm:$0xff] }
 0x205   :  { %8156 = vst [vmem:[#allocation48_spill] sm:$0xff] %v7334_v12  ;;  %v3283_v32 = vadd.f32 %v3275_v56, %v7249_v28  ;;  %v2393_v46 = vadd.f32 %v7173_v3, %v2365_v26  ;;  %v3261_v8 = vmul.f32 %v3235_v41, %v5856_v29  ;;  %v2499_v60 = vmax.f32 %v2491_v10, 0.0 }
 0x206   :  { %v2416_v52 = vmul.f32 %v2376_v37, %v5837_v13  ;;  %v2417_v40 = vmul.f32 %v7336_v1, %v5837_v13  ;;  %2506 = vst [vmem:[#allocation3 + $0xc8] sm:$0xff] %v2498_v34  ;;  %v3203_v53 = vmul.f32 %v5844_v17, %v2498_v34  ;;  %v3217_v28 = vmul.f32 %v5853_v22, %v2498_v34 }
 0x207   :  { %v3311_v59 = vadd.f32 %v8157_v54, %v3283_v32  ;;  %v7356_v24 = vmul.f32 %v5840_v14, %v2498_v34  ;;  %2507 = vst [vmem:[#allocation3 + $0xd0] sm:$0xff] %v2499_v60  ;;  %v3218_v3 = vmul.f32 %v5853_v22, %v2499_v60  ;;  %v7360_v25 = vmul.f32 %v5840_v14, %v2499_v60 }
 0x208   :  { %v3400_v0 = vmul.f32 %v5844_v17, %v2499_v60  ;;  %v2409_v26 = vadd.f32 %v7275_v20, %v2393_v46  ;;  %v3335_v10 = vmul.f32 %v6953_v38, %v3295_v48  ;;  %v7367_v32 = vadd.f32 %v3203_v53, %v7216_v49  ;;  %v8160_v60 = vld [vmem:[#allocation26_spill] sm:$0xff]  ;;  %v8161_v53 = vld [vmem:[#allocation36_spill] sm:$0xff] }
 0x209   :  { %8158 = vst [vmem:[#allocation25_spill] sm:$0xff] %v7356_v24  ;;  %8159 = vst [vmem:[#allocation49_spill] sm:$0xff] %v7360_v25  ;;  %v3327_v56 = vadd.f32 %v7213_v47, %v3311_v59  ;;  %v3225_v34 = vadd.f32 %v3217_v28, %v7232_v55  ;;  %v3226_v54 = vadd.f32 %v3218_v3, %v3210_v16 }
 0x20a   :  { %v7371_v43 = vadd.f32 %v3400_v0, %v7283_v33  ;;  %v2424_v12 = vadd.f32 %v2416_v52, %v7286_v5  ;;  %v2425_v25 = vadd.f32 %v2417_v40, %v2409_v26  ;;  %v2351_v20 = vadd.f32 %v2343_v19, %v7253_v51  ;;  %v2436_v51 = vld [vmem:[#allocation2 + $0xfa] sm:$0xff] }
 0x20b   :  { %v3343_v24 = vadd.f32 %v3335_v10, %v3327_v56  ;;  %v3253_v61 = vadd.f32 %v8160_v60, %v3225_v34  ;;  %v7377_v47 = vmul.f32 %v2376_v37, %v5825_v2  ;;  %v3254_v46 = vadd.f32 %v3246_v35, %v3226_v54 }
 0x20c   :  { %v2402_v49 = vmul.f32 %v2376_v37, %v5827_v4  ;;  %v2452_v55 = vadd.f32 %v8161_v53, %v2424_v12  ;;  %v2453_v16 = vadd.f32 %v7224_v45, %v2425_v25  ;;  %v7383_v33 = vmul.f32 %v3235_v41, %v5847_v18  ;;  %v7397_v45 = vld [vmem:[#allocation2 + $0x102] sm:$0xff] }
 0x20d   :  { %v7386_v5 = vadd.f32 %v6985_v15, %v3343_v24  ;;  %v3269_v52 = vadd.f32 %v3261_v8, %v3253_v61  ;;  %v2394_v40 = vadd.f32 %v7267_v31, %v2366_v9  ;;  %v7390_v19 = vmul.f32 %v3295_v48, %v5851_v21  ;;  %v3236_v37 = vld [vmem:[#allocation3 + $0xc1] sm:$0xff] }
 0x20e   :  { %v3321_v35 = vmul.f32 %v3295_v48, %v5858_v30  ;;  %v7395_v12 = vmul.f32 %v7336_v1, %v5827_v4  ;;  %v2468_v41 = vadd.f32 %v2460_v6, %v2452_v55  ;;  %v7400_v28 = vld [vmem:[#allocation3 + $0xc9] sm:$0xff]  ;;  %v3262_v31 = vmul.f32 %v3236_v37, %v5856_v29 }
 0x20f   :  { %8162 = vst [vmem:[#allocation26_spill] sm:$0xff] %v7386_v5  ;;  %v3276_v61 = vmul.f32 %v3236_v37, %v5862_v36  ;;  %v2469_v9 = vadd.f32 %v2461_v62, %v2453_v16  ;;  %v3277_v48 = vmul.f32 %v7400_v28, %v5862_v36  ;;  %v7406_v8 = vld [vmem:[#allocation3 + $0xc2] sm:$0xff]  ;;  %v2410_v24 = vadd.f32 %v2402_v49, %v2394_v40  ;;  %v3297_v60 = vld [vmem:[#allocation3 + $0xca] sm:$0xff] }
 0x210   :  { %v7409_v3 = vmul.f32 %v2436_v51, %v8137_v11  ;;  %v7412_v6 = vmul.f32 %v2436_v51, %v8058_v23  ;;  %v7414_v25 = vadd.f32 %v3262_v31, %v3254_v46  ;;  %v2476_v26 = vmul.f32 %v7301_v7, %v2436_v51  ;;  %v4812_v51 = vld [vmem:[#allocation2 + $0x118] sm:$0xff] }
 0x211   :  { %v3284_v0 = vadd.f32 %v3276_v61, %v7312_v63  ;;  %v2477_v62 = vmul.f32 %v7301_v7, %v7397_v45  ;;  %v3285_v56 = vadd.f32 %v3277_v48, %v3269_v52  ;;  %v7422_v10 = vmul.f32 %v7397_v45, %v8058_v23  ;;  %v8164_v63 = vld [vmem:[#allocation41_spill] sm:$0xff]  ;;  %v8165_v52 = vld [vmem:[#allocation43_spill] sm:$0xff] }
 0x212   :  { %v7426_v34 = vmul.f32 %v7308_v42, %v5812_v57  ;;  %v7430_v54 = vmul.f32 %v7336_v1, %v5825_v2  ;;  %v7435_v49 = vmul.f32 %v7406_v8, %v5858_v30  ;;  %v2484_v53 = vadd.f32 %v2476_v26, %v2468_v41 }
 0x213   :  { %v3312_v46 = vadd.f32 %v8164_v63, %v3284_v0  ;;  %v2485_v55 = vadd.f32 %v2477_v62, %v2469_v9  ;;  %v3263_v16 = vmul.f32 %v7400_v28, %v5856_v29  ;;  %v3313_v40 = vadd.f32 %v8165_v52, %v3285_v56  ;;  %v4813_v0 = vld [vmem:[#allocation2 + $0x110] sm:$0xff] }
 0x214   :  { %8163 = vst [vmem:[#allocation36_spill] sm:$0xff] %v7430_v54  ;;  %v3336_v42 = vmul.f32 %v6953_v38, %v7406_v8  ;;  %v2360_v1 = vmul.f32 %v4812_v51, %v8094_v50  ;;  %v2492_v61 = vadd.f32 %v7327_v27, %v2484_v53  ;;  %v2359_v41 = vmul.f32 %v4813_v0, %v8094_v50  ;;  %v7447_v9 = vld [vmem:[#allocation2 + $0x109] sm:$0xff] }
 0x215   :  { %v3328_v31 = vadd.f32 %v7319_v44, %v3312_v46  ;;  %v2493_v48 = vadd.f32 %v7327_v27, %v2485_v55  ;;  %v3329_v26 = vadd.f32 %v3321_v35, %v3313_v40  ;;  %v3337_v62 = vmul.f32 %v6953_v38, %v3297_v60  ;;  %v2379_v55 = vld [vmem:[#allocation2 + $0x111] sm:$0xff] }
 0x216   :  { %v3444_v56 = vmul.f32 %v3236_v37, %v5847_v18  ;;  %v2542_v63 = vmul.f32 %v4812_v51, %v5814_v58  ;;  %v2500_v59 = vmax.f32 %v2492_v61, 0.0  ;;  %v2367_v44 = vadd.f32 %v2359_v41, %v2351_v20 }
 0x217   :  { %v3344_v52 = vadd.f32 %v3336_v42, %v3328_v31  ;;  %v2501_v5 = vmax.f32 %v2493_v48, 0.0  ;;  %v3345_v46 = vadd.f32 %v3337_v62, %v3329_v26  ;;  %v2368_v53 = vadd.f32 %v2360_v1, %v7341_v39  ;;  %v8170_v26 = vld [vmem:[#allocation45_spill] sm:$0xff] }
 0x218   :  { %v2404_v54 = vmul.f32 %v7447_v9, %v5827_v4  ;;  %v2418_v35 = vmul.f32 %v7447_v9, %v5837_v13  ;;  %2508 = vst [vmem:[#allocation3 + $0xd8] sm:$0xff] %v2500_v59  ;;  %v3219_v37 = vmul.f32 %v5853_v22, %v2500_v59  ;;  %v7462_v42 = vmul.f32 %v5840_v14, %v2500_v59 }
 0x219   :  { %v7458_v40 = vadd.f32 %v6985_v15, %v3344_v52  ;;  %2509 = vst [vmem:[#allocation3 + $0xe0] sm:$0xff] %v2501_v5  ;;  %v7465_v20 = vmul.f32 %v5840_v14, %v2501_v5  ;;  %v7468_v39 = vadd.f32 %v6985_v15, %v3345_v46  ;;  %v3401_v1 = vmul.f32 %v5844_v17, %v2500_v59  ;;  %v8172_v46 = vld [vmem:[#allocation49_spill] sm:$0xff]  ;;  %v8176_v14 = vld [vmem:[#allocation47_spill] sm:$0xff] }
 0x21a   :  { %8167 = vst [vmem:[#allocation43_spill] sm:$0xff] %v7462_v42  ;;  %v3402_v31 = vmul.f32 %v5844_v17, %v2501_v5  ;;  %v3416_v61 = vmul.f32 %v5853_v22, %v2501_v5  ;;  %v3227_v41 = vadd.f32 %v3219_v37, %v7367_v32  ;;  %v2395_v62 = vadd.f32 %v8170_v26, %v2367_v44  ;;  %v2438_v37 = vld [vmem:[#allocation2 + $0x10a] sm:$0xff] }
 0x21b   :  { %8166 = vst [vmem:[#allocation41_spill] sm:$0xff] %v7458_v40  ;;  %8168 = vst [vmem:[#allocation50_spill] sm:$0xff] %v7465_v20  ;;  %v2419_v52 = vmul.f32 %v2379_v55, %v5837_v13  ;;  %v8171_v20 = vld [vmem:[#allocation25_spill] sm:$0xff]  ;;  %v3323_v5 = vmul.f32 %v3297_v60, %v5858_v30  ;;  %v7488_v48 = vmul.f32 %v7400_v28, %v5847_v18 }
 0x21c   :  { %8169 = vst [vmem:[#allocation51_spill] sm:$0xff] %v7468_v39  ;;  %v7479_v42 = vadd.f32 %v3401_v1, %v8171_v20  ;;  %v7482_v50 = vadd.f32 %v3402_v31, %v8172_v46  ;;  %v3424_v59 = vadd.f32 %v3416_v61, %v7371_v43  ;;  %v3255_v32 = vadd.f32 %v7383_v33, %v3227_v41 }
 0x21d   :  { %v2426_v44 = vadd.f32 %v2418_v35, %v2410_v24  ;;  %v7493_v26 = vmul.f32 %v7406_v8, %v5851_v21  ;;  %v2396_v1 = vadd.f32 %v7377_v47, %v2368_v53  ;;  %v2411_v31 = vadd.f32 %v7395_v12, %v2395_v62  ;;  %v7507_v24 = vld [vmem:[#allocation2 + $0x112] sm:$0xff] }
 0x21e   :  { %v3452_v20 = vadd.f32 %v3444_v56, %v3424_v59  ;;  %v7498_v43 = vmul.f32 %v3297_v60, %v5851_v21  ;;  %v7502_v28 = vmul.f32 %v7397_v45, %v8137_v11  ;;  %v3271_v61 = vadd.f32 %v3263_v16, %v3255_v32  ;;  %v8174_v56 = vld [vmem:[#allocation48_spill] sm:$0xff]  ;;  %v8175_v16 = vld [vmem:[#allocation46_spill] sm:$0xff] }
 0x21f   :  { %v7505_v33 = vmul.f32 %v4812_v51, %v5812_v57  ;;  %v3238_v8 = vld [vmem:[#allocation3 + $0xd1] sm:$0xff]  ;;  %v7510_v41 = vadd.f32 %v2542_v63, %v8174_v56  ;;  %v2412_v47 = vadd.f32 %v2404_v54, %v2396_v1  ;;  %v2427_v12 = vadd.f32 %v2419_v52, %v2411_v31 }
 0x220   :  { %8173 = vst [vmem:[#allocation45_spill] sm:$0xff] %v7502_v28  ;;  %v3239_v35 = vld [vmem:[#allocation3 + $0xd9] sm:$0xff]  ;;  %v7513_v60 = vmul.f32 %v2438_v37, %v8058_v23  ;;  %v3278_v53 = vmul.f32 %v3238_v8, %v5862_v36  ;;  %v2454_v62 = vadd.f32 %v8175_v16, %v2426_v44  ;;  %v2478_v51 = vmul.f32 %v7301_v7, %v2438_v37  ;;  %v7547_v28 = vld [vmem:[#allocation2 + $0x119] sm:$0xff] }
 0x221   :  { %v3279_v45 = vmul.f32 %v3239_v35, %v5862_v36  ;;  %v3298_v46 = vld [vmem:[#allocation3 + $0xd2] sm:$0xff]  ;;  %v3460_v59 = vmul.f32 %v3238_v8, %v5856_v29  ;;  %v2479_v63 = vmul.f32 %v7301_v7, %v7507_v24  ;;  %v7523_v54 = vmul.f32 %v4813_v0, %v5812_v57  ;;  %v3299_v31 = vld [vmem:[#allocation3 + $0xda] sm:$0xff] }
 0x222   :  { %v2541_v52 = vmul.f32 %v4813_v0, %v5814_v58  ;;  %v3286_v32 = vadd.f32 %v3278_v53, %v7414_v25  ;;  %v7529_v44 = vmul.f32 %v7447_v9, %v5825_v2  ;;  %v7532_v56 = vmul.f32 %v2379_v55, %v5825_v2  ;;  %v8177_v25 = vld [vmem:[#allocation28_spill] sm:$0xff] }
 0x223   :  { %v3287_v1 = vadd.f32 %v3279_v45, %v3271_v61  ;;  %v7534_v16 = vadd.f32 %v3460_v59, %v3452_v20  ;;  %v2455_v39 = vadd.f32 %v8176_v14, %v2427_v12  ;;  %v7538_v40 = vmul.f32 %v2379_v55, %v5827_v4 }
 0x224   :  { %v7541_v0 = vmul.f32 %v2438_v37, %v8137_v11  ;;  %v3314_v61 = vadd.f32 %v8177_v25, %v3286_v32  ;;  %v3338_v9 = vmul.f32 %v6953_v38, %v3298_v46  ;;  %v2470_v45 = vadd.f32 %v7412_v6, %v2454_v62 }
 0x225   :  { %v3315_v53 = vadd.f32 %v7390_v19, %v3287_v1  ;;  %v3339_v20 = vmul.f32 %v6953_v38, %v3299_v31  ;;  %v3446_v14 = vmul.f32 %v3238_v8, %v5847_v18  ;;  %v7552_v55 = vmul.f32 %v3239_v35, %v5847_v18 }
 0x226   :  { %v2471_v37 = vadd.f32 %v7422_v10, %v2455_v39  ;;  %v3330_v12 = vadd.f32 %v7435_v49, %v3314_v61  ;;  %v3461_v19 = vmul.f32 %v3239_v35, %v5856_v29  ;;  %v2486_v32 = vadd.f32 %v2478_v51, %v2470_v45  ;;  %v4814_v45 = vld [vmem:[#allocation2 + $0x128] sm:$0xff] }
 0x227   :  { %v3331_v59 = vadd.f32 %v3323_v5, %v3315_v53  ;;  %v7558_v1 = vmul.f32 %v3298_v46, %v5851_v21  ;;  %v7561_v6 = vmul.f32 %v3299_v31, %v5851_v21  ;;  %v2420_v8 = vmul.f32 %v7547_v28, %v5837_v13 }
 0x228   :  { %v2487_v38 = vadd.f32 %v2479_v63, %v2471_v37  ;;  %v3346_v62 = vadd.f32 %v3338_v9, %v3330_v12  ;;  %v7566_v10 = vmul.f32 %v3298_v46, %v5858_v30  ;;  %v2494_v49 = vadd.f32 %v7327_v27, %v2486_v32  ;;  %v8184_v12 = vld [vmem:[#allocation50_spill] sm:$0xff] }
 0x229   :  { %8178 = vst [vmem:[#allocation25_spill] sm:$0xff] %v7561_v6  ;;  %v3347_v25 = vadd.f32 %v3339_v20, %v3331_v59  ;;  %v7570_v39 = vmul.f32 %v3299_v31, %v5858_v30  ;;  %v2549_v35 = vadd.f32 %v2541_v52, %v7426_v34  ;;  %v2428_v51 = vadd.f32 %v2420_v8, %v2412_v47  ;;  %v2440_v20 = vld [vmem:[#allocation2 + $0x11a] sm:$0xff]  ;;  %v8182_v47 = vld [vmem:[#allocation18_spill] sm:$0xff] }
 0x22a   :  { %v2495_v5 = vadd.f32 %v7327_v27, %v2487_v38  ;;  %v7575_v63 = vadd.f32 %v6985_v15, %v3346_v62  ;;  %v2502_v53 = vmax.f32 %v2494_v49, 0.0  ;;  %v7582_v46 = vmul.f32 %v7507_v24, %v8137_v11  ;;  %v4815_v34 = vld [vmem:[#allocation2 + $0x120] sm:$0xff] }
 0x22b   :  { %v7578_v61 = vadd.f32 %v6985_v15, %v3347_v25  ;;  %v2544_v31 = vmul.f32 %v4814_v45, %v5814_v58  ;;  %v2456_v37 = vadd.f32 %v7409_v3, %v2428_v51  ;;  %v2557_v52 = vmul.f32 %v4815_v34, %v8182_v47  ;;  %v8183_v25 = vld [vmem:[#allocation43_spill] sm:$0xff] }
 0x22c   :  { %8179 = vst [vmem:[#allocation49_spill] sm:$0xff] %v7575_v63  ;;  %8181 = vst [vmem:[#allocation46_spill] sm:$0xff] %v7582_v46  ;;  %v2503_v9 = vmax.f32 %v2495_v5, 0.0  ;;  %v3403_v59 = vmul.f32 %v5844_v17, %v2502_v53  ;;  %v2558_v32 = vmul.f32 %v4814_v45, %v8182_v47  ;;  %v7593_v38 = vmul.f32 %v7507_v24, %v8058_v23 }
 0x22d   :  { %8180 = vst [vmem:[#allocation48_spill] sm:$0xff] %v7578_v61  ;;  %2510 = vst [vmem:[#allocation3 + $0xe8] sm:$0xff] %v2502_v53  ;;  %v3417_v3 = vmul.f32 %v5853_v22, %v2502_v53  ;;  %v2472_v5 = vadd.f32 %v7513_v60, %v2456_v37  ;;  %v2480_v51 = vmul.f32 %v7301_v7, %v2440_v20 }
 0x22e   :  { %2511 = vst [vmem:[#allocation3 + $0xf0] sm:$0xff] %v2503_v9  ;;  %v3404_v8 = vmul.f32 %v5844_v17, %v2503_v9  ;;  %v3418_v62 = vmul.f32 %v5853_v22, %v2503_v9  ;;  %v3411_v49 = vadd.f32 %v3403_v59, %v8183_v25  ;;  %v2565_v15 = vadd.f32 %v2557_v52, %v2549_v35  ;;  %v2577_v25 = vld [vmem:[#allocation2 + $0x121] sm:$0xff]  ;;  %v8185_v35 = vld [vmem:[#allocation36_spill] sm:$0xff] }
 0x22f   :  { %v3425_v61 = vadd.f32 %v3417_v3, %v7479_v42  ;;  %v2543_v63 = vmul.f32 %v4815_v34, %v5814_v58  ;;  %v7608_v6 = vadd.f32 %v2544_v31, %v7505_v33  ;;  %v2566_v46 = vadd.f32 %v2558_v32, %v7510_v41  ;;  %v8186_v42 = vld [vmem:[#allocation21_spill] sm:$0xff] }
 0x230   :  { %v7602_v45 = vadd.f32 %v3404_v8, %v8184_v12  ;;  %v3426_v24 = vadd.f32 %v3418_v62, %v7482_v50  ;;  %v2488_v59 = vadd.f32 %v2480_v51, %v2472_v5  ;;  %v2593_v52 = vadd.f32 %v8185_v35, %v2565_v15  ;;  %v2637_v15 = vld [vmem:[#allocation2 + $0x122] sm:$0xff] }
 0x231   :  { %v3453_v60 = vadd.f32 %v7488_v48, %v3425_v61  ;;  %v2602_v12 = vmul.f32 %v7547_v28, %v5827_v4  ;;  %v3389_v8 = vmul.f32 %v8186_v42, %v2502_v53  ;;  %v7617_v50 = vmul.f32 %v8186_v42, %v2503_v9 }
 0x232   :  { %v3454_v37 = vadd.f32 %v3446_v14, %v3426_v24  ;;  %v2594_v33 = vadd.f32 %v7529_v44, %v2566_v46  ;;  %v7621_v31 = vmul.f32 %v4815_v34, %v5812_v57  ;;  %v2496_v48 = vadd.f32 %v7327_v27, %v2488_v59 }
 0x233   :  { %v3469_v32 = vadd.f32 %v3461_v19, %v3453_v60  ;;  %v2551_v14 = vadd.f32 %v2543_v63, %v7523_v54  ;;  %v7627_v61 = vmul.f32 %v7547_v28, %v5825_v2  ;;  %v7632_v44 = vmul.f32 %v2577_v25, %v5825_v2 }
 0x234   :  { %v3436_v41 = vld [vmem:[#allocation3 + $0xe1] sm:$0xff]  ;;  %v2617_v57 = vmul.f32 %v2577_v25, %v5837_v13  ;;  %v7637_v54 = vmul.f32 %v2577_v25, %v5827_v4  ;;  %v2609_v28 = vadd.f32 %v7538_v40, %v2593_v52  ;;  %v7640_v63 = vadd.f32 %v2602_v12, %v2594_v33 }
 0x235   :  { %v3437_v53 = vld [vmem:[#allocation3 + $0xe9] sm:$0xff]  ;;  %v3462_v9 = vmul.f32 %v3436_v41, %v5856_v29  ;;  %v3476_v3 = vmul.f32 %v3436_v41, %v5862_v36  ;;  %v7644_v5 = vmul.f32 %v2440_v20, %v8137_v11  ;;  %v7647_v2 = vmul.f32 %v2637_v15, %v8137_v11 }
 0x236   :  { %v3477_v19 = vmul.f32 %v3437_v53, %v5862_v36  ;;  %v3496_v46 = vld [vmem:[#allocation3 + $0xe2] sm:$0xff]  ;;  %v2504_v24 = vmax.f32 %v2496_v48, 0.0  ;;  %v7650_v59 = vmul.f32 %v2440_v20, %v8058_v23  ;;  %v7653_v60 = vmul.f32 %v2637_v15, %v8058_v23  ;;  %v8188_v48 = vld [vmem:[#allocation45_spill] sm:$0xff] }
 0x237   :  { %v3470_v34 = vadd.f32 %v3462_v9, %v3454_v37  ;;  %v3484_v62 = vadd.f32 %v3476_v3, %v7534_v16  ;;  %v7656_v40 = vmul.f32 %v3436_v41, %v5847_v18  ;;  %v3497_v37 = vld [vmem:[#allocation3 + $0xea] sm:$0xff]  ;;  %v7659_v16 = vmul.f32 %v3496_v46, %v5851_v21 }
 0x238   :  { %v3485_v51 = vadd.f32 %v3477_v19, %v3469_v32  ;;  %v2625_v35 = vadd.f32 %v2617_v57, %v2609_v28  ;;  %v7663_v11 = vmul.f32 %v3437_v53, %v5847_v18  ;;  %2512 = vst [vmem:[#allocation3 + $0xf8] sm:$0xff] %v2504_v24  ;;  %v3405_v20 = vmul.f32 %v5844_v17, %v2504_v24  ;;  %v7673_v32 = vld [vmem:[%s7975_s1 + $0x12] ss:$0 sm:$0xff] }
 0x239   :  { %8187 = vst [vmem:[#allocation47_spill] sm:$0xff] %v7659_v16  ;;  %v3512_v25 = vadd.f32 %v7493_v26, %v3484_v62  ;;  %v3419_v12 = vmul.f32 %v5853_v22, %v2504_v24  ;;  %v3463_v33 = vmul.f32 %v3437_v53, %v5856_v29  ;;  %v3536_v26 = vmul.f32 %v7673_v32, %v3496_v46  ;;  %v4817_v62 = vld [vmem:[#allocation2 + $0x138] sm:$0xff] }
 0x23a   :  { %v3513_v52 = vadd.f32 %v7498_v43, %v3485_v51  ;;  %v2653_v9 = vadd.f32 %v8188_v48, %v2625_v35  ;;  %v3537_v3 = vmul.f32 %v7673_v32, %v3497_v37  ;;  %v7679_v57 = vadd.f32 %v3405_v20, %v3389_v8 }
 0x23b   :  { %v3528_v41 = vadd.f32 %v7566_v10, %v3512_v25  ;;  %v3427_v19 = vadd.f32 %v3419_v12, %v3411_v49  ;;  %v2677_v10 = vmul.f32 %v7301_v7, %v2637_v15  ;;  %v2560_v51 = vmul.f32 %v4817_v62, %v8182_v47 }
 0x23c   :  { %v3529_v43 = vadd.f32 %v7570_v39, %v3513_v52  ;;  %v2669_v53 = vadd.f32 %v7593_v38, %v2653_v9  ;;  %v7685_v25 = vmul.f32 %v3497_v37, %v5851_v21  ;;  %v4818_v39 = vld [vmem:[#allocation2 + $0x130] sm:$0xff]  ;;  %v3522_v8 = vmul.f32 %v3496_v46, %v5858_v30 }
 0x23d   :  { %v3544_v28 = vadd.f32 %v3536_v26, %v3528_v41  ;;  %v3455_v35 = vadd.f32 %v7552_v55, %v3427_v19  ;;  %v2559_v52 = vmul.f32 %v4818_v39, %v8182_v47  ;;  %v7693_v38 = vld [vmem:[%s7975_s1 + $0x13] ss:$0 sm:$0xff]  ;;  %v2545_v55 = vmul.f32 %v4818_v39, %v5814_v58 }
 0x23e   :  { %v3545_v16 = vadd.f32 %v3537_v3, %v3529_v43  ;;  %v2685_v15 = vadd.f32 %v2677_v10, %v2669_v53  ;;  %v7703_v26 = vmul.f32 %v3497_v37, %v5858_v30  ;;  %v2568_v43 = vadd.f32 %v2560_v51, %v7608_v6  ;;  %v2578_v3 = vld [vmem:[#allocation2 + $0x129] sm:$0xff]  ;;  %v2579_v58 = vld [vmem:[#allocation2 + $0x131] sm:$0xff] }
 0x23f   :  { %v7696_v49 = vadd.f32 %v7693_v38, %v3544_v28  ;;  %v3471_v12 = vadd.f32 %v3463_v33, %v3455_v35  ;;  %v2567_v41 = vadd.f32 %v2559_v52, %v2551_v14  ;;  %v3438_v9 = vld [vmem:[#allocation3 + $0xf1] sm:$0xff]  ;;  %v2553_v53 = vadd.f32 %v2545_v55, %v7621_v31 }
 0x240   :  { %v7699_v20 = vadd.f32 %v7693_v38, %v3545_v16  ;;  %v2693_v48 = vadd.f32 %v7327_v27, %v2685_v15  ;;  %v7710_v16 = vmul.f32 %v8186_v42, %v2504_v24  ;;  %v3478_v33 = vmul.f32 %v3438_v9, %v5862_v36  ;;  %v7718_v51 = vld [vmem:[#allocation3 + $0xf2] sm:$0xff]  ;;  %v2638_v15 = vld [vmem:[#allocation2 + $0x12a] sm:$0xff] }
 0x241   :  { %v3560_v46 = vmax.f32 %v7696_v49, 0.0  ;;  %v2596_v37 = vadd.f32 %v7627_v61, %v2568_v43  ;;  %v2595_v10 = vadd.f32 %v7532_v56, %v2567_v41  ;;  %v2618_v42 = vmul.f32 %v2578_v3, %v5837_v13 }
 0x242   :  { %v3561_v19 = vmax.f32 %v7699_v20, 0.0  ;;  %v2701_v14 = vmax.f32 %v2693_v48, 0.0  ;;  %v3486_v28 = vadd.f32 %v3478_v33, %v3470_v34  ;;  %v2619_v24 = vmul.f32 %v2579_v58, %v5837_v13  ;;  %v2639_v33 = vld [vmem:[#allocation2 + $0x132] sm:$0xff] }
 0x243   :  { %v2604_v61 = vmul.f32 %v2578_v3, %v5827_v4  ;;  %v2611_v34 = vadd.f32 %v7637_v54, %v2595_v10  ;;  %v3464_v39 = vmul.f32 %v3438_v9, %v5856_v29  ;;  %v2626_v52 = vadd.f32 %v2618_v42, %v7640_v63 }
 0x244   :  { %2709 = vst [vmem:[#allocation3 + $0x100] sm:$0xff] %v2701_v14  ;;  %v3406_v6 = vmul.f32 %v5844_v17, %v2701_v14  ;;  %v3420_v62 = vmul.f32 %v5853_v22, %v2701_v14  ;;  %v3514_v35 = vadd.f32 %v7558_v1, %v3486_v28  ;;  %v7732_v55 = vmul.f32 %v3438_v9, %v5847_v18  ;;  %v8189_v9 = vld [vmem:[#allocation46_spill] sm:$0xff] }
 0x245   :  { %v3538_v1 = vmul.f32 %v7673_v32, %v7718_v51  ;;  %v2627_v48 = vadd.f32 %v2619_v24, %v2611_v34  ;;  %v2654_v43 = vadd.f32 %v7541_v0, %v2626_v52  ;;  %v2612_v3 = vadd.f32 %v2604_v61, %v2596_v37  ;;  %v2580_v61 = vld [vmem:[#allocation2 + $0x139] sm:$0xff]  ;;  %v2581_v52 = vld [vmem:[#allocation2 + $0x141] sm:$0xff] }
 0x246   :  { %v7726_v31 = vadd.f32 %v3406_v6, %v7617_v50  ;;  %v3428_v56 = vadd.f32 %v3420_v62, %v7602_v45  ;;  %v3530_v41 = vadd.f32 %v3522_v8, %v3514_v35  ;;  %v7739_v50 = vmul.f32 %v7718_v51, %v5858_v30 }
 0x247   :  { %v2605_v45 = vmul.f32 %v2579_v58, %v5827_v4  ;;  %v2655_v14 = vadd.f32 %v8189_v9, %v2627_v48  ;;  %v2678_v8 = vmul.f32 %v7301_v7, %v2638_v15  ;;  %v2670_v10 = vadd.f32 %v7650_v59, %v2654_v43 }
 0x248   :  { %v3456_v54 = vadd.f32 %v7656_v40, %v3428_v56  ;;  %v3546_v63 = vadd.f32 %v3538_v1, %v3530_v41  ;;  %v4821_v40 = vld [vmem:[#allocation2 + $0x140] sm:$0xff]  ;;  %v2679_v58 = vmul.f32 %v7301_v7, %v2639_v33  ;;  %v2664_v24 = vmul.f32 %v2638_v15, %v8058_v23 }
 0x249   :  { %v2561_v6 = vmul.f32 %v4821_v40, %v8182_v47  ;;  %v2671_v4 = vadd.f32 %v7653_v60, %v2655_v14  ;;  %v2665_v35 = vmul.f32 %v2639_v33, %v8058_v23  ;;  %v2686_v59 = vadd.f32 %v2678_v8, %v2670_v10  ;;  %v8190_v1 = vld [vmem:[#allocation25_spill] sm:$0xff] }
 0x24a   :  { %v7745_v28 = vadd.f32 %v3464_v39, %v3456_v54  ;;  %v7750_v42 = vadd.f32 %v7693_v38, %v3546_v63  ;;  %v2620_v23 = vmul.f32 %v2580_v61, %v5837_v13  ;;  %v2621_v63 = vmul.f32 %v2581_v52, %v5837_v13  ;;  %v2640_v8 = vld [vmem:[#allocation2 + $0x13a] sm:$0xff]  ;;  %v2641_v13 = vld [vmem:[#allocation2 + $0x142] sm:$0xff] }
 0x24b   :  { %v3439_v62 = vld [vmem:[#allocation3 + $0xf9] sm:$0xff]  ;;  %v2687_v56 = vadd.f32 %v2679_v58, %v2671_v4  ;;  %v2569_v39 = vadd.f32 %v2561_v6, %v2553_v53  ;;  %v2694_v41 = vadd.f32 %v7327_v27, %v2686_v59 }
 0x24c   :  { %v3479_v0 = vmul.f32 %v3439_v62, %v5862_v36  ;;  %v3562_v37 = vmax.f32 %v7750_v42, 0.0  ;;  %v7758_v47 = vld [vmem:[#allocation3 + $0xfa] sm:$0xff]  ;;  %v7761_v60 = vmul.f32 %v3439_v62, %v5847_v18  ;;  %v2628_v14 = vadd.f32 %v2620_v23, %v2612_v3 }
 0x24d   :  { %v2695_v54 = vadd.f32 %v7327_v27, %v2687_v56  ;;  %v2597_v15 = vadd.f32 %v7632_v44, %v2569_v39  ;;  %v3539_v43 = vmul.f32 %v7673_v32, %v7758_v47  ;;  %v2702_v53 = vmax.f32 %v2694_v41, 0.0 }
 0x24e   :  { %v3487_v34 = vadd.f32 %v3479_v0, %v3471_v12  ;;  %v3465_v12 = vmul.f32 %v3439_v62, %v5856_v29  ;;  %v3525_v10 = vmul.f32 %v7758_v47, %v5858_v30  ;;  %v2680_v0 = vmul.f32 %v7301_v7, %v2640_v8 }
 0x24f   :  { %v2703_v33 = vmax.f32 %v2695_v54, 0.0  ;;  %v2613_v9 = vadd.f32 %v2605_v45, %v2597_v15  ;;  %2710 = vst [vmem:[#allocation3 + $0x108] sm:$0xff] %v2702_v53  ;;  %v3407_v44 = vmul.f32 %v5844_v17, %v2702_v53  ;;  %v3421_v40 = vmul.f32 %v5853_v22, %v2702_v53 }
 0x250   :  { %v3515_v48 = vadd.f32 %v8190_v1, %v3487_v34  ;;  %v2681_v56 = vmul.f32 %v7301_v7, %v2641_v13 }
 0x251   :  { %2711 = vst [vmem:[#allocation3 + $0x110] sm:$0xff] %v2703_v33  ;;  %v3422_v62 = vmul.f32 %v5853_v22, %v2703_v33  ;;  %v2629_v4 = vadd.f32 %v2621_v63, %v2613_v9  ;;  %v3415_v45 = vadd.f32 %v3407_v44, %v7710_v16  ;;  %v3429_v3 = vadd.f32 %v3421_v40, %v7679_v57  ;;  %v8191_v63 = vld [vmem:[#allocation47_spill] sm:$0xff] }
 0x252   :  { %v3531_v18 = vadd.f32 %v7703_v26, %v3515_v48  ;;  %v2656_v26 = vadd.f32 %v7644_v5, %v2628_v14 }
 0x253   :  { %v3430_v17 = vadd.f32 %v3422_v62, %v7726_v31  ;;  %v2657_v59 = vadd.f32 %v7647_v2, %v2629_v4  ;;  %v3457_v34 = vadd.f32 %v7663_v11, %v3429_v3 }
 0x254   :  { %v3547_v6 = vadd.f32 %v3539_v43, %v3531_v18  ;;  %v2672_v61 = vadd.f32 %v2664_v24, %v2656_v26 }
 0x255   :  { %v3458_v16 = vadd.f32 %v7732_v55, %v3430_v17  ;;  %v2673_v39 = vadd.f32 %v2665_v35, %v2657_v59  ;;  %v3473_v52 = vadd.f32 %v3465_v12, %v3457_v34 }
 0x256   :  { %v7783_v58 = vadd.f32 %v7693_v38, %v3547_v6  ;;  %v2688_v57 = vadd.f32 %v2680_v0, %v2672_v61  ;;  %v3440_v41 = vld [vmem:[#allocation3 + $0x101] sm:$0xff]  ;;  %v3511_v0 = vmul.f32 %v7758_v47, %v5851_v21 }
 0x257   :  { %v3500_v1 = vld [vmem:[#allocation3 + $0x102] sm:$0xff]  ;;  %v2689_v48 = vadd.f32 %v2681_v56, %v2673_v39  ;;  %v3466_v2 = vmul.f32 %v3440_v41, %v5856_v29  ;;  %v3480_v24 = vmul.f32 %v3440_v41, %v5862_v36 }
 0x258   :  { %v3563_v5 = vmax.f32 %v7783_v58, 0.0  ;;  %v2696_v54 = vadd.f32 %v7327_v27, %v2688_v57  ;;  %v3441_v31 = vld [vmem:[#allocation3 + $0x109] sm:$0xff]  ;;  %v3540_v7 = vmul.f32 %v7673_v32, %v3500_v1  ;;  %v3526_v59 = vmul.f32 %v3500_v1, %v5858_v30 }
 0x259   :  { %v3481_v11 = vmul.f32 %v3441_v31, %v5862_v36  ;;  %v3474_v15 = vadd.f32 %v3466_v2, %v3458_v16  ;;  %v3488_v55 = vadd.f32 %v3480_v24, %v7745_v28  ;;  %v3501_v35 = vld [vmem:[#allocation3 + $0x10a] sm:$0xff]  ;;  %v2697_v23 = vadd.f32 %v7327_v27, %v2689_v48  ;;  %v8194_v24 = vld [vmem:[#allocation23_spill] sm:$0xff] }
 0x25a   :  { %v2704_v12 = vmax.f32 %v2696_v54, 0.0  ;;  %v3467_v43 = vmul.f32 %v3441_v31, %v5856_v29  ;;  %v3541_v8 = vmul.f32 %v7673_v32, %v3501_v35  ;;  %v3527_v56 = vmul.f32 %v3501_v35, %v5858_v30  ;;  %v8192_v31 = vld [vmem:[#allocation44_spill] sm:$0xff] }
 0x25b   :  { %v3489_v53 = vadd.f32 %v3481_v11, %v3473_v52  ;;  %v3516_v18 = vadd.f32 %v8191_v63, %v3488_v55  ;;  %v2705_v33 = vmax.f32 %v2697_v23, 0.0  ;;  %v8193_v2 = vmax.f32 %v8192_v31, 0.0  ;;  %v8198_v55 = vld [vmem:[#allocation39_spill] sm:$0xff] }
 0x25c   :  { %2712 = vst [vmem:[#allocation3 + $0x118] sm:$0xff] %v2704_v12  ;;  %v3423_v9 = vmul.f32 %v5853_v22, %v2704_v12  ;;  %v8195_v30 = vmax.f32 %v8194_v24, 0.0  ;;  %v8199_v35 = vmax.f32 %v8198_v55, 0.0  ;;  %v8200_v12 = vld [vmem:[#allocation19_spill] sm:$0xff] }
 0x25d   :  { %v3517_v14 = vadd.f32 %v7685_v25, %v3489_v53  ;;  %v3532_v44 = vadd.f32 %v7739_v50, %v3516_v18  ;;  %2713 = vst [vmem:[#allocation3 + $0x120] sm:$0xff] %v2705_v33 }
 0x25e   :  { %v3431_v28 = vadd.f32 %v3423_v9, %v3415_v45  ;;  %v3626_v11 = vpack.c.bf16 %v8195_v30, %v8193_v2 }
 0x25f   :  { %v3533_v40 = vadd.f32 %v3525_v10, %v3517_v14  ;;  %v3548_v27 = vadd.f32 %v3540_v7, %v3532_v44  ;;  %v3510_v10 = vmul.f32 %v7718_v51, %v5851_v21  ;;  %v8196_v7 = vld [vmem:[#allocation37_spill] sm:$0xff] }
 0x260   :  { %v3459_v6 = vadd.f32 %v7761_v60, %v3431_v28 }
 0x261   :  { %v3549_v29 = vadd.f32 %v3541_v8, %v3533_v40  ;;  %v7806_v62 = vadd.f32 %v7693_v38, %v3548_v27 }
 0x262   :  { %v3475_v4 = vadd.f32 %v3467_v43, %v3459_v6  ;;  %v8202_v43 = vld [vmem:[#allocation26_spill] sm:$0xff] }
 0x263   :  { %v7809_v13 = vadd.f32 %v7693_v38, %v3549_v29  ;;  %v3442_v22 = vld [vmem:[#allocation3 + $0x111] sm:$0xff]  ;;  %v3564_v25 = vmax.f32 %v7806_v62, 0.0  ;;  %v8203_v53 = vmax.f32 %v8202_v43, 0.0 }
 0x264   :  { %v3482_v26 = vmul.f32 %v3442_v22, %v5862_v36  ;;  %v3443_v45 = vld [vmem:[#allocation3 + $0x119] sm:$0xff] }
 0x265   :  { %v3565_v50 = vmax.f32 %v7809_v13, 0.0  ;;  %v3483_v60 = vmul.f32 %v3443_v45, %v5862_v36  ;;  %v3502_v17 = vld [vmem:[#allocation3 + $0x112] sm:$0xff]  ;;  %v3503_v16 = vld [vmem:[#allocation3 + $0x11a] sm:$0xff] }
 0x266   :  { %v3490_v3 = vadd.f32 %v3482_v26, %v3474_v15  ;;  %v3542_v52 = vmul.f32 %v7673_v32, %v3502_v17  ;;  %v3543_v51 = vmul.f32 %v7673_v32, %v3503_v16  ;;  %v8197_v15 = vmax.f32 %v8196_v7, 0.0 }
 0x267   :  { %v3491_v61 = vadd.f32 %v3483_v60, %v3475_v4  ;;  %v8201_v32 = vmax.f32 %v8200_v12, 0.0 }
 0x268   :  { %v3518_v34 = vadd.f32 %v3510_v10, %v3490_v3  ;;  %v3618_v23 = vpack.c.bf16 %v8199_v35, %v8197_v15 }
 0x269   :  { %v3519_v39 = vadd.f32 %v3511_v0, %v3491_v61  ;;  %v3627_v63 = vpack.c.bf16 %v8203_v53, %v8201_v32 }
 0x26a   :  { %v3534_v57 = vadd.f32 %v3526_v59, %v3518_v34 }
 0x26b   :  { %v3535_v41 = vadd.f32 %v3527_v56, %v3519_v39 }
 0x26c   :  { %v3550_v36 = vadd.f32 %v3542_v52, %v3534_v57 }
 0x26d   :  { %v3551_v48 = vadd.f32 %v3543_v51, %v3535_v41 }
 0x26e   :  { %v3558_v54 = vadd.f32 %v7693_v38, %v3550_v36 }
 0x26f   :  { %v3559_v21 = vadd.f32 %v7693_v38, %v3551_v48 }
 0x270   :  { %v3566_v47 = vmax.f32 %v3558_v54, 0.0 }
 0x271   :  { %v3567_v1 = vmax.f32 %v3559_v21, 0.0 }
 0x272   :  { %4846 = dma.done.wait [#allocation7], 18432 }
 0x273   :  { %4847 = vsyncadd [#allocation7], 4294948864  ;;  %v8204_v38 = vmov 0   ;;  %4655 = vmatprep.subr.bf16.mxu0 %v3626_v11  ;;  %v8205_v18 = vld [vmem:[#allocation33_spill] sm:$0xff]  ;;  %v8207_v9 = vld [vmem:[#allocation22_spill] sm:$0xff]  ;;  %v3630_v54 = vpack.c.bf16 %v3561_v19, %v3560_v46  ;;  %v3631_v15 = vpack.c.bf16 %v3563_v5, %v3562_v37  ;;  %v3632_v12 = vpack.c.bf16 %v3565_v50, %v3564_v25 }
 0x274   :  { %3728 = vmatprep.mubr.bf16.mxu1 %v8204_v38  ;;  %4656 = vmatpush3.bf16.msra.mxu0 %v3618_v23  ;;  %v8206_v33 = vmax.f32 %v8205_v18, 0.0  ;;  %v8208_v14 = vmax.f32 %v8207_v9, 0.0  ;;  %v8209_v44 = vld [vmem:[#allocation41_spill] sm:$0xff]  ;;  %v8211_v40 = vld [vmem:[#allocation51_spill] sm:$0xff]  ;;  %v8213_v29 = vld [vmem:[#allocation40_spill] sm:$0xff] }
 0x275   :  { %4657 = vmatprep.subr.bf16.mxu0 %v3627_v63  ;;  %v8210_v28 = vmax.f32 %v8209_v44, 0.0  ;;  %v8212_v27 = vmax.f32 %v8211_v40, 0.0  ;;  %v8214_v4 = vmax.f32 %v8213_v29, 0.0  ;;  %v8215_v22 = vld [vmem:[#allocation35_spill] sm:$0xff]  ;;  %v3583_v60 = vld [vmem:[%s7976_s2 + $0x18] sm:$0xff]  ;;  %v3683_v39 = vld [vmem:[#allocation5 + $0x18] sm:$0xff]  ;;  %v3633_v63 = vpack.c.bf16 %v3567_v1, %v3566_v47 }
 0x276   :  { %v3619_v8 = vpack.c.bf16 %v8208_v14, %v8206_v33  ;;  %v8216_v26 = vmax.f32 %v8215_v22, 0.0  ;;  %v3581_v10 = vld [vmem:[%s7976_s2 + $0x8] sm:$0xff]  ;;  %v8217_v3 = vld [vmem:[#allocation49_spill] sm:$0xff]  ;;  %v8219_v17 = vld [vmem:[#allocation48_spill] sm:$0xff] }
 0x277   :  { %v3628_v6 = vpack.c.bf16 %v8212_v27, %v8210_v28  ;;  %v8218_v0 = vmax.f32 %v8217_v3, 0.0  ;;  %v8220_v59 = vmax.f32 %v8219_v17, 0.0  ;;  %v3585_v34 = vpack.c.bf16 %v3583_v60, %v3581_v10  ;;  %v3681_v56 = vld [vmem:[#allocation5 + $0x8] sm:$0xff]  ;;  %v3680_v16 = vld [vmem:[#allocation5] sm:$0xff]  ;;  %v3682_v48 = vld [vmem:[#allocation5 + $0x10] sm:$0xff] }
 0x278   :  { %4658 = vmatpush3.bf16.msra.mxu0 %v3619_v8  ;;  %v3620_v45 = vpack.c.bf16 %v8216_v26, %v8214_v4  ;;  %3696 = vmatprep.subr.bf16.mxu1 %v3681_v56  ;;  %v8221_v57 = vld [vmem:[#allocation31_spill] sm:$0xff]  ;;  %v8223_v41 = vld [vmem:[#allocation32_spill] sm:$0xff]  ;;  %v8225_v31 = vld [vmem:[#allocation34_spill] sm:$0xff] }
 0x279   :  { %4659 = vmatprep.subr.bf16.mxu0 %v3628_v6  ;;  %v3629_v61 = vpack.c.bf16 %v8220_v59, %v8218_v0  ;;  %3666 = vmatprep.mubr.bf16.mxu0 %v3585_v34  ;;  %v8222_v52 = vmax.f32 %v8221_v57, 0.0  ;;  %v8224_v51 = vmax.f32 %v8223_v41, 0.0  ;;  %v3685_v21 = vld [vmem:[#allocation5 + $0x28] sm:$0xff]  ;;  %v8226_v2 = vmax.f32 %v8225_v31, 0.0  ;;  %v3684_v7 = vld [vmem:[#allocation5 + $0x20] sm:$0xff]  ;;  %v3687_v49 = vld [vmem:[#allocation5 + $0x38] sm:$0xff] }
 0x27a   :  { %3697 = vmatpush1.bf16.msra.mxu1 %v3680_v16  ;;  %v8227_v24 = vld [vmem:[#allocation24_spill] sm:$0xff]  ;;  %v8229_v20 = vld [vmem:[#allocation29_spill] sm:$0xff]  ;;  %v8233_v37 = vld [vmem:[#allocation27_spill] sm:$0xff] }
 0x27b   :  { %v3621_v36 = vpack.c.bf16 %v8224_v51, %v8222_v52  ;;  %3698 = vmatprep.subr.bf16.mxu1 %v3683_v39  ;;  %v8228_v30 = vmax.f32 %v8227_v24, 0.0  ;;  %v8230_v46 = vmax.f32 %v8229_v20, 0.0  ;;  %v8231_v19 = vld [vmem:[#allocation20_spill] sm:$0xff]  ;;  %v8234_v58 = vmax.f32 %v8233_v37, 0.0  ;;  %v8235_v5 = vld [vmem:[#allocation42_spill] sm:$0xff] }
 0x27c   :  { %4660 = vmatpush3.bf16.msra.mxu0 %v3620_v45  ;;  %v8232_v55 = vmax.f32 %v8231_v19, 0.0  ;;  %v3686_v23 = vld [vmem:[#allocation5 + $0x30] sm:$0xff]  ;;  %v3689_v42 = vld [vmem:[#allocation5 + $0x48] sm:$0xff]  ;;  %v8236_v32 = vmax.f32 %v8235_v5, 0.0  ;;  %v3688_v53 = vld [vmem:[#allocation5 + $0x40] sm:$0xff] }
 0x27d   :  { %4661 = vmatprep.subr.bf16.mxu0 %v3629_v61  ;;  %v3622_v11 = vpack.c.bf16 %v8228_v30, %v8226_v2  ;;  %v3691_v18 = vld [vmem:[#allocation5 + $0x58] sm:$0xff]  ;;  %v3582_v14 = vld [vmem:[%s7976_s2 + $0x10] sm:$0xff]  ;;  %v3690_v8 = vld [vmem:[#allocation5 + $0x50] sm:$0xff] }
 0x27e   :  { %3699 = vmatpush1.bf16.msra.mxu1 %v3682_v48  ;;  %v3623_v35 = vpack.c.bf16 %v8232_v55, %v8230_v46  ;;  %v3624_v43 = vpack.c.bf16 %v8236_v32, %v8234_v58  ;;  %v8237_v33 = vld [vmem:[#allocation38_spill] sm:$0xff]  ;;  %v3693_v47 = vld [vmem:[#allocation5 + $0x68] sm:$0xff]  ;;  %v3758_v27 = vld [vmem:[#allocation5 + $0x90] sm:$0xff] }
 0x27f   :  { %3700 = vmatprep.subr.bf16.mxu1 %v3685_v21  ;;  %v8238_v62 = vmax.f32 %v8237_v33, 0.0  ;;  %v8239_v9 = vld [vmem:[#allocation30_spill] sm:$0xff]  ;;  %v3757_v1 = vld [vmem:[#allocation5 + $0x88] sm:$0xff]  ;;  %v3762_v22 = vld [vmem:[#allocation5 + $0xb0] sm:$0xff] }
 0x280   :  { %4662 = vmatpush3.bf16.msra.mxu0 %v3621_v36  ;;  %v8240_v13 = vmax.f32 %v8239_v9, 0.0  ;;  %v3580_v50 = vld [vmem:[%s7976_s2] sm:$0xff]  ;;  %v3756_v28 = vld [vmem:[#allocation5 + $0x80] sm:$0xff]  ;;  %v3761_v6 = vld [vmem:[#allocation5 + $0xa8] sm:$0xff] }
 0x281   :  { %4663 = vmatprep.subr.bf16.mxu0 %v3630_v54  ;;  %v3584_v44 = vpack.c.bf16 %v3582_v14, %v3580_v50  ;;  %v3759_v40 = vld [vmem:[#allocation5 + $0x98] sm:$0xff]  ;;  %v3760_v29 = vld [vmem:[#allocation5 + $0xa0] sm:$0xff]  ;;  %v3765_v26 = vld [vmem:[#allocation5 + $0xc8] sm:$0xff] }
 0x282   :  { %3701 = vmatpush1.bf16.msra.mxu1 %v3684_v7  ;;  %v3625_v25 = vpack.c.bf16 %v8240_v13, %v8238_v62  ;;  %v3763_v4 = vld [vmem:[#allocation5 + $0xb8] sm:$0xff]  ;;  %v3764_v45 = vld [vmem:[#allocation5 + $0xc0] sm:$0xff]  ;;  %v3766_v60 = vld [vmem:[#allocation5 + $0xd0] sm:$0xff] }
 0x283   :  { %3702 = vmatprep.subr.bf16.mxu1 %v3687_v49  ;;  %v3767_v10 = vld [vmem:[#allocation5 + $0xd8] sm:$0xff]  ;;  %v3692_v3 = vld [vmem:[#allocation5 + $0x60] sm:$0xff]  ;;  %v3769_v0 = vld [vmem:[#allocation5 + $0xe8] sm:$0xff] }
 0x284   :  { %4664 = vmatpush3.bf16.msra.mxu0 %v3622_v11  ;;  %v3768_v17 = vld [vmem:[#allocation5 + $0xe0] sm:$0xff]  ;;  %v3695_v59 = vld [vmem:[#allocation5 + $0x78] sm:$0xff]  ;;  %v3694_v61 = vld [vmem:[#allocation5 + $0x70] sm:$0xff] }
 0x285   :  { %4665 = vmatprep.subr.bf16.mxu0 %v3631_v15  ;;  %v3771_v34 = vld [vmem:[#allocation5 + $0xf8] sm:$0xff]  ;;  %v3770_v56 = vld [vmem:[#allocation5 + $0xf0] sm:$0xff]  ;;  %v3837_v16 = vld [vmem:[#allocation5 + $0x108] sm:$0xff] }
 0x286   :  { %3703 = vmatpush1.bf16.msra.mxu1 %v3686_v23  ;;  %v3916_v39 = vld [vmem:[#allocation5 + $0x188] sm:$0xff]  ;;  %v3836_v31 = vld [vmem:[#allocation5 + $0x100] sm:$0xff]  ;;  %v3839_v2 = vld [vmem:[#allocation5 + $0x118] sm:$0xff] }
 0x287   :  { %3704 = vmatprep.subr.bf16.mxu1 %v3689_v42  ;;  %v3915_v30 = vld [vmem:[#allocation5 + $0x180] sm:$0xff]  ;;  %v3918_v11 = vld [vmem:[#allocation5 + $0x198] sm:$0xff]  ;;  %v3838_v7 = vld [vmem:[#allocation5 + $0x110] sm:$0xff] }
 0x288   :  { %4666 = vmatpush3.bf16.msra.mxu0 %v3623_v35  ;;  %v3841_v15 = vld [vmem:[#allocation5 + $0x128] sm:$0xff]  ;;  %v3917_v49 = vld [vmem:[#allocation5 + $0x190] sm:$0xff]  ;;  %v3840_v46 = vld [vmem:[#allocation5 + $0x120] sm:$0xff] }
 0x289   :  { %4667 = vmatprep.subr.bf16.mxu0 %v3632_v12  ;;  %v3920_v20 = vld [vmem:[#allocation5 + $0x1a8] sm:$0xff]  ;;  %v3843_v19 = vld [vmem:[#allocation5 + $0x138] sm:$0xff]  ;;  %v3919_v55 = vld [vmem:[#allocation5 + $0x1a0] sm:$0xff] }
 0x28a   :  { %3705 = vmatpush1.bf16.msra.mxu1 %v3688_v53  ;;  %v3922_v35 = vld [vmem:[#allocation5 + $0x1b8] sm:$0xff]  ;;  %v3842_v23 = vld [vmem:[#allocation5 + $0x130] sm:$0xff]  ;;  %v3845_v12 = vld [vmem:[#allocation5 + $0x148] sm:$0xff] }
 0x28b   :  { %3706 = vmatprep.subr.bf16.mxu1 %v3691_v18  ;;  %v3921_v42 = vld [vmem:[#allocation5 + $0x1b0] sm:$0xff]  ;;  %v3924_v37 = vld [vmem:[#allocation5 + $0x1c8] sm:$0xff]  ;;  %v3844_v58 = vld [vmem:[#allocation5 + $0x140] sm:$0xff] }
 0x28c   :  { %4668 = vmatpush3.bf16.msra.mxu0 %v3624_v43  ;;  %v3847_v5 = vld [vmem:[#allocation5 + $0x158] sm:$0xff]  ;;  %v3923_v32 = vld [vmem:[#allocation5 + $0x1c0] sm:$0xff]  ;;  %v3846_v53 = vld [vmem:[#allocation5 + $0x150] sm:$0xff] }
 0x28d   :  { %4669 = vmatprep.subr.bf16.mxu0 %v3633_v63  ;;  %v3926_v43 = vld [vmem:[#allocation5 + $0x1d8] sm:$0xff]  ;;  %v3849_v63 = vld [vmem:[#allocation5 + $0x168] sm:$0xff]  ;;  %v3925_v18 = vld [vmem:[#allocation5 + $0x1d0] sm:$0xff] }
 0x28e   :  { %3707 = vmatpush1.bf16.msra.mxu1 %v3690_v8  ;;  %v3928_v33 = vld [vmem:[#allocation5 + $0x1e8] sm:$0xff]  ;;  %v3848_v62 = vld [vmem:[#allocation5 + $0x160] sm:$0xff]  ;;  %v3851_v9 = vld [vmem:[#allocation5 + $0x178] sm:$0xff] }
 0x28f   :  { %3708 = vmatprep.subr.bf16.mxu1 %v3693_v47  ;;  %v3927_v13 = vld [vmem:[#allocation5 + $0x1e0] sm:$0xff]  ;;  %v3850_v50 = vld [vmem:[#allocation5 + $0x170] sm:$0xff]  ;;  %v3994_v14 = vld [vmem:[#allocation5 + $0x208] sm:$0xff] }
 0x290   :  { %4670 = vmatpush3.bf16.msra.mxu0 %v3625_v25  ;;  %v3930_v25 = vld [vmem:[#allocation5 + $0x1f8] sm:$0xff]  ;;  %v3929_v8 = vld [vmem:[#allocation5 + $0x1f0] sm:$0xff]  ;;  %v4072_v47 = vld [vmem:[#allocation5 + $0x288] sm:$0xff] }
 0x291   :  { %3776 = vmatprep.subr.bf16.mxu0 %v3757_v1 }
 0x292   :  { %3709 = vmatpush1.bf16.msra.mxu1 %v3692_v3  ;;  %v4078_v3 = vld [vmem:[#allocation5 + $0x2b8] sm:$0xff] }
 0x293   :  { %3667 = vmatmul.mubr.bf16.vlgmr.msra.gmra.mrb[0].mxu0 %v3584_v44  ;;  %3710 = vmatprep.subr.bf16.mxu1 %v3695_v59  ;;  %v3993_v44 = vld [vmem:[#allocation5 + $0x200] sm:$0xff]  ;;  %v4077_v59 = vld [vmem:[#allocation5 + $0x2b0] sm:$0xff] }
 0x294   :  { %3777 = vmatpush1.bf16.msra.mxu0 %v3756_v28  ;;  %3808 = vmatprep.mubr.bf16.mxu0 %v8204_v38  ;;  %v3996_v28 = vld [vmem:[#allocation5 + $0x218] sm:$0xff] }
 0x295   :  { %3778 = vmatprep.subr.bf16.mxu0 %v3759_v40 }
 0x296   :  { %3711 = vmatpush1.bf16.msra.mxu1 %v3694_v61  ;;  %v4080_v61 = vld [vmem:[#allocation5 + $0x2c8] sm:$0xff] }
 0x297   :  { %3855 = vmatprep.subr.bf16.mxu1 %v3837_v16  ;;  %v4079_v16 = vld [vmem:[#allocation5 + $0x2c0] sm:$0xff] }
 0x298   :  { %3779 = vmatpush1.bf16.msra.mxu0 %v3758_v27  ;;  %v4071_v27 = vld [vmem:[#allocation5 + $0x280] sm:$0xff] }
 0x299   :  { %3780 = vmatprep.subr.bf16.mxu0 %v3761_v6  ;;  %v4074_v6 = vld [vmem:[#allocation5 + $0x298] sm:$0xff] }
 0x29c   :  { %3781 = vmatpush1.bf16.msra.mxu0 %v3760_v29  ;;  %v3995_v29 = vld [vmem:[#allocation5 + $0x210] sm:$0xff] }
 0x29d   :  { %3782 = vmatprep.subr.bf16.mxu0 %v3763_v4  ;;  %v3998_v4 = vld [vmem:[#allocation5 + $0x228] sm:$0xff] }
 0x2a0   :  { %3783 = vmatpush1.bf16.msra.mxu0 %v3762_v22  ;;  %v4073_v22 = vld [vmem:[#allocation5 + $0x290] sm:$0xff] }
 0x2a1   :  { %3784 = vmatprep.subr.bf16.mxu0 %v3765_v26  ;;  %v4076_v26 = vld [vmem:[#allocation5 + $0x2a8] sm:$0xff] }
 0x2a4   :  { %3785 = vmatpush1.bf16.msra.mxu0 %v3764_v45  ;;  %v3997_v45 = vld [vmem:[#allocation5 + $0x220] sm:$0xff] }
 0x2a5   :  { %3786 = vmatprep.subr.bf16.mxu0 %v3767_v10  ;;  %v4000_v10 = vld [vmem:[#allocation5 + $0x238] sm:$0xff] }
 0x2a8   :  { %3787 = vmatpush1.bf16.msra.mxu0 %v3766_v60  ;;  %v4075_v60 = vld [vmem:[#allocation5 + $0x2a0] sm:$0xff] }
 0x2a9   :  { %3788 = vmatprep.subr.bf16.mxu0 %v3769_v0  ;;  %v3999_v0 = vld [vmem:[#allocation5 + $0x230] sm:$0xff] }
 0x2ac   :  { %3789 = vmatpush1.bf16.msra.mxu0 %v3768_v17  ;;  %v4002_v17 = vld [vmem:[#allocation5 + $0x248] sm:$0xff] }
 0x2ad   :  { %3790 = vmatprep.subr.bf16.mxu0 %v3771_v34  ;;  %v4001_v34 = vld [vmem:[#allocation5 + $0x240] sm:$0xff] }
 0x2b0   :  { %3791 = vmatpush1.bf16.msra.mxu0 %v3770_v56  ;;  %v4004_v56 = vld [vmem:[#allocation5 + $0x258] sm:$0xff] }
 0x2b1   :  { %3933 = vmatprep.subr.bf16.mxu0 %v3916_v39  ;;  %v4082_v39 = vld [vmem:[#allocation5 + $0x2d8] sm:$0xff] }
 0x366   :  { %v4671_v57 = vpop.f32.mrb[0].mxu0 }
 0x367   :  { %v4672_v52 = vpop.f32.mrb[1].mxu0 }
 0x368   :  { %v4673_v41 = vadd.f32 %v4672_v52, %v4671_v57  ;;  %v4674_v51 = vpop.f32.mrb[2].mxu0  ;;  %v4003_v57 = vld [vmem:[#allocation5 + $0x250] sm:$0xff]  ;;  %v4006_v52 = vld [vmem:[#allocation5 + $0x268] sm:$0xff] }
 0x369   :  { %v4675_v36 = vpop.f32.mrb[3].mxu0 }
 0x36a   :  { %v3675_v48 = vmul.f32 0.01, %v4673_v41  ;;  %v7899_v54 = vadd.f32 %v4675_v36, %v4674_v51  ;;  %v4081_v41 = vld [vmem:[#allocation5 + $0x2d0] sm:$0xff]  ;;  %v4084_v51 = vld [vmem:[#allocation5 + $0x2e8] sm:$0xff]  ;;  %v4005_v36 = vld [vmem:[#allocation5 + $0x260] sm:$0xff] }
 0x36c   :  { %v7901_v21 = vpack.c.bf16 %v3675_v48, %v3675_v48  ;;  %v4008_v48 = vld [vmem:[#allocation5 + $0x278] sm:$0xff] }
 0x36e   :  { %3729 = vmatmul.mubr.bf16.vlgmr.msra.gmra.mrb[0].mxu1 %v7901_v21  ;;  %v7905_v24 = vshrl.u32 %v7901_v21, 16  ;;  %v3853_v1 = vrot.slane %v7901_v21, 1 }
 0x36f   :  { %3856 = vmatpush1.bf16.msra.mxu1 %v3836_v31  ;;  %3887 = vmatprep.mubr.bf16.mxu1 %v8204_v38  ;;  %v4083_v31 = vld [vmem:[#allocation5 + $0x2e0] sm:$0xff] }
 0x370   :  { %3809 = vmatmul.mubr.bf16.vlgmr.msra.gmra.mrb[4].mxu0 %v7905_v24  ;;  %3857 = vmatprep.subr.bf16.mxu1 %v3839_v2  ;;  %v3931_v40 = vrot.slane %v7905_v24, 1  ;;  %v4086_v2 = vld [vmem:[#allocation5 + $0x2f8] sm:$0xff] }
 0x371   :  { %3934 = vmatpush1.bf16.msra.mxu0 %v3915_v30  ;;  %3965 = vmatprep.mubr.bf16.mxu0 %v8204_v38  ;;  %v4007_v30 = vld [vmem:[#allocation5 + $0x270] sm:$0xff] }
 0x372   :  { %3935 = vmatprep.subr.bf16.mxu0 %v3918_v11  ;;  %v4150_v11 = vld [vmem:[#allocation5 + $0x308] sm:$0xff] }
 0x373   :  { %3858 = vmatpush1.bf16.msra.mxu1 %v3838_v7  ;;  %v4085_v7 = vld [vmem:[#allocation5 + $0x2f0] sm:$0xff] }
 0x374   :  { %3859 = vmatprep.subr.bf16.mxu1 %v3841_v15  ;;  %v4228_v15 = vld [vmem:[#allocation5 + $0x388] sm:$0xff] }
 0x375   :  { %3936 = vmatpush1.bf16.msra.mxu0 %v3917_v49  ;;  %v4009_v49 = vrot.slane %v7901_v21, 2 }
 0x376   :  { %3937 = vmatprep.subr.bf16.mxu0 %v3920_v20  ;;  %v4149_v20 = vld [vmem:[#allocation5 + $0x300] sm:$0xff] }
 0x377   :  { %3860 = vmatpush1.bf16.msra.mxu1 %v3840_v46  ;;  %v4152_v46 = vld [vmem:[#allocation5 + $0x318] sm:$0xff] }
 0x378   :  { %3861 = vmatprep.subr.bf16.mxu1 %v3843_v19  ;;  %v4087_v19 = vrot.slane %v7905_v24, 2 }
 0x379   :  { %3938 = vmatpush1.bf16.msra.mxu0 %v3919_v55  ;;  %v4227_v55 = vld [vmem:[#allocation5 + $0x380] sm:$0xff] }
 0x37a   :  { %3939 = vmatprep.subr.bf16.mxu0 %v3922_v35  ;;  %v4230_v35 = vld [vmem:[#allocation5 + $0x398] sm:$0xff] }
 0x37b   :  { %3862 = vmatpush1.bf16.msra.mxu1 %v3842_v23  ;;  %v4151_v23 = vld [vmem:[#allocation5 + $0x310] sm:$0xff] }
 0x37c   :  { %3863 = vmatprep.subr.bf16.mxu1 %v3845_v12  ;;  %v4154_v12 = vld [vmem:[#allocation5 + $0x328] sm:$0xff] }
 0x37d   :  { %3940 = vmatpush1.bf16.msra.mxu0 %v3921_v42  ;;  %v4229_v42 = vld [vmem:[#allocation5 + $0x390] sm:$0xff] }
 0x37e   :  { %3941 = vmatprep.subr.bf16.mxu0 %v3924_v37  ;;  %v4232_v37 = vld [vmem:[#allocation5 + $0x3a8] sm:$0xff] }
 0x37f   :  { %3864 = vmatpush1.bf16.msra.mxu1 %v3844_v58  ;;  %v4153_v58 = vld [vmem:[#allocation5 + $0x320] sm:$0xff] }
 0x380   :  { %3865 = vmatprep.subr.bf16.mxu1 %v3847_v5  ;;  %v4156_v5 = vld [vmem:[#allocation5 + $0x338] sm:$0xff] }
 0x381   :  { %3942 = vmatpush1.bf16.msra.mxu0 %v3923_v32  ;;  %v4231_v32 = vld [vmem:[#allocation5 + $0x3a0] sm:$0xff] }
 0x382   :  { %3943 = vmatprep.subr.bf16.mxu0 %v3926_v43  ;;  %v4234_v43 = vld [vmem:[#allocation5 + $0x3b8] sm:$0xff] }
 0x383   :  { %3866 = vmatpush1.bf16.msra.mxu1 %v3846_v53  ;;  %v4155_v53 = vld [vmem:[#allocation5 + $0x330] sm:$0xff] }
 0x384   :  { %3867 = vmatprep.subr.bf16.mxu1 %v3849_v63  ;;  %v4158_v63 = vld [vmem:[#allocation5 + $0x348] sm:$0xff] }
 0x385   :  { %3944 = vmatpush1.bf16.msra.mxu0 %v3925_v18  ;;  %v4233_v18 = vld [vmem:[#allocation5 + $0x3b0] sm:$0xff] }
 0x386   :  { %3945 = vmatprep.subr.bf16.mxu0 %v3928_v33  ;;  %v4236_v33 = vld [vmem:[#allocation5 + $0x3c8] sm:$0xff] }
 0x387   :  { %3868 = vmatpush1.bf16.msra.mxu1 %v3848_v62  ;;  %v4157_v62 = vld [vmem:[#allocation5 + $0x340] sm:$0xff] }
 0x388   :  { %3869 = vmatprep.subr.bf16.mxu1 %v3851_v9  ;;  %v4160_v9 = vld [vmem:[#allocation5 + $0x358] sm:$0xff] }
 0x389   :  { %3946 = vmatpush1.bf16.msra.mxu0 %v3927_v13  ;;  %v4235_v13 = vld [vmem:[#allocation5 + $0x3c0] sm:$0xff] }
 0x38a   :  { %3947 = vmatprep.subr.bf16.mxu0 %v3930_v25  ;;  %v4238_v25 = vld [vmem:[#allocation5 + $0x3d8] sm:$0xff] }
 0x38b   :  { %3870 = vmatpush1.bf16.msra.mxu1 %v3850_v50  ;;  %v4159_v50 = vld [vmem:[#allocation5 + $0x350] sm:$0xff] }
 0x38c   :  { %4011 = vmatprep.subr.bf16.mxu1 %v3994_v14  ;;  %v4162_v14 = vld [vmem:[#allocation5 + $0x368] sm:$0xff] }
 0x38d   :  { %3948 = vmatpush1.bf16.msra.mxu0 %v3929_v8  ;;  %v4237_v8 = vld [vmem:[#allocation5 + $0x3d0] sm:$0xff] }
 0x38e   :  { %3888 = vmatmul.mubr.bf16.vlgmr.msra.gmra.mrb[4].mxu1 %v3853_v1  ;;  %4089 = vmatprep.subr.bf16.mxu0 %v4072_v47  ;;  %v4240_v47 = vld [vmem:[#allocation5 + $0x3e8] sm:$0xff]  ;;  %v4161_v1 = vld [vmem:[#allocation5 + $0x360] sm:$0xff] }
 0x38f   :  { %4012 = vmatpush1.bf16.msra.mxu1 %v3993_v44  ;;  %4043 = vmatprep.mubr.bf16.mxu1 %v8204_v38  ;;  %v4164_v44 = vld [vmem:[#allocation5 + $0x378] sm:$0xff] }
 0x390   :  { %3966 = vmatmul.mubr.bf16.vlgmr.msra.gmra.mrb[8].mxu0 %v3931_v40  ;;  %4013 = vmatprep.subr.bf16.mxu1 %v3996_v28  ;;  %v4239_v28 = vld [vmem:[#allocation5 + $0x3e0] sm:$0xff]  ;;  %v4242_v40 = vld [vmem:[#allocation5 + $0x3f8] sm:$0xff] }
 0x391   :  { %4090 = vmatpush1.bf16.msra.mxu0 %v4071_v27  ;;  %4121 = vmatprep.mubr.bf16.mxu0 %v8204_v38  ;;  %v4163_v27 = vld [vmem:[#allocation5 + $0x370] sm:$0xff] }
 0x392   :  { %4091 = vmatprep.subr.bf16.mxu0 %v4074_v6  ;;  %v4307_v6 = vld [vmem:[#allocation5 + $0x408] sm:$0xff] }
 0x393   :  { %4014 = vmatpush1.bf16.msra.mxu1 %v3995_v29  ;;  %v4241_v29 = vld [vmem:[#allocation5 + $0x3f0] sm:$0xff] }
 0x394   :  { %4015 = vmatprep.subr.bf16.mxu1 %v3998_v4  ;;  %v4165_v4 = vrot.slane %v7901_v21, 3  ;;  %v4312_v21 = vld [vmem:[#allocation5 + $0x430] sm:$0xff] }
 0x395   :  { %4092 = vmatpush1.bf16.msra.mxu0 %v4073_v22  ;;  %v4306_v22 = vld [vmem:[#allocation5 + $0x400] sm:$0xff] }
 0x396   :  { %4093 = vmatprep.subr.bf16.mxu0 %v4076_v26  ;;  %v4309_v26 = vld [vmem:[#allocation5 + $0x418] sm:$0xff] }
 0x397   :  { %4016 = vmatpush1.bf16.msra.mxu1 %v3997_v45  ;;  %v4243_v45 = vrot.slane %v7905_v24, 3  ;;  %v4316_v24 = vld [vmem:[#allocation5 + $0x450] sm:$0xff] }
 0x398   :  { %4017 = vmatprep.subr.bf16.mxu1 %v4000_v10  ;;  %v4308_v10 = vld [vmem:[#allocation5 + $0x410] sm:$0xff] }
 0x399   :  { %4094 = vmatpush1.bf16.msra.mxu0 %v4075_v60  ;;  %v4311_v60 = vld [vmem:[#allocation5 + $0x428] sm:$0xff] }
 0x39a   :  { %4095 = vmatprep.subr.bf16.mxu0 %v4078_v3  ;;  %v4310_v3 = vld [vmem:[#allocation5 + $0x420] sm:$0xff] }
 0x39b   :  { %4018 = vmatpush1.bf16.msra.mxu1 %v3999_v0  ;;  %v4313_v0 = vld [vmem:[#allocation5 + $0x438] sm:$0xff] }
 0x39c   :  { %4019 = vmatprep.subr.bf16.mxu1 %v4002_v17  ;;  %v4315_v17 = vld [vmem:[#allocation5 + $0x448] sm:$0xff] }
 0x39d   :  { %4096 = vmatpush1.bf16.msra.mxu0 %v4077_v59  ;;  %v4314_v59 = vld [vmem:[#allocation5 + $0x440] sm:$0xff] }
 0x39e   :  { %4097 = vmatprep.subr.bf16.mxu0 %v4080_v61  ;;  %v4317_v61 = vld [vmem:[#allocation5 + $0x458] sm:$0xff] }
 0x39f   :  { %4020 = vmatpush1.bf16.msra.mxu1 %v4001_v34  ;;  %v4318_v34 = vld [vmem:[#allocation5 + $0x460] sm:$0xff] }
 0x3a0   :  { %4021 = vmatprep.subr.bf16.mxu1 %v4004_v56  ;;  %v4321_v56 = vld [vmem:[#allocation5 + $0x478] sm:$0xff] }
 0x3a1   :  { %4098 = vmatpush1.bf16.msra.mxu0 %v4079_v16  ;;  %v3676_v16 = vmul.f32 0.01, %v7899_v54 }
 0x3a2   :  { %4099 = vmatprep.subr.bf16.mxu0 %v4082_v39  ;;  %v4320_v39 = vld [vmem:[#allocation5 + $0x470] sm:$0xff] }
 0x3a3   :  { %4022 = vmatpush1.bf16.msra.mxu1 %v4003_v57  ;;  %v4305_v57 = vpack.c.bf16 %v3676_v16, %v3676_v16 }
 0x3a4   :  { %4023 = vmatprep.subr.bf16.mxu1 %v4006_v52  ;;  %v4853_v52 = vmov 1966171168  }
 0x3a5   :  { %4100 = vmatpush1.bf16.msra.mxu0 %v4081_v41  ;;  %v3741_v41 = vunpack.c.l.s4 %v4853_v52 }
 0x3a6   :  { %4101 = vmatprep.subr.bf16.mxu0 %v4084_v51 }
 0x3a7   :  { %4024 = vmatpush1.bf16.msra.mxu1 %v4005_v36  ;;  %v3742_v51 = vunpack.c.0.s8 %v3741_v41 }
 0x3a8   :  { %4025 = vmatprep.subr.bf16.mxu1 %v4008_v48  ;;  %v8241_v48 = vld [vmem:[#allocation15_spill] sm:$0xff] }
 0x3a9   :  { %4102 = vmatpush1.bf16.msra.mxu0 %v4083_v31  ;;  %v7923_v31 = vsub.s32 %v3742_v51, %v8241_v48 }
 0x3aa   :  { %4103 = vmatprep.subr.bf16.mxu0 %v4086_v2 }
 0x3ab   :  { %4026 = vmatpush1.bf16.msra.mxu1 %v4007_v30 }
 0x3ac   :  { %4167 = vmatprep.subr.bf16.mxu1 %v4150_v11 }
 0x3ad   :  { %4104 = vmatpush1.bf16.msra.mxu0 %v4085_v7 }
 0x3ae   :  { %4044 = vmatmul.mubr.bf16.vlgmr.msra.gmra.mrb[8].mxu1 %v4009_v49  ;;  %4245 = vmatprep.subr.bf16.mxu0 %v4228_v15 }
 0x3af   :  { %4168 = vmatpush1.bf16.msra.mxu1 %v4149_v20  ;;  %4199 = vmatprep.mubr.bf16.mxu1 %v8204_v38 }
 0x3b0   :  { %4122 = vmatmul.mubr.bf16.vlgmr.msra.gmra.mrb[12].mxu0 %v4087_v19  ;;  %4169 = vmatprep.subr.bf16.mxu1 %v4152_v46  ;;  %v4647_v19 = vld [vmem:[%s7976_s2 + $0x20] ss:$8 sm:$0x3] }
 0x3b1   :  { %4246 = vmatpush1.bf16.msra.mxu0 %v4227_v55  ;;  %4277 = vmatprep.mubr.bf16.mxu0 %v8204_v38 }
 0x3b2   :  { %4247 = vmatprep.subr.bf16.mxu0 %v4230_v35 }
 0x3b3   :  { %4170 = vmatpush1.bf16.msra.mxu1 %v4151_v23 }
 0x3b4   :  { %4171 = vmatprep.subr.bf16.mxu1 %v4154_v12 }
 0x3b5   :  { %4248 = vmatpush1.bf16.msra.mxu0 %v4229_v42 }
 0x3b6   :  { %4249 = vmatprep.subr.bf16.mxu0 %v4232_v37 }
 0x3b7   :  { %4172 = vmatpush1.bf16.msra.mxu1 %v4153_v58 }
 0x3b8   :  { %4173 = vmatprep.subr.bf16.mxu1 %v4156_v5 }
 0x3b9   :  { %4250 = vmatpush1.bf16.msra.mxu0 %v4231_v32 }
 0x3ba   :  { %4251 = vmatprep.subr.bf16.mxu0 %v4234_v43 }
 0x3bb   :  { %4174 = vmatpush1.bf16.msra.mxu1 %v4155_v53 }
 0x3bc   :  { %4175 = vmatprep.subr.bf16.mxu1 %v4158_v63 }
 0x3bd   :  { %4252 = vmatpush1.bf16.msra.mxu0 %v4233_v18 }
 0x3be   :  { %4253 = vmatprep.subr.bf16.mxu0 %v4236_v33 }
 0x3bf   :  { %4176 = vmatpush1.bf16.msra.mxu1 %v4157_v62 }
 0x3c0   :  { %4177 = vmatprep.subr.bf16.mxu1 %v4160_v9 }
 0x3c1   :  { %4254 = vmatpush1.bf16.msra.mxu0 %v4235_v13 }
 0x3c2   :  { %4255 = vmatprep.subr.bf16.mxu0 %v4238_v25 }
 0x3c3   :  { %4178 = vmatpush1.bf16.msra.mxu1 %v4159_v50 }
 0x3c4   :  { %4179 = vmatprep.subr.bf16.mxu1 %v4162_v14 }
 0x3c5   :  { %4256 = vmatpush1.bf16.msra.mxu0 %v4237_v8 }
 0x3c6   :  { %4257 = vmatprep.subr.bf16.mxu0 %v4240_v47 }
 0x3c7   :  { %4180 = vmatpush1.bf16.msra.mxu1 %v4161_v1 }
 0x3c8   :  { %4181 = vmatprep.subr.bf16.mxu1 %v4164_v44 }
 0x3c9   :  { %4258 = vmatpush1.bf16.msra.mxu0 %v4239_v28 }
 0x3ca   :  { %4259 = vmatprep.subr.bf16.mxu0 %v4242_v40 }
 0x3cb   :  { %4182 = vmatpush1.bf16.msra.mxu1 %v4163_v27 }
 0x3cc   :  { %4322 = vmatprep.subr.bf16.mxu1 %v4307_v6 }
 0x3cd   :  { %4260 = vmatpush1.bf16.msra.mxu0 %v4241_v29 }
 0x3ce   :  { %4200 = vmatmul.mubr.bf16.vlgmr.msra.gmra.mrb[12].mxu1 %v4165_v4 }
 0x3cf   :  { %4323 = vmatpush1.bf16.msra.mxu1 %v4306_v22  ;;  %4354 = vmatprep.mubr.bf16.mxu1 %v8204_v38  ;;  %v4319_v38 = vld [vmem:[#allocation5 + $0x468] sm:$0xff] }
 0x3d0   :  { %4278 = vmatmul.mubr.bf16.vlgmr.msra.gmra.mrb[16].mxu0 %v4243_v45  ;;  %4324 = vmatprep.subr.bf16.mxu1 %v4309_v26 }
 0x3d3   :  { %4325 = vmatpush1.bf16.msra.mxu1 %v4308_v10 }
 0x3d4   :  { %4326 = vmatprep.subr.bf16.mxu1 %v4311_v60 }
 0x3d7   :  { %4327 = vmatpush1.bf16.msra.mxu1 %v4310_v3 }
 0x3d8   :  { %4328 = vmatprep.subr.bf16.mxu1 %v4313_v0 }
 0x3db   :  { %4329 = vmatpush1.bf16.msra.mxu1 %v4312_v21 }
 0x3dc   :  { %4330 = vmatprep.subr.bf16.mxu1 %v4315_v17 }
 0x3df   :  { %4331 = vmatpush1.bf16.msra.mxu1 %v4314_v59 }
 0x3e0   :  { %4332 = vmatprep.subr.bf16.mxu1 %v4317_v61 }
 0x3e3   :  { %4333 = vmatpush1.bf16.msra.mxu1 %v4316_v24 }
 0x3e4   :  { %4334 = vmatprep.subr.bf16.mxu1 %v4319_v38 }
 0x3e7   :  { %4335 = vmatpush1.bf16.msra.mxu1 %v4318_v34 }
 0x3e8   :  { %4336 = vmatprep.subr.bf16.mxu1 %v4321_v56 }
 0x3eb   :  { %4337 = vmatpush1.bf16.msra.mxu1 %v4320_v39 }
 0x3ee   :  { %4355 = vmatmul.mubr.bf16.vlgmr.msra.gmra.mrb[16].mxu1 %v4305_v57 }
 0x441   :  { %v3730_v36 = vpop.f32.mrb[0].mxu1 }
 0x442   :  { %v3732_v2 = vpop.f32.mrb[1].mxu1 }
 0x443   :  { %v3739_v30 = vcombine.low %v3730_v36, %v3732_v2  ;;  %v3734_v11 = vpop.f32.mrb[2].mxu1  ;;  %v3810_v7 = vpop.f32.mrb[4].mxu0 }
 0x444   :  { %v3735_v15 = vpop.f32.mrb[3].mxu1  ;;  %v3812_v49 = vpop.f32.mrb[5].mxu0 }
 0x445   :  { %v3746_v54 = vrot.slane %v3739_v30, %v7923_v31  ;;  %v3819_v20 = vcombine.low %v3810_v7, %v3812_v49  ;;  %v3814_v46 = vpop.f32.mrb[6].mxu0 }
 0x446   :  { %v3815_v55 = vpop.f32.mrb[7].mxu0 }
 0x447   :  { %v3753_v35 = vrot.slane %v3746_v54, %v7923_v31  ;;  %v3826_v23 = vrot.slane %v3819_v20, %v7923_v31 }
 0x449   :  { %v3755_v12 = vadd.f32 %v4647_v19, %v3753_v35  ;;  %v3833_v42 = vrot.slane %v3826_v23, %v7923_v31 }
 0x44b   :  { %v3835_v37 = vadd.f32 %v3833_v42, %v3755_v12 }
 0x461   :  { %v3889_v58 = vpop.f32.mrb[4].mxu1 }
 0x462   :  { %v3891_v5 = vpop.f32.mrb[5].mxu1 }
 0x463   :  { %v3898_v32 = vcombine.low %v3889_v58, %v3891_v5  ;;  %v3893_v43 = vpop.f32.mrb[6].mxu1  ;;  %v3967_v53 = vpop.f32.mrb[8].mxu0 }
 0x464   :  { %v3894_v63 = vpop.f32.mrb[7].mxu1  ;;  %v3969_v18 = vpop.f32.mrb[9].mxu0 }
 0x465   :  { %v3905_v33 = vrot.slane %v3898_v32, %v7923_v31  ;;  %v3976_v62 = vcombine.low %v3967_v53, %v3969_v18  ;;  %v3971_v9 = vpop.f32.mrb[10].mxu0 }
 0x466   :  { %v3972_v13 = vpop.f32.mrb[11].mxu0 }
 0x467   :  { %v3912_v25 = vrot.slane %v3905_v33, %v7923_v31  ;;  %v3983_v50 = vrot.slane %v3976_v62, %v7923_v31 }
 0x469   :  { %v3914_v14 = vadd.f32 %v3912_v25, %v3835_v37  ;;  %v3990_v8 = vrot.slane %v3983_v50, %v7923_v31 }
 0x46b   :  { %v3992_v47 = vadd.f32 %v3990_v8, %v3914_v14 }
 0x481   :  { %v4045_v1 = vpop.f32.mrb[8].mxu1 }
 0x482   :  { %v4047_v44 = vpop.f32.mrb[9].mxu1 }
 0x483   :  { %v4054_v28 = vcombine.low %v4045_v1, %v4047_v44  ;;  %v4049_v40 = vpop.f32.mrb[10].mxu1  ;;  %v4123_v27 = vpop.f32.mrb[12].mxu0 }
 0x484   :  { %v4050_v6 = vpop.f32.mrb[11].mxu1  ;;  %v4125_v29 = vpop.f32.mrb[13].mxu0 }
 0x485   :  { %v4061_v4 = vrot.slane %v4054_v28, %v7923_v31  ;;  %v4132_v22 = vcombine.low %v4123_v27, %v4125_v29  ;;  %v4127_v26 = vpop.f32.mrb[14].mxu0 }
 0x486   :  { %v4128_v45 = vpop.f32.mrb[15].mxu0 }
 0x487   :  { %v4068_v10 = vrot.slane %v4061_v4, %v7923_v31  ;;  %v4139_v60 = vrot.slane %v4132_v22, %v7923_v31 }
 0x489   :  { %v4070_v3 = vadd.f32 %v4068_v10, %v3992_v47  ;;  %v4146_v0 = vrot.slane %v4139_v60, %v7923_v31 }
 0x48b   :  { %v4148_v21 = vadd.f32 %v4146_v0, %v4070_v3 }
 0x4a1   :  { %v4201_v17 = vpop.f32.mrb[12].mxu1 }
 0x4a2   :  { %v4203_v59 = vpop.f32.mrb[13].mxu1 }
 0x4a3   :  { %v4210_v61 = vcombine.low %v4201_v17, %v4203_v59  ;;  %v4205_v24 = vpop.f32.mrb[14].mxu1  ;;  %v4279_v38 = vpop.f32.mrb[16].mxu0 }
 0x4a4   :  { %v4206_v34 = vpop.f32.mrb[15].mxu1  ;;  %v4281_v56 = vpop.f32.mrb[17].mxu0 }
 0x4a5   :  { %v4217_v16 = vrot.slane %v4210_v61, %v7923_v31  ;;  %v4288_v39 = vcombine.low %v4279_v38, %v4281_v56  ;;  %v4283_v57 = vpop.f32.mrb[18].mxu0 }
 0x4a6   :  { %v4284_v52 = vpop.f32.mrb[19].mxu0 }
 0x4a7   :  { %v4224_v41 = vrot.slane %v4217_v16, %v7923_v31  ;;  %v4295_v51 = vrot.slane %v4288_v39, %v7923_v31 }
 0x4a9   :  { %v4226_v36 = vadd.f32 %v4224_v41, %v4148_v21  ;;  %v4302_v48 = vrot.slane %v4295_v51, %v7923_v31 }
 0x4ab   :  { %v4304_v2 = vadd.f32 %v4302_v48, %v4226_v36 }
 0x4c1   :  { %v4356_v30 = vpop.f32.mrb[16].mxu1 }
 0x4c2   :  { %v4358_v11 = vpop.f32.mrb[17].mxu1 }
 0x4c3   :  { %v4365_v7 = vcombine.low %v4356_v30, %v4358_v11  ;;  %v4360_v15 = vpop.f32.mrb[18].mxu1 }
 0x4c4   :  { %v4361_v49 = vpop.f32.mrb[19].mxu1 }
 0x4c5   :  { %v4372_v54 = vrot.slane %v4365_v7, %v7923_v31 }
 0x4c7   :  { %v4379_v20 = vrot.slane %v4372_v54, %v7923_v31 }
 0x4c9   :  { %v7946_v46 = vadd.f32 %v4379_v20, %v4304_v2 }
 0x4ca   :  { %4848 = dma.done.wait [#allocation7 + $0x1], 5120 }
 0x4cb   :  { %4849 = vsyncadd [#allocation7 + $0x1], 4294962176  ;;  %v8242_v19 = vld [vmem:[#allocation17_spill] sm:$0xff]  ;;  %vm4429_vm0 = vcmask 998400   ;;  %v4854_v35 = vmov 0.0|0.0   ;;  %v4401_v23 = vld [vmem:[#allocation6 + $0x80] sm:$0xff] }
 0x4cc   :  { %v4427_v55 = vrot.slane %v7946_v46, %v8242_v19  ;;  %4773 = vmatprep.subr.bf16.mxu1 %v4854_v35  ;;  %v4402_v12 = vld [vmem:[#allocation6 + $0x88] sm:$0xff]  ;;  %v4385_v42 = vld [vmem:[#allocation6] sm:$0xff]  ;;  %v4403_v5 = vld [vmem:[#allocation6 + $0x90] sm:$0xff]  ;;  %vm4432_vm1 = vcmask 1041408   ;;  %vm4855_vm2 = vmmov 1   ;;  %vm4856_vm4 = vmmov 0  }
 0x4cd   :  { %v4740_v37 = vpack.c.bf16 %v4402_v12, %v4401_v23  ;;  %v4386_v58 = vld [vmem:[#allocation6 + $0x8] sm:$0xff]  ;;  %v4404_v32 = vld [vmem:[#allocation6 + $0x98] sm:$0xff]  ;;  %v4387_v53 = vld [vmem:[#allocation6 + $0x10] sm:$0xff]  ;;  %v4857_v23 = vmov 0.0   ;;  %vm4515_vm5 = vcmask 523264   ;;  %s4858_s23 = smov [#allocation8]  }
 0x4ce   :  { %4650 = vmatprep.mubr.msk.f32.mxu0 %vm4429_vm0, %v4427_v55  ;;  %v4742_v31 = vpack.c.bf16 %v4386_v58, %v4385_v42  ;;  %v4744_v43 = vpack.c.bf16 %v4404_v32, %v4403_v5  ;;  %v4388_v63 = vld [vmem:[#allocation6 + $0x18] sm:$0xff]  ;;  %v4405_v18 = vld [vmem:[#allocation6 + $0xa0] sm:$0xff]  ;;  %v4406_v33 = vld [vmem:[#allocation6 + $0xa8] sm:$0xff]  ;;  %4737 = vmatprep.mubr.msk.f32.mxu1 %vm4856_vm4, %v4857_v23  ;;  %s4600_s24 = sshll.u32 %s4858_s23, 4  ;;  %vm4592_vm6 = vcmask 73728   ;;  %s4601_s24 = int_to_ptr.vmem [resolvable:$true] %s4600_s24 }
 0x4cf   :  { %4741 = vmatprep.subr.bf16.mxu0 %v4740_v37  ;;  %v4746_v62 = vpack.c.bf16 %v4388_v63, %v4387_v53  ;;  %v4748_v9 = vpack.c.bf16 %v4406_v33, %v4405_v18  ;;  %v4389_v13 = vld [vmem:[#allocation6 + $0x20] sm:$0xff]  ;;  %v4390_v25 = vld [vmem:[#allocation6 + $0x28] sm:$0xff]  ;;  %v4407_v50 = vld [vmem:[#allocation6 + $0xb0] sm:$0xff]  ;;  %s4824_s25 = scalar_lea.vmem %s4601_s24, 16  ;;  %s4828_s26 = scalar_lea.vmem %s4601_s24, 32 }
 0x4d0   :  { %4743 = vmatpush3.bf16.msra.mxu0 %v4742_v31  ;;  %v4408_v14 = vld [vmem:[#allocation6 + $0xb8] sm:$0xff]  ;;  %v4750_v8 = vpack.c.bf16 %v4390_v25, %v4389_v13  ;;  %v4391_v1 = vld [vmem:[#allocation6 + $0x30] sm:$0xff]  ;;  %v4409_v28 = vld [vmem:[#allocation6 + $0xc0] sm:$0xff]  ;;  %p4825_p0 = scmp.ne.s32.totalorder %s4601_s24, %s4824_s25  ;;  %p4829_p1 = scmp.lt.s32.totalorder %s4601_s24, %s4601_s24 }
 0x4d1   :  { %4745 = vmatprep.subr.bf16.mxu0 %v4744_v43  ;;  %v4752_v47 = vpack.c.bf16 %v4408_v14, %v4407_v50  ;;  %v4392_v44 = vld [vmem:[#allocation6 + $0x38] sm:$0xff]  ;;  %v4410_v40 = vld [vmem:[#allocation6 + $0xc8] sm:$0xff]  ;;  %v4507_v27 = vld [vmem:[#allocation6 + $0x100] sm:$0xff]  ;;  %p4830_p2 = scmp.lt.s32.totalorder %s4828_s26, %s4824_s25 }
 0x4d2   :  { %v4508_v6 = vld [vmem:[#allocation6 + $0x108] sm:$0xff]  ;;  %v4509_v29 = vld [vmem:[#allocation6 + $0x110] sm:$0xff]  ;;  %v4510_v4 = vld [vmem:[#allocation6 + $0x118] sm:$0xff]  ;;  %v4754_v22 = vpack.c.bf16 %v4392_v44, %v4391_v1  ;;  %v4756_v45 = vpack.c.bf16 %v4410_v40, %v4409_v28 }
 0x4d3   :  { %v4774_v26 = vpack.c.bf16 %v4508_v6, %v4507_v27  ;;  %v4393_v10 = vld [vmem:[#allocation6 + $0x40] sm:$0xff]  ;;  %v4394_v60 = vld [vmem:[#allocation6 + $0x48] sm:$0xff]  ;;  %v4411_v3 = vld [vmem:[#allocation6 + $0xd0] sm:$0xff]  ;;  %v4777_v21 = vpack.c.bf16 %v4510_v4, %v4509_v29  ;;  %p4831_p3 = por %p4830_p2, %p4829_p1 }
 0x4d4   :  { %4747 = vmatpush3.bf16.msra.mxu0 %v4746_v62  ;;  %v4412_v0 = vld [vmem:[#allocation6 + $0xd8] sm:$0xff]  ;;  %v4758_v17 = vpack.c.bf16 %v4394_v60, %v4393_v10  ;;  %v4395_v61 = vld [vmem:[#allocation6 + $0x50] sm:$0xff]  ;;  %v4413_v38 = vld [vmem:[#allocation6 + $0xe0] sm:$0xff] }
 0x4d5   :  { %4749 = vmatprep.subr.bf16.mxu0 %v4748_v9  ;;  %4775 = vmatpush3.bf16.msra.mxu1 %v4774_v26  ;;  %v4760_v59 = vpack.c.bf16 %v4412_v0, %v4411_v3  ;;  %v4396_v24 = vld [vmem:[#allocation6 + $0x58] sm:$0xff]  ;;  %v4414_v34 = vld [vmem:[#allocation6 + $0xe8] sm:$0xff]  ;;  %v4397_v39 = vld [vmem:[#allocation6 + $0x60] sm:$0xff]  ;;  %p4832_p4 = pnand %p4831_p3, %p4825_p0 }
 0x4d6   :  { %4776 = vmatprep.subr.bf16.mxu1 %v4854_v35  ;;  %v4762_v56 = vpack.c.bf16 %v4396_v24, %v4395_v61  ;;  %v4764_v16 = vpack.c.bf16 %v4414_v34, %v4413_v38  ;;  %v4398_v57 = vld [vmem:[#allocation6 + $0x68] sm:$0xff]  ;;  %v4415_v52 = vld [vmem:[#allocation6 + $0xf0] sm:$0xff]  ;;  %v4416_v41 = vld [vmem:[#allocation6 + $0xf8] sm:$0x3] }
 0x4d7   :  { %v4766_v51 = vpack.c.bf16 %v4398_v57, %v4397_v39  ;;  %v4768_v36 = vpack.c.bf16 %v4416_v41, %v4415_v52  ;;  %v4399_v48 = vld [vmem:[#allocation6 + $0x70] sm:$0xff]  ;;  %v4400_v2 = vld [vmem:[#allocation6 + $0x78] sm:$0xff]  ;;  %vm4769_vm3 = vmpackc.low %vm4432_vm1, %vm4855_vm2 }
 0x4d8   :  { %4751 = vmatpush3.bf16.msra.mxu0 %v4750_v8  ;;  %v4771_v30 = vpack.c.bf16 %v4400_v2, %v4399_v48  ;;  %v8243_v11 = vld [vmem:[#allocation16_spill] sm:$0xff]  ;;  %v4511_v15 = vld [vmem:[#allocation6 + $0x120] sm:$0xff]  ;;  %v4514_v19 = vld [vmem:[#allocation6 + $0x138] sm:$0xff] }
 0x4d9   :  { %4753 = vmatprep.subr.bf16.mxu0 %v4752_v47  ;;  %4778 = vmatpush3.bf16.msra.mxu1 %v4777_v21  ;;  %v4423_v7 = vrot.slane %v7946_v46, %v8243_v11  ;;  %v4512_v49 = vld [vmem:[#allocation6 + $0x128] sm:$0xff]  ;;  %v4513_v20 = vld [vmem:[#allocation6 + $0x130] sm:$0xff]  ;;  %v4648_v46 = vld [vmem:[%s7976_s2 + $0x21] ss:$8 sm:$0x3] }
 0x4da   :  { %4779 = vmatprep.subr.bf16.mxu1 %v4854_v35  ;;  %v4780_v54 = vpack.c.bf16 %v4512_v49, %v4511_v15  ;;  %v4783_v55 = vpack.c.bf16 %v4514_v19, %v4513_v20 }
 0x4dc   :  { %4755 = vmatpush3.bf16.msra.mxu0 %v4754_v22 }
 0x4dd   :  { %4757 = vmatprep.subr.bf16.mxu0 %v4756_v45  ;;  %4781 = vmatpush3.bf16.msra.mxu1 %v4780_v54 }
 0x4de   :  { %4782 = vmatprep.subr.bf16.mxu1 %v4854_v35  ;;  %v4652_v35 = vld [vmem:[%s7976_s2 + $0x22] ss:$8 sm:$0x3] }
 0x4e0   :  { %4759 = vmatpush3.bf16.msra.mxu0 %v4758_v17 }
 0x4e1   :  { %4761 = vmatprep.subr.bf16.mxu0 %v4760_v59  ;;  %4784 = vmatpush3.bf16.msra.mxu1 %v4783_v55 }
 0x4e4   :  { %4763 = vmatpush3.bf16.msra.mxu0 %v4762_v56 }
 0x4e5   :  { %4765 = vmatprep.subr.bf16.mxu0 %v4764_v16 }
 0x4e8   :  { %4767 = vmatpush3.bf16.msra.mxu0 %v4766_v51 }
 0x4e9   :  { %4770 = vmatprep.subr.msk.bf16.mxu0 %vm4769_vm3, %v4768_v36 }
 0x4ec   :  { %4772 = vmatpush3.bf16.msra.mxu0 %v4771_v30 }
 0x4ef   :  { %4501 = vmatmul.mubr.f32.vlgmr.msra.gmra.mrb[20].mxu0 %v4423_v7 }
 0x5c2   :  { %v4709_v12 = vpop.f32.mrb[20].mxu0 }
 0x5c3   :  { %v4710_v42 = vpop.f32.mrb[21].mxu0 }
 0x5c4   :  { %v4711_v37 = vadd.f32 %v4710_v42, %v4709_v12 }
 0x5c6   :  { %v4503_v58 = vadd.f32 %v4711_v37, %v4648_v46 }
 0x5c8   :  { %v4506_v5 = vmax.f32 %v4503_v58, 0.0 }
 0x5ca   :  { %4738 = vmatmul.mubr.msk.f32.vlgmr.msra.gmra.mrb[20].mxu1 %vm4515_vm5, %v4506_v5 }
 0x69d   :  { %v4585_v32 = vpop.f32.mrb[20].mxu1 }
 0x69e   :  { %v4591_v31 = vadd.f32 %v4652_v35, %v4585_v32  ;;  %v4739_v43 = vpop.f32.mrb[21].mxu1 }
 0x6a0   :  { %4593 = vst.msk [vmem:[#allocation8] sm:$0x1] %vm4592_vm6, %v4591_v31 }
 0x6a1   :  { %4835 = shalt.err (!%p4832_p4)
}
 0x6a2   :  { %s4836_s2 = scalar_lea.hbm %s7979_s5, 16 }
 0x6a3   :  { %p4837_p5 = scmp.ne.s32.totalorder %s7979_s5, %s4836_s2  ;;  %p4840_p6 = scmp.lt.u32.totalorder %s4836_s2, %s7979_s5 }
 0x6a5   :  { %p4842_p7 = pnand %p4840_p6, %p4837_p5 }
 0x6a7   :  { %4845 = shalt.err (!%p4842_p7)
}
 0x6a8   :  { %4603 = dma.vmem_to_hbm [thread:$0]  %s4601_s24, 16, %s7979_s5, [#allocation9]  }
 0x6a9   :  { %4850 = dma.done.wait [#allocation9], 16  }
 0x6aa   :  { %4851 = vsyncadd [#allocation9], 4294967280 }
 0x6ab   :  { %4607 = vsyncpa [#allocation9], 1 }
 0x6ac   :  { %4608 = vsyncmov [#allocation7] }
 0x6af   :  { %s4609_s3 = vpop.sfrf %4608 }
 0x6b0   :  { %p4653_p8 = scmp.ne.s32.totalorder %s4609_s3, 0 }
 0x6b2   :  { %4613 = shalt.err (%p4653_p8)  }
 0x6b3   :  { %4615 = vsyncmov [#allocation7 + $0x1] }
 0x6b6   :  { %s4616_s4 = vpop.sfrf %4615 }
 0x6b7   :  { %p4654_p9 = scmp.ne.s32.totalorder %s4616_s4, 0 }
 0x6b9   :  { %4620 = shalt.err (%p4654_p9)  }

</bundles_post_ra>
